<compile_context>
chip_gen: v5e
topology: v5e:2x2
jax: 0.10.0
libtpu: 0.0.40
codegen_flags: <defaults>
</compile_context>

<pallas_src>
import functools

import jax
import jax.numpy as jnp
from jax.experimental import pallas as pl
from jax.experimental.pallas import tpu as pltpu

HIDDEN = 512
N_HIDDEN_LAYERS = 4
EPS = 1e-5


def _label_predictor_kernel(h_ref, w_ref, gamma_ref, beta_ref, w5_ref, b5_ref, out_ref):
    # h_ref:     (B, 512)            f32
    # w_ref:     (4, 512, 512)       bf16   hidden Linear weights, stored (in, out)
    # gamma_ref: (4, 512)            f32    BN gamma per layer
    # beta_ref:  (4, 512)            f32    BN beta  per layer
    # w5_ref:    (512, n_pad)        bf16   head weight, lane-padded
    # b5_ref:    (1, n_pad)          f32    head bias,   lane-padded
    # out_ref:   (B, n_pad)          f32
    x = h_ref[...].astype(jnp.float32)
    gamma = gamma_ref[...]          # (4, 512) f32, loaded once
    beta = beta_ref[...]            # (4, 512) f32, loaded once

    for l in range(N_HIDDEN_LAYERS):           # static unroll
        w = w_ref[l].astype(jnp.float32)        # (512, 512) bf16 -> f32
        # Linear (bias dropped: cancelled exactly by batch-stat BatchNorm)
        y = jnp.dot(x, w, preferred_element_type=jnp.float32)
        # Fused BatchNorm1d (training-mode batch statistics, biased variance) + ReLU:
        mu = jnp.mean(y, axis=0, keepdims=True)
        m2 = jnp.mean(y * y, axis=0, keepdims=True)
        var = m2 - mu * mu
        s = gamma[l:l + 1, :] * jax.lax.rsqrt(var + EPS)   # (1, 512)
        shift = beta[l:l + 1, :] - mu * s                  # (1, 512)
        x = jnp.maximum(y * s + shift, 0.0)

    # Classifier head: (B, 512) @ (512, n_pad) + (1, n_pad)
    w5 = w5_ref[...].astype(jnp.float32)
    out = jnp.dot(x, w5, preferred_element_type=jnp.float32) + b5_ref[...]
    out_ref[...] = out.astype(out_ref.dtype)


@functools.partial(jax.jit, static_argnames=("class_nums",))
def label_predictor(h, packed, class_nums=2):
    """h: (B, 512) f32. packed: output of prepare_params()."""
    B = h.shape[0]
    w_stack = packed["w_stack"]     # (4, 512, 512) bf16
    gamma = packed["gamma"]         # (4, 512) f32
    beta = packed["beta"]           # (4, 512) f32
    w5 = packed["w5"]               # (512, n_pad) bf16
    b5 = packed["b5"]               # (1, n_pad) f32
    n_pad = w5.shape[1]

    flops = 2 * B * HIDDEN * HIDDEN * N_HIDDEN_LAYERS + 2 * B * HIDDEN * n_pad
    bytes_accessed = (
        w_stack.size * 2 + w5.size * 2                       # bf16 weights
        + (gamma.size + beta.size + b5.size) * 4             # f32 small params
        + h.size * 4 + B * n_pad * 4                         # activations in/out
    )

    vmem = pl.BlockSpec(memory_space=pltpu.MemorySpace.VMEM)
    out = pl.pallas_call(
        _label_predictor_kernel,
        out_shape=jax.ShapeDtypeStruct((B, n_pad), jnp.float32),
        in_specs=[vmem] * 6,
        out_specs=vmem,
        compiler_params=pltpu.CompilerParams(
            vmem_limit_bytes=32 * 1024 * 1024,   # explicit; safe on v5e/v6e/v7x
        ),
        cost_estimate=pl.CostEstimate(
            flops=flops, transcendentals=0, bytes_accessed=bytes_accessed),
    )(h, w_stack, gamma, beta, w5, b5)
    # Slice lane-padded head output back to class_nums.
    return out[:, :class_nums]


def init_params(key, class_nums=2):
    """PyTorch-like parameter shapes/init (f32), weights stored as (in, out)."""
    keys = jax.random.split(key, 10)
    params = {}
    scale = 1.0 / jnp.sqrt(HIDDEN)
    for i in range(N_HIDDEN_LAYERS):
        params[f"w{i+1}"] = jax.random.uniform(
            keys[2 * i], (HIDDEN, HIDDEN), jnp.float32, -scale, scale)
        params[f"b{i+1}"] = jax.random.uniform(
            keys[2 * i + 1], (1, HIDDEN), jnp.float32, -scale, scale)
        params[f"g{i+1}"] = jnp.ones((1, HIDDEN), jnp.float32)
        params[f"be{i+1}"] = jnp.zeros((1, HIDDEN), jnp.float32)
    params["w5"] = jax.random.uniform(
        keys[8], (HIDDEN, class_nums), jnp.float32, -scale, scale)
    params["b5"] = jax.random.uniform(
        keys[9], (1, class_nums), jnp.float32, -scale, scale)
    return params


def prepare_params(params, class_nums=2):
    """Pack params for the kernel: bf16 weight stacks, lane-padded head.

    Hidden biases b1..b4 are intentionally NOT packed: with training-mode
    BatchNorm they cancel exactly, so the kernel never needs them.
    """
    n_pad = ((class_nums + 127) // 128) * 128
    w_stack = jnp.stack(
        [params[f"w{i+1}"] for i in range(N_HIDDEN_LAYERS)]).astype(jnp.bfloat16)
    gamma = jnp.stack(
        [params[f"g{i+1}"].reshape(HIDDEN) for i in range(N_HIDDEN_LAYERS)])
    beta = jnp.stack(
        [params[f"be{i+1}"].reshape(HIDDEN) for i in range(N_HIDDEN_LAYERS)])
    w5 = jnp.zeros((HIDDEN, n_pad), jnp.float32)
    w5 = w5.at[:, :class_nums].set(params["w5"]).astype(jnp.bfloat16)
    b5 = jnp.zeros((1, n_pad), jnp.float32)
    b5 = b5.at[:, :class_nums].set(params["b5"])
    return {"w_stack": w_stack, "gamma": gamma, "beta": beta, "w5": w5, "b5": b5}


def label_predictor_ref(h, params):
    """Pure-JAX reference (module semantics: Linear WITH bias, training-mode BN).

    Uses the same bf16-quantized weights as the kernel so the comparison
    isolates kernel logic; keeps the hidden biases to demonstrate their exact
    cancellation by batch-stat BatchNorm.
    """
    x = h.astype(jnp.float32)
    for i in range(N_HIDDEN_LAYERS):
        w = params[f"w{i+1}"].astype(jnp.bfloat16).astype(jnp.float32)
        y = x @ w + params[f"b{i+1}"]
        mu = jnp.mean(y, axis=0, keepdims=True)
        var = jnp.mean((y - mu) ** 2, axis=0, keepdims=True)
        y = (y - mu) * jax.lax.rsqrt(var + EPS)
        y = y * params[f"g{i+1}"] + params[f"be{i+1}"]
        x = jnp.maximum(y, 0.0)
    w5 = params["w5"].astype(jnp.bfloat16).astype(jnp.float32)
    return x @ w5 + params["b5"]


if __name__ == "__main__":
    key = jax.random.PRNGKey(0)
    k_h, k_p = jax.random.split(key)

    B = 2            # BatchNorm1d in training mode needs B > 1
    class_nums = 2
    h = jax.random.normal(k_h, (B, HIDDEN), jnp.float32)
    params = init_params(k_p, class_nums=class_nums)
    packed = prepare_params(params, class_nums=class_nums)

    out = label_predictor(h, packed, class_nums=class_nums)
    out = jax.block_until_ready(out)

    ref = label_predictor_ref(h, params)
    assert out.shape == (B, class_nums)
    assert jnp.allclose(out, ref, atol=1e-2, rtol=1e-2)

    print("KERNEL_OK")
</pallas_src>

<mosaic_0001>
module attributes {stable_mosaic.version = 11 : i64} {
  func.func @_label_predictor_kernel(%arg0: memref<2x512xf32, #tpu.memory_space<vmem>>, %arg1: memref<4x512x512xbf16, #tpu.memory_space<vmem>>, %arg2: memref<4x512xf32, #tpu.memory_space<vmem>>, %arg3: memref<4x512xf32, #tpu.memory_space<vmem>>, %arg4: memref<512x128xbf16, #tpu.memory_space<vmem>>, %arg5: memref<1x128xf32, #tpu.memory_space<vmem>>, %arg6: memref<2x128xf32, #tpu.memory_space<vmem>>) attributes {dimension_semantics = [], scalar_prefetch = 0 : i64, scratch_operands = 0 : i64, tpu.core_type = #tpu.core_type<tc>} {
    %c0 = arith.constant 0 : index
    %c0_0 = arith.constant 0 : index
    %0 = vector.load %arg0[%c0, %c0_0] : memref<2x512xf32, #tpu.memory_space<vmem>>, vector<2x512xf32>
    %c0_1 = arith.constant 0 : index
    %c0_2 = arith.constant 0 : index
    %1 = vector.load %arg2[%c0_1, %c0_2] : memref<4x512xf32, #tpu.memory_space<vmem>>, vector<4x512xf32>
    %c0_3 = arith.constant 0 : index
    %c0_4 = arith.constant 0 : index
    %2 = vector.load %arg3[%c0_3, %c0_4] : memref<4x512xf32, #tpu.memory_space<vmem>>, vector<4x512xf32>
    %c0_5 = arith.constant 0 : index
    %c0_6 = arith.constant 0 : index
    %c0_7 = arith.constant 0 : index
    %3 = vector.load %arg1[%c0_5, %c0_6, %c0_7] : memref<4x512x512xbf16, #tpu.memory_space<vmem>>, vector<1x512x512xbf16>
    %4 = vector.shape_cast %3 : vector<1x512x512xbf16> to vector<512x512xbf16>
    %5 = arith.extf %4 : vector<512x512xbf16> to vector<512x512xf32>
    %cst = arith.constant dense<0.000000e+00> : vector<2x512xf32>
    %6 = tpu.matmul %0, %5, %cst {dimension_numbers = #tpu.dot_dimension_numbers<[1], [0], [0], [1], [0, 0, 1, 1], [], []>} : vector<2x512xf32>, vector<512x512xf32>, vector<2x512xf32> -> vector<2x512xf32>
    %cst_8 = arith.constant dense<0.000000e+00> : vector<512xf32>
    %7 = vector.multi_reduction <add>, %6, %cst_8 [0] : vector<2x512xf32> to vector<512xf32>
    %8 = vector.shape_cast %7 : vector<512xf32> to vector<1x512xf32>
    %cst_9 = arith.constant 2.000000e+00 : f32
    %9 = vector.broadcast %cst_9 : f32 to vector<1x512xf32>
    %10 = arith.divf %8, %9 : vector<1x512xf32>
    %11 = arith.mulf %6, %6 : vector<2x512xf32>
    %cst_10 = arith.constant dense<0.000000e+00> : vector<512xf32>
    %12 = vector.multi_reduction <add>, %11, %cst_10 [0] : vector<2x512xf32> to vector<512xf32>
    %13 = vector.shape_cast %12 : vector<512xf32> to vector<1x512xf32>
    %cst_11 = arith.constant 2.000000e+00 : f32
    %14 = vector.broadcast %cst_11 : f32 to vector<1x512xf32>
    %15 = arith.divf %13, %14 : vector<1x512xf32>
    %16 = arith.mulf %10, %10 : vector<1x512xf32>
    %17 = arith.subf %15, %16 : vector<1x512xf32>
    %18 = vector.extract_strided_slice %1 {offsets = [0, 0], sizes = [1, 512], strides = [1, 1]} : vector<4x512xf32> to vector<1x512xf32>
    %cst_12 = arith.constant 9.99999974E-6 : f32
    %19 = vector.broadcast %cst_12 : f32 to vector<1x512xf32>
    %20 = arith.addf %17, %19 : vector<1x512xf32>
    %21 = math.rsqrt %20 : vector<1x512xf32>
    %22 = arith.mulf %18, %21 : vector<1x512xf32>
    %23 = vector.extract_strided_slice %2 {offsets = [0, 0], sizes = [1, 512], strides = [1, 1]} : vector<4x512xf32> to vector<1x512xf32>
    %24 = arith.mulf %10, %22 : vector<1x512xf32>
    %25 = arith.subf %23, %24 : vector<1x512xf32>
    %26 = vector.broadcast %22 : vector<1x512xf32> to vector<2x512xf32>
    %27 = arith.mulf %6, %26 : vector<2x512xf32>
    %28 = vector.broadcast %25 : vector<1x512xf32> to vector<2x512xf32>
    %29 = arith.addf %27, %28 : vector<2x512xf32>
    %cst_13 = arith.constant 0.000000e+00 : f32
    %30 = vector.broadcast %cst_13 : f32 to vector<2x512xf32>
    %31 = arith.maximumf %29, %30 : vector<2x512xf32>
    %c1 = arith.constant 1 : index
    %c0_14 = arith.constant 0 : index
    %c0_15 = arith.constant 0 : index
    %32 = vector.load %arg1[%c1, %c0_14, %c0_15] : memref<4x512x512xbf16, #tpu.memory_space<vmem>>, vector<1x512x512xbf16>
    %33 = vector.shape_cast %32 : vector<1x512x512xbf16> to vector<512x512xbf16>
    %34 = arith.extf %33 : vector<512x512xbf16> to vector<512x512xf32>
    %cst_16 = arith.constant dense<0.000000e+00> : vector<2x512xf32>
    %35 = tpu.matmul %31, %34, %cst_16 {dimension_numbers = #tpu.dot_dimension_numbers<[1], [0], [0], [1], [0, 0, 1, 1], [], []>} : vector<2x512xf32>, vector<512x512xf32>, vector<2x512xf32> -> vector<2x512xf32>
    %cst_17 = arith.constant dense<0.000000e+00> : vector<512xf32>
    %36 = vector.multi_reduction <add>, %35, %cst_17 [0] : vector<2x512xf32> to vector<512xf32>
    %37 = vector.shape_cast %36 : vector<512xf32> to vector<1x512xf32>
    %cst_18 = arith.constant 2.000000e+00 : f32
    %38 = vector.broadcast %cst_18 : f32 to vector<1x512xf32>
    %39 = arith.divf %37, %38 : vector<1x512xf32>
    %40 = arith.mulf %35, %35 : vector<2x512xf32>
    %cst_19 = arith.constant dense<0.000000e+00> : vector<512xf32>
    %41 = vector.multi_reduction <add>, %40, %cst_19 [0] : vector<2x512xf32> to vector<512xf32>
    %42 = vector.shape_cast %41 : vector<512xf32> to vector<1x512xf32>
    %cst_20 = arith.constant 2.000000e+00 : f32
    %43 = vector.broadcast %cst_20 : f32 to vector<1x512xf32>
    %44 = arith.divf %42, %43 : vector<1x512xf32>
    %45 = arith.mulf %39, %39 : vector<1x512xf32>
    %46 = arith.subf %44, %45 : vector<1x512xf32>
    %47 = vector.extract_strided_slice %1 {offsets = [1, 0], sizes = [1, 512], strides = [1, 1]} : vector<4x512xf32> to vector<1x512xf32>
    %cst_21 = arith.constant 9.99999974E-6 : f32
    %48 = vector.broadcast %cst_21 : f32 to vector<1x512xf32>
    %49 = arith.addf %46, %48 : vector<1x512xf32>
    %50 = math.rsqrt %49 : vector<1x512xf32>
    %51 = arith.mulf %47, %50 : vector<1x512xf32>
    %52 = vector.extract_strided_slice %2 {offsets = [1, 0], sizes = [1, 512], strides = [1, 1]} : vector<4x512xf32> to vector<1x512xf32>
    %53 = arith.mulf %39, %51 : vector<1x512xf32>
    %54 = arith.subf %52, %53 : vector<1x512xf32>
    %55 = vector.broadcast %51 : vector<1x512xf32> to vector<2x512xf32>
    %56 = arith.mulf %35, %55 : vector<2x512xf32>
    %57 = vector.broadcast %54 : vector<1x512xf32> to vector<2x512xf32>
    %58 = arith.addf %56, %57 : vector<2x512xf32>
    %cst_22 = arith.constant 0.000000e+00 : f32
    %59 = vector.broadcast %cst_22 : f32 to vector<2x512xf32>
    %60 = arith.maximumf %58, %59 : vector<2x512xf32>
    %c2 = arith.constant 2 : index
    %c0_23 = arith.constant 0 : index
    %c0_24 = arith.constant 0 : index
    %61 = vector.load %arg1[%c2, %c0_23, %c0_24] : memref<4x512x512xbf16, #tpu.memory_space<vmem>>, vector<1x512x512xbf16>
    %62 = vector.shape_cast %61 : vector<1x512x512xbf16> to vector<512x512xbf16>
    %63 = arith.extf %62 : vector<512x512xbf16> to vector<512x512xf32>
    %cst_25 = arith.constant dense<0.000000e+00> : vector<2x512xf32>
    %64 = tpu.matmul %60, %63, %cst_25 {dimension_numbers = #tpu.dot_dimension_numbers<[1], [0], [0], [1], [0, 0, 1, 1], [], []>} : vector<2x512xf32>, vector<512x512xf32>, vector<2x512xf32> -> vector<2x512xf32>
    %cst_26 = arith.constant dense<0.000000e+00> : vector<512xf32>
    %65 = vector.multi_reduction <add>, %64, %cst_26 [0] : vector<2x512xf32> to vector<512xf32>
    %66 = vector.shape_cast %65 : vector<512xf32> to vector<1x512xf32>
    %cst_27 = arith.constant 2.000000e+00 : f32
    %67 = vector.broadcast %cst_27 : f32 to vector<1x512xf32>
    %68 = arith.divf %66, %67 : vector<1x512xf32>
    %69 = arith.mulf %64, %64 : vector<2x512xf32>
    %cst_28 = arith.constant dense<0.000000e+00> : vector<512xf32>
    %70 = vector.multi_reduction <add>, %69, %cst_28 [0] : vector<2x512xf32> to vector<512xf32>
    %71 = vector.shape_cast %70 : vector<512xf32> to vector<1x512xf32>
    %cst_29 = arith.constant 2.000000e+00 : f32
    %72 = vector.broadcast %cst_29 : f32 to vector<1x512xf32>
    %73 = arith.divf %71, %72 : vector<1x512xf32>
    %74 = arith.mulf %68, %68 : vector<1x512xf32>
    %75 = arith.subf %73, %74 : vector<1x512xf32>
    %76 = vector.extract_strided_slice %1 {offsets = [2, 0], sizes = [1, 512], strides = [1, 1]} : vector<4x512xf32> to vector<1x512xf32>
    %cst_30 = arith.constant 9.99999974E-6 : f32
    %77 = vector.broadcast %cst_30 : f32 to vector<1x512xf32>
    %78 = arith.addf %75, %77 : vector<1x512xf32>
    %79 = math.rsqrt %78 : vector<1x512xf32>
    %80 = arith.mulf %76, %79 : vector<1x512xf32>
    %81 = vector.extract_strided_slice %2 {offsets = [2, 0], sizes = [1, 512], strides = [1, 1]} : vector<4x512xf32> to vector<1x512xf32>
    %82 = arith.mulf %68, %80 : vector<1x512xf32>
    %83 = arith.subf %81, %82 : vector<1x512xf32>
    %84 = vector.broadcast %80 : vector<1x512xf32> to vector<2x512xf32>
    %85 = arith.mulf %64, %84 : vector<2x512xf32>
    %86 = vector.broadcast %83 : vector<1x512xf32> to vector<2x512xf32>
    %87 = arith.addf %85, %86 : vector<2x512xf32>
    %cst_31 = arith.constant 0.000000e+00 : f32
    %88 = vector.broadcast %cst_31 : f32 to vector<2x512xf32>
    %89 = arith.maximumf %87, %88 : vector<2x512xf32>
    %c3 = arith.constant 3 : index
    %c0_32 = arith.constant 0 : index
    %c0_33 = arith.constant 0 : index
    %90 = vector.load %arg1[%c3, %c0_32, %c0_33] : memref<4x512x512xbf16, #tpu.memory_space<vmem>>, vector<1x512x512xbf16>
    %91 = vector.shape_cast %90 : vector<1x512x512xbf16> to vector<512x512xbf16>
    %92 = arith.extf %91 : vector<512x512xbf16> to vector<512x512xf32>
    %cst_34 = arith.constant dense<0.000000e+00> : vector<2x512xf32>
    %93 = tpu.matmul %89, %92, %cst_34 {dimension_numbers = #tpu.dot_dimension_numbers<[1], [0], [0], [1], [0, 0, 1, 1], [], []>} : vector<2x512xf32>, vector<512x512xf32>, vector<2x512xf32> -> vector<2x512xf32>
    %cst_35 = arith.constant dense<0.000000e+00> : vector<512xf32>
    %94 = vector.multi_reduction <add>, %93, %cst_35 [0] : vector<2x512xf32> to vector<512xf32>
    %95 = vector.shape_cast %94 : vector<512xf32> to vector<1x512xf32>
    %cst_36 = arith.constant 2.000000e+00 : f32
    %96 = vector.broadcast %cst_36 : f32 to vector<1x512xf32>
    %97 = arith.divf %95, %96 : vector<1x512xf32>
    %98 = arith.mulf %93, %93 : vector<2x512xf32>
    %cst_37 = arith.constant dense<0.000000e+00> : vector<512xf32>
    %99 = vector.multi_reduction <add>, %98, %cst_37 [0] : vector<2x512xf32> to vector<512xf32>
    %100 = vector.shape_cast %99 : vector<512xf32> to vector<1x512xf32>
    %cst_38 = arith.constant 2.000000e+00 : f32
    %101 = vector.broadcast %cst_38 : f32 to vector<1x512xf32>
    %102 = arith.divf %100, %101 : vector<1x512xf32>
    %103 = arith.mulf %97, %97 : vector<1x512xf32>
    %104 = arith.subf %102, %103 : vector<1x512xf32>
    %105 = vector.extract_strided_slice %1 {offsets = [3, 0], sizes = [1, 512], strides = [1, 1]} : vector<4x512xf32> to vector<1x512xf32>
    %cst_39 = arith.constant 9.99999974E-6 : f32
    %106 = vector.broadcast %cst_39 : f32 to vector<1x512xf32>
    %107 = arith.addf %104, %106 : vector<1x512xf32>
    %108 = math.rsqrt %107 : vector<1x512xf32>
    %109 = arith.mulf %105, %108 : vector<1x512xf32>
    %110 = vector.extract_strided_slice %2 {offsets = [3, 0], sizes = [1, 512], strides = [1, 1]} : vector<4x512xf32> to vector<1x512xf32>
    %111 = arith.mulf %97, %109 : vector<1x512xf32>
    %112 = arith.subf %110, %111 : vector<1x512xf32>
    %113 = vector.broadcast %109 : vector<1x512xf32> to vector<2x512xf32>
    %114 = arith.mulf %93, %113 : vector<2x512xf32>
    %115 = vector.broadcast %112 : vector<1x512xf32> to vector<2x512xf32>
    %116 = arith.addf %114, %115 : vector<2x512xf32>
    %cst_40 = arith.constant 0.000000e+00 : f32
    %117 = vector.broadcast %cst_40 : f32 to vector<2x512xf32>
    %118 = arith.maximumf %116, %117 : vector<2x512xf32>
    %c0_41 = arith.constant 0 : index
    %c0_42 = arith.constant 0 : index
    %119 = vector.load %arg4[%c0_41, %c0_42] : memref<512x128xbf16, #tpu.memory_space<vmem>>, vector<512x128xbf16>
    %120 = arith.extf %119 : vector<512x128xbf16> to vector<512x128xf32>
    %cst_43 = arith.constant dense<0.000000e+00> : vector<2x128xf32>
    %121 = tpu.matmul %118, %120, %cst_43 {dimension_numbers = #tpu.dot_dimension_numbers<[1], [0], [0], [1], [0, 0, 1, 1], [], []>} : vector<2x512xf32>, vector<512x128xf32>, vector<2x128xf32> -> vector<2x128xf32>
    %c0_44 = arith.constant 0 : index
    %c0_45 = arith.constant 0 : index
    %122 = vector.load %arg5[%c0_44, %c0_45] : memref<1x128xf32, #tpu.memory_space<vmem>>, vector<1x128xf32>
    %123 = vector.broadcast %122 : vector<1x128xf32> to vector<2x128xf32>
    %124 = arith.addf %121, %123 : vector<2x128xf32>
    %c0_46 = arith.constant 0 : index
    %c0_47 = arith.constant 0 : index
    %125 = vector.load %arg6[%c0_46, %c0_47] : memref<2x128xf32, #tpu.memory_space<vmem>>, vector<2x128xf32>
    tpu.vector_store %arg6[%c0_46, %c0_47], %124 {strides = array<i32>} : memref<2x128xf32, #tpu.memory_space<vmem>>, vector<2x128xf32>,
    return
  }
}

</mosaic_0001>

<bundles_post_ra>
// kernel: label_predictor.1
= control target key start
LH: loop header
LB: loop body
LE: loop exit
PB: predicated region body
PF: predicated region fallthrough
CT: control target
= control target key end

     0   :  { %11 = vsyncpa [#allocation3], 0  ;;  %s7025_s0 = inlined_call_operand.hbm [shape: f32[2,512], index: 0, kind: input, shape index: {}]   ;;  %s7026_s1 = inlined_call_operand.hbm [shape: bf16[4,512,512], index: 1, kind: input, shape index: {}]   ;;  %s7027_s2 = inlined_call_operand.hbm [shape: f32[4,512], index: 2, kind: input, shape index: {}]   ;;  %s7028_s3 = inlined_call_operand.hbm [shape: f32[4,512], index: 3, kind: input, shape index: {}]   ;;  %s7029_s4 = inlined_call_operand.hbm [shape: bf16[512,128], index: 4, kind: input, shape index: {}]   ;;  %s7030_s5 = inlined_call_operand.hbm [shape: f32[1,128], index: 5, kind: input, shape index: {}]   ;;  %s7031_s6 = inlined_call_operand.hbm [shape: f32[2,128], index: 6, kind: output, shape index: {}]  }
   0x1   :  { %12 = vsyncpa [#allocation6], 0 }
   0x2   :  { %13 = vsyncpa [#allocation9], 0 }
   0x3   :  { %14 = vsyncpa [#allocation12], 0  ;;  %s31_s23 = sshll.u32 %s7026_s1, 4  ;;  %s32_s23 = int_to_ptr.hbm [resolvable:$true] %s31_s23 }
   0x4   :  { %15 = vsyncpa [#allocation4], 0  ;;  %s4346_s24 = smov [#allocation5]   ;;  %s56_s28 = sshll.u32 %s7028_s3, 4  ;;  %s57_s28 = int_to_ptr.hbm [resolvable:$true] %s56_s28 }
   0x5   :  { %s33_s25 = sshll.u32 %s4346_s24, 4  ;;  %s4347_s29 = smov 256   ;;  %s34_s25 = int_to_ptr.vmem [resolvable:$true] %s33_s25 }
   0x6   :  { %s4348_s30 = smov 16   ;;  %s4349_s7 = smov [#allocation8]  }
   0x7   :  { %39 = dma.hbm_to_vmem [thread:$0]  %s32_s23, 65536, %s34_s25, [#allocation6], %s4347_s29, %s4347_s29, %s4348_s30  }
   0x8   :  { %s58_s8 = sshll.u32 %s4349_s7, 4  ;;  %s21_s11 = sshll.u32 %s7025_s0, 4  ;;  %s59_s8 = int_to_ptr.vmem [resolvable:$true] %s58_s8  ;;  %s22_s11 = int_to_ptr.hbm [resolvable:$true] %s21_s11 }
   0x9   :  { %61 = dma.hbm_to_vmem [thread:$0]  %s57_s28, 256, %s59_s8, [#allocation9]  }
   0xa   :  { %s45_s13 = sshll.u32 %s7027_s2, 4  ;;  %s4350_s14 = smov [#allocation2]   ;;  %s46_s13 = int_to_ptr.hbm [resolvable:$true] %s45_s13 }
   0xb   :  { %s23_s15 = sshll.u32 %s4350_s14, 4  ;;  %s4351_s3 = smov [#allocation7]   ;;  %s24_s15 = int_to_ptr.vmem [resolvable:$true] %s23_s15 }
   0xc   :  { %26 = dma.hbm_to_vmem [thread:$0]  %s22_s11, 128, %s24_s15, [#allocation3]  }
   0xd   :  { %s47_s16 = sshll.u32 %s4351_s3, 4  ;;  %s66_s19 = sshll.u32 %s7029_s4, 4  ;;  %s48_s16 = int_to_ptr.vmem [resolvable:$true] %s47_s16  ;;  %s67_s19 = int_to_ptr.hbm [resolvable:$true] %s66_s19 }
   0xe   :  { %50 = dma.hbm_to_vmem [thread:$0]  %s46_s13, 256, %s48_s16, [#allocation6]  }
   0xf   :  { %s4352_s0 = smov [#allocation10]   ;;  %s80_s2 = sshll.u32 %s7030_s5, 4  ;;  %s81_s2 = int_to_ptr.hbm [resolvable:$true] %s80_s2 }
  0x10   :  { %s68_s20 = sshll.u32 %s4352_s0, 4  ;;  %s4353_s23 = smov 64   ;;  %s69_s20 = int_to_ptr.vmem [resolvable:$true] %s68_s20 }
  0x11   :  { %s4354_s24 = smov 4   ;;  %s4355_s25 = smov [#allocation11]  }
  0x12   :  { %74 = dma.hbm_to_vmem [thread:$0]  %s67_s19, 4096, %s69_s20, [#allocation9], %s4353_s23, %s4353_s23, %s4354_s24  }
  0x13   :  { %s82_s26 = sshll.u32 %s4355_s25, 4  ;;  %s83_s26 = int_to_ptr.vmem [resolvable:$true] %s82_s26 }
  0x14   :  { %85 = dma.hbm_to_vmem [thread:$0]  %s81_s2, 16, %s83_s26, [#allocation12]  }
  0x15   :  { %4336 = dma.done.wait [#allocation3], 128  }
  0x16   :  { %4337 = vsyncadd [#allocation3], 4294967168 }
  0x17   :  { %4338 = dma.done.wait [#allocation6], 65792  }
  0x18   :  { %4339 = vsyncadd [#allocation6], 4294901504 }
  0x19   :  { %4340 = dma.done.wait [#allocation9], 4352  }
  0x1a   :  { %4341 = vsyncadd [#allocation9], 4294962944 }
  0x1b   :  { %4342 = dma.done.wait [#allocation12], 16  }
  0x1c   :  { %4343 = vsyncadd [#allocation12], 4294967280  ;;  %v4411_v0 = vld [vmem:[#allocation5 + $0x2f0] sm:$0xff]  ;;  %v4413_v1 = vld [vmem:[#allocation5 + $0x2e0] sm:$0xff]  ;;  %vm829_vm0 = vcmask 1041408   ;;  %vm963_vm8 = vcmask 1043456  }
  0x1d   :  { %v4415_v2 = vld [vmem:[#allocation5 + $0x3f0] sm:$0xff]  ;;  %v431_v3 = vunpack.c.l.bf16 %v4411_v0  ;;  %v427_v4 = vunpack.c.l.bf16 %v4413_v1  ;;  %v4428_v11 = vld [vmem:[#allocation5 + $0x3e0] sm:$0xff]  ;;  %s4357_s4 = smov [#allocation13]   ;;  %s3937_s29 = sshll.u32 %s7031_s6, 4  ;;  %s3938_s29 = int_to_ptr.hbm [resolvable:$true] %s3937_s29 }
  0x1e   :  { %v495_v5 = vunpack.c.l.bf16 %v4415_v2  ;;  %v4420_v6 = vld [vmem:[#allocation5 + $0xf0] sm:$0xff]  ;;  %v4430_v12 = vld [vmem:[#allocation5 + $0xe0] sm:$0xff]  ;;  %v491_v15 = vunpack.c.l.bf16 %v4428_v11  ;;  %s3935_s5 = sshll.u32 %s4357_s4, 4  ;;  %s3936_s5 = int_to_ptr.vmem [resolvable:$true] %s3935_s5 }
  0x1f   :  { %v4422_v7 = vld [vmem:[#allocation5 + $0x1f0] sm:$0xff]  ;;  %v303_v9 = vunpack.c.l.bf16 %v4420_v6  ;;  %v4432_v13 = vld [vmem:[#allocation5 + $0x1e0] sm:$0xff]  ;;  %549 = vmatpush.msra.mxu2 %v431_v3  ;;  %v299_v16 = vunpack.c.l.bf16 %v4430_v12 }
  0x20   :  { %v4424_v8 = vld [vmem:[#allocation5 + $0x2d0] sm:$0xff]  ;;  %v367_v10 = vunpack.c.l.bf16 %v4422_v7  ;;  %569 = vmatpush.msra.mxu3 %v495_v5  ;;  %v363_v17 = vunpack.c.l.bf16 %v4432_v13  ;;  %v4438_v18 = vld [vmem:[#allocation5 + $0x2c0] sm:$0xff] }
  0x21   :  { %v423_v14 = vunpack.c.l.bf16 %v4424_v8  ;;  %v4440_v19 = vld [vmem:[#allocation5 + $0x3d0] sm:$0xff]  ;;  %509 = vmatpush.msra.mxu0 %v303_v9  ;;  %v4450_v25 = vld [vmem:[#allocation5 + $0x3c0] sm:$0xff]  ;;  %550 = vmatpush.msra.mxu2 %v427_v4  ;;  %v419_v26 = vunpack.c.l.bf16 %v4438_v18 }
  0x22   :  { %v4442_v20 = vld [vmem:[#allocation5 + $0xd0] sm:$0xff]  ;;  %529 = vmatpush.msra.mxu1 %v367_v10  ;;  %v487_v21 = vunpack.c.l.bf16 %v4440_v19  ;;  %570 = vmatpush.msra.mxu3 %v491_v15  ;;  %v483_v28 = vunpack.c.l.bf16 %v4450_v25  ;;  %v4455_v29 = vld [vmem:[#allocation5 + $0xc0] sm:$0xff] }
  0x23   :  { %v295_v22 = vunpack.c.l.bf16 %v4442_v20  ;;  %v4446_v23 = vld [vmem:[#allocation5 + $0x1d0] sm:$0xff]  ;;  %v4457_v30 = vld [vmem:[#allocation5 + $0x1c0] sm:$0xff]  ;;  %510 = vmatpush.msra.mxu0 %v299_v16  ;;  %v291_v32 = vunpack.c.l.bf16 %v4455_v29  ;;  %551 = vmatpush.msra.mxu2 %v423_v14 }
  0x24   :  { %v4448_v24 = vld [vmem:[#allocation5 + $0x2b0] sm:$0xff]  ;;  %v359_v27 = vunpack.c.l.bf16 %v4446_v23  ;;  %v4459_v31 = vld [vmem:[#allocation5 + $0x2a0] sm:$0xff]  ;;  %530 = vmatpush.msra.mxu1 %v363_v17  ;;  %v355_v33 = vunpack.c.l.bf16 %v4457_v30  ;;  %571 = vmatpush.msra.mxu3 %v487_v21 }
  0x25   :  { %v4463_v34 = vld [vmem:[#allocation5 + $0x3b0] sm:$0xff]  ;;  %v415_v37 = vunpack.c.l.bf16 %v4448_v24  ;;  %v4471_v39 = vld [vmem:[#allocation5 + $0x3a0] sm:$0xff]  ;;  %511 = vmatpush.msra.mxu0 %v295_v22  ;;  %552 = vmatpush.msra.mxu2 %v419_v26  ;;  %v411_v46 = vunpack.c.l.bf16 %v4459_v31 }
  0x26   :  { %v4465_v35 = vld [vmem:[#allocation5 + $0xb0] sm:$0xff]  ;;  %v479_v38 = vunpack.c.l.bf16 %v4463_v34  ;;  %v4473_v40 = vld [vmem:[#allocation5 + $0xa0] sm:$0xff]  ;;  %531 = vmatpush.msra.mxu1 %v359_v27  ;;  %572 = vmatpush.msra.mxu3 %v483_v28  ;;  %v475_v47 = vunpack.c.l.bf16 %v4471_v39 }
  0x27   :  { %v4467_v36 = vld [vmem:[#allocation5 + $0x1b0] sm:$0xff]  ;;  %v287_v41 = vunpack.c.l.bf16 %v4465_v35  ;;  %v4479_v44 = vld [vmem:[#allocation5 + $0x1a0] sm:$0xff]  ;;  %512 = vmatpush.msra.mxu0 %v291_v32  ;;  %v283_v50 = vunpack.c.l.bf16 %v4473_v40  ;;  %553 = vmatpush.msra.mxu2 %v415_v37 }
  0x28   :  { %v351_v42 = vunpack.c.l.bf16 %v4467_v36  ;;  %v4477_v43 = vld [vmem:[#allocation5 + $0x290] sm:$0xff]  ;;  %532 = vmatpush.msra.mxu1 %v355_v33  ;;  %v347_v51 = vunpack.c.l.bf16 %v4479_v44  ;;  %v4491_v52 = vld [vmem:[#allocation5 + $0x280] sm:$0xff]  ;;  %573 = vmatpush.msra.mxu3 %v479_v38 }
  0x29   :  { %v4481_v45 = vld [vmem:[#allocation5 + $0x390] sm:$0xff]  ;;  %v4493_v53 = vld [vmem:[#allocation5 + $0x380] sm:$0xff]  ;;  %v407_v54 = vunpack.c.l.bf16 %v4477_v43  ;;  %513 = vmatpush.msra.mxu0 %v287_v41  ;;  %554 = vmatpush.msra.mxu2 %v411_v46  ;;  %v403_v62 = vunpack.c.l.bf16 %v4491_v52 }
  0x2a   :  { %v4485_v48 = vld [vmem:[#allocation5 + $0x90] sm:$0xff]  ;;  %v471_v55 = vunpack.c.l.bf16 %v4481_v45  ;;  %v4497_v56 = vld [vmem:[#allocation5 + $0x80] sm:$0xff]  ;;  %533 = vmatpush.msra.mxu1 %v351_v42  ;;  %574 = vmatpush.msra.mxu3 %v475_v47  ;;  %v467_v63 = vunpack.c.l.bf16 %v4493_v53 }
  0x2b   :  { %v4487_v49 = vld [vmem:[#allocation5 + $0x190] sm:$0xff]  ;;  %v4499_v57 = vld [vmem:[#allocation5 + $0x180] sm:$0xff]  ;;  %v279_v58 = vunpack.c.l.bf16 %v4485_v48  ;;  %514 = vmatpush.msra.mxu0 %v283_v50  ;;  %v275_v5 = vunpack.c.l.bf16 %v4497_v56  ;;  %555 = vmatpush.msra.mxu2 %v407_v54 }
  0x2c   :  { %v343_v59 = vunpack.c.l.bf16 %v4487_v49  ;;  %v4503_v60 = vld [vmem:[#allocation5 + $0x270] sm:$0xff]  ;;  %534 = vmatpush.msra.mxu1 %v347_v51  ;;  %v339_v9 = vunpack.c.l.bf16 %v4499_v57  ;;  %v4515_v10 = vld [vmem:[#allocation5 + $0x260] sm:$0xff]  ;;  %575 = vmatpush.msra.mxu3 %v471_v55 }
  0x2d   :  { %v4505_v61 = vld [vmem:[#allocation5 + $0x370] sm:$0xff]  ;;  %v4517_v14 = vld [vmem:[#allocation5 + $0x360] sm:$0xff]  ;;  %v399_v15 = vunpack.c.l.bf16 %v4503_v60  ;;  %515 = vmatpush.msra.mxu0 %v279_v58  ;;  %556 = vmatpush.msra.mxu2 %v403_v62  ;;  %v395_v32 = vunpack.c.l.bf16 %v4515_v10 }
  0x2e   :  { %v4509_v3 = vld [vmem:[#allocation5 + $0x70] sm:$0xff]  ;;  %v463_v16 = vunpack.c.l.bf16 %v4505_v61  ;;  %v4521_v17 = vld [vmem:[#allocation5 + $0x60] sm:$0xff]  ;;  %535 = vmatpush.msra.mxu1 %v343_v59  ;;  %576 = vmatpush.msra.mxu3 %v467_v63  ;;  %v459_v33 = vunpack.c.l.bf16 %v4517_v14 }
  0x2f   :  { %v4511_v4 = vld [vmem:[#allocation5 + $0x170] sm:$0xff]  ;;  %v4523_v21 = vld [vmem:[#allocation5 + $0x160] sm:$0xff]  ;;  %v271_v22 = vunpack.c.l.bf16 %v4509_v3  ;;  %516 = vmatpush.msra.mxu0 %v275_v5  ;;  %v267_v41 = vunpack.c.l.bf16 %v4521_v17  ;;  %557 = vmatpush.msra.mxu2 %v399_v15 }
  0x30   :  { %v335_v26 = vunpack.c.l.bf16 %v4511_v4  ;;  %v4527_v27 = vld [vmem:[#allocation5 + $0x250] sm:$0xff]  ;;  %536 = vmatpush.msra.mxu1 %v339_v9  ;;  %v331_v42 = vunpack.c.l.bf16 %v4523_v21  ;;  %v4539_v46 = vld [vmem:[#allocation5 + $0x240] sm:$0xff]  ;;  %577 = vmatpush.msra.mxu3 %v463_v16 }
  0x31   :  { %v4529_v28 = vld [vmem:[#allocation5 + $0x350] sm:$0xff]  ;;  %7077 = vst [vmem:[#allocation22_spill] sm:$0xff] %v4539_v46  ;;  %v4541_v47 = vld [vmem:[#allocation5 + $0x340] sm:$0xff]  ;;  %v391_v50 = vunpack.c.l.bf16 %v4527_v27  ;;  %517 = vmatpush.msra.mxu0 %v271_v22  ;;  %558 = vmatpush.msra.mxu2 %v395_v32  ;;  %v387_v9 = vunpack.c.l.bf16 %v4539_v46  ;;  %v110_v22 = vld [vmem:[#allocation2] sm:$0xff] }
  0x32   :  { %7074 = vst [vmem:[#allocation19_spill] sm:$0xff] %v4529_v28  ;;  %v4533_v37 = vld [vmem:[#allocation5 + $0x50] sm:$0xff]  ;;  %v455_v51 = vunpack.c.l.bf16 %v4529_v28  ;;  %v4545_v54 = vld [vmem:[#allocation5 + $0x40] sm:$0xff]  ;;  %537 = vmatpush.msra.mxu1 %v335_v26  ;;  %578 = vmatpush.msra.mxu3 %v459_v33  ;;  %v451_v15 = vunpack.c.l.bf16 %v4541_v47 }
  0x33   :  { %7075 = vst [vmem:[#allocation20_spill] sm:$0xff] %v4533_v37  ;;  %v4535_v38 = vld [vmem:[#allocation5 + $0x150] sm:$0xff]  ;;  %v4547_v55 = vld [vmem:[#allocation5 + $0x140] sm:$0xff]  ;;  %v263_v58 = vunpack.c.l.bf16 %v4533_v37  ;;  %518 = vmatpush.msra.mxu0 %v267_v41  ;;  %v259_v26 = vunpack.c.l.bf16 %v4545_v54  ;;  %559 = vmatpush.msra.mxu2 %v391_v50 }
  0x34   :  { %7076 = vst [vmem:[#allocation21_spill] sm:$0xff] %v4535_v38  ;;  %v327_v59 = vunpack.c.l.bf16 %v4535_v38  ;;  %v4551_v62 = vld [vmem:[#allocation5 + $0x230] sm:$0xff]  ;;  %538 = vmatpush.msra.mxu1 %v331_v42  ;;  %v323_v38 = vunpack.c.l.bf16 %v4547_v55  ;;  %v4563_v37 = vld [vmem:[#allocation5 + $0x220] sm:$0xff]  ;;  %579 = vmatpush.msra.mxu3 %v455_v51 }
  0x35   :  { %7078 = vst [vmem:[#allocation23_spill] sm:$0xff] %v4541_v47  ;;  %v4553_v63 = vld [vmem:[#allocation5 + $0x330] sm:$0xff]  ;;  %v4565_v28 = vld [vmem:[#allocation5 + $0x320] sm:$0xff]  ;;  %v383_v32 = vunpack.c.l.bf16 %v4551_v62  ;;  %519 = vmatpush.msra.mxu0 %v263_v58  ;;  %560 = vmatpush.msra.mxu2 %v387_v9  ;;  %v379_v50 = vunpack.c.l.bf16 %v4563_v37 }
  0x36   :  { %7079 = vst [vmem:[#allocation24_spill] sm:$0xff] %v4545_v54  ;;  %v4555_v5 = vld [vmem:[#allocation5 + $0x30] sm:$0xff]  ;;  %v447_v33 = vunpack.c.l.bf16 %v4553_v63  ;;  %v4569_v47 = vld [vmem:[#allocation5 + $0x20] sm:$0xff]  ;;  %539 = vmatpush.msra.mxu1 %v327_v59  ;;  %580 = vmatpush.msra.mxu3 %v451_v15  ;;  %v443_v51 = vunpack.c.l.bf16 %v4565_v28 }
  0x37   :  { %7080 = vst [vmem:[#allocation25_spill] sm:$0xff] %v4547_v55  ;;  %v4559_v16 = vld [vmem:[#allocation5 + $0x130] sm:$0xff]  ;;  %v4571_v46 = vld [vmem:[#allocation5 + $0x120] sm:$0xff]  ;;  %v255_v41 = vunpack.c.l.bf16 %v4555_v5  ;;  %520 = vmatpush.msra.mxu0 %v259_v26  ;;  %v251_v58 = vunpack.c.l.bf16 %v4569_v47  ;;  %561 = vmatpush.msra.mxu2 %v383_v32 }
  0x38   :  { %7081 = vst [vmem:[#allocation26_spill] sm:$0xff] %v4553_v63  ;;  %v319_v42 = vunpack.c.l.bf16 %v4559_v16  ;;  %v4575_v55 = vld [vmem:[#allocation5 + $0x210] sm:$0xff]  ;;  %540 = vmatpush.msra.mxu1 %v323_v38  ;;  %v315_v59 = vunpack.c.l.bf16 %v4571_v46  ;;  %581 = vmatpush.msra.mxu3 %v447_v33  ;;  %v4595_v26 = vld [vmem:[#allocation5] sm:$0xff]  ;;  %v432_v33 = vunpack.c.h.bf16 %v4411_v0  ;;  %v492_v0 = vunpack.c.h.bf16 %v4428_v11 }
  0x39   :  { %7082 = vst [vmem:[#allocation27_spill] sm:$0xff] %v4555_v5  ;;  %v4577_v54 = vld [vmem:[#allocation5 + $0x310] sm:$0xff]  ;;  %v4589_v5 = vld [vmem:[#allocation5 + $0x300] sm:$0xff]  ;;  %v375_v9 = vunpack.c.l.bf16 %v4575_v55  ;;  %521 = vmatpush.msra.mxu0 %v255_v41  ;;  %562 = vmatpush.msra.mxu2 %v379_v50  ;;  %v496_v41 = vunpack.c.h.bf16 %v4415_v2  ;;  %v428_v50 = vunpack.c.h.bf16 %v4413_v1  ;;  %v424_v2 = vunpack.c.h.bf16 %v4424_v8 }
  0x3a   :  { %7083 = vst [vmem:[#allocation28_spill] sm:$0xff] %v4559_v16  ;;  %v4583_v63 = vld [vmem:[#allocation5 + $0x110] sm:$0xff]  ;;  %v4587_v16 = vld [vmem:[#allocation5 + $0x200] sm:$0xff]  ;;  %v439_v15 = vunpack.c.l.bf16 %v4577_v54  ;;  %541 = vmatpush.msra.mxu1 %v319_v42  ;;  %582 = vmatpush.msra.mxu3 %v443_v51  ;;  %v435_v32 = vunpack.c.l.bf16 %v4589_v5  ;;  %v243_v42 = vunpack.c.l.bf16 %v4595_v26  ;;  %v304_v51 = vunpack.c.h.bf16 %v4420_v6 }
  0x3b   :  { %7084 = vst [vmem:[#allocation29_spill] sm:$0xff] %v4565_v28  ;;  %v311_v38 = vunpack.c.l.bf16 %v4583_v63  ;;  %522 = vmatpush.msra.mxu0 %v251_v58  ;;  %563 = vmatpush.msra.mxu2 %v375_v9  ;;  %v368_v58 = vunpack.c.h.bf16 %v4422_v7  ;;  %v488_v1 = vunpack.c.h.bf16 %v4440_v19  ;;  %v420_v6 = vunpack.c.h.bf16 %v4438_v18 }
  0x3c   :  { %500 = vst [vmem:[#allocation1] ss:$4 sm:$0xff] %v110_v22  ;;  %v4581_v22 = vld [vmem:[#allocation5 + $0x10] sm:$0xff]  ;;  %542 = vmatpush.msra.mxu1 %v315_v59  ;;  %583 = vmatpush.msra.mxu3 %v439_v15  ;;  %v300_v59 = vunpack.c.h.bf16 %v4430_v12  ;;  %v296_v7 = vunpack.c.h.bf16 %v4442_v20  ;;  %v360_v11 = vunpack.c.h.bf16 %v4446_v23  ;;  %v484_v8 = vunpack.c.h.bf16 %v4450_v25 }
  0x3d   :  { %7085 = vst [vmem:[#allocation30_spill] sm:$0xff] %v4569_v47  ;;  %v247_v28 = vunpack.c.l.bf16 %v4581_v22  ;;  %v4597_v47 = vld [vmem:[#allocation5 + $0x100] sm:$0xff]  ;;  %v416_v12 = vunpack.c.h.bf16 %v4448_v24  ;;  %v356_v19 = vunpack.c.h.bf16 %v4457_v30  ;;  %v412_v20 = vunpack.c.h.bf16 %v4459_v31 }
  0x3e   :  { %7086 = vst [vmem:[#allocation31_spill] sm:$0xff] %v4571_v46  ;;  %v371_v46 = vunpack.c.l.bf16 %v4587_v16  ;;  %543 = vmatpush.msra.mxu1 %v311_v38  ;;  %584 = vmatpush.msra.mxu3 %v435_v32  ;;  %v480_v23 = vunpack.c.h.bf16 %v4463_v34  ;;  %v288_v25 = vunpack.c.h.bf16 %v4465_v35  ;;  %v408_v30 = vunpack.c.h.bf16 %v4477_v43  ;;  %v7088_v38 = vld [vmem:[#allocation22_spill] sm:$0xff] }
  0x3f   :  { %7087 = vst [vmem:[#allocation32_spill] sm:$0xff] %v4583_v63  ;;  %v307_v63 = vunpack.c.l.bf16 %v4597_v47  ;;  %523 = vmatpush.msra.mxu0 %v247_v28  ;;  %v364_v28 = vunpack.c.h.bf16 %v4432_v13  ;;  %v292_v13 = vunpack.c.h.bf16 %v4455_v29  ;;  %v352_v29 = vunpack.c.h.bf16 %v4467_v36 }
  0x40   :  { %564 = vmatpush.msra.mxu2 %v371_v46  ;;  %649 = vmatpush.msrb.mxu3 %v496_v41  ;;  %v476_v46 = vunpack.c.h.bf16 %v4471_v39  ;;  %v284_v34 = vunpack.c.h.bf16 %v4473_v40  ;;  %v348_v36 = vunpack.c.h.bf16 %v4479_v44  ;;  %v404_v43 = vunpack.c.h.bf16 %v4491_v52 }
  0x41   :  { %524 = vmatpush.msra.mxu0 %v243_v42  ;;  %544 = vmatpush.msra.mxu1 %v307_v63  ;;  %v472_v63 = vunpack.c.h.bf16 %v4481_v45  ;;  %v280_v39 = vunpack.c.h.bf16 %v4485_v48  ;;  %v344_v40 = vunpack.c.h.bf16 %v4487_v49  ;;  %v400_v9 = vunpack.c.h.bf16 %v4503_v60 }
  0x42   :  { %629 = vmatpush.msrb.mxu2 %v432_v33  ;;  %650 = vmatpush.msrb.mxu3 %v492_v0  ;;  %v468_v44 = vunpack.c.h.bf16 %v4493_v53  ;;  %v276_v52 = vunpack.c.h.bf16 %v4497_v56  ;;  %v340_v45 = vunpack.c.h.bf16 %v4499_v57  ;;  %v396_v48 = vunpack.c.h.bf16 %v4515_v10  ;;  %v7090_v33 = vld [vmem:[#allocation20_spill] sm:$0xff] }
  0x43   :  { %589 = vmatpush.msrb.mxu0 %v304_v51  ;;  %609 = vmatpush.msrb.mxu1 %v368_v58  ;;  %v4620_v18 = vld.sshfl [vmem:[#allocation1 + $0x10] sm:$0xff pattern:$0x73625140]  ;;  %v4625_v24 = vld.sshfl [vmem:[#allocation1 + $0x18] sm:$0xff pattern:$0x73625140]  ;;  %v464_v15 = vunpack.c.h.bf16 %v4505_v61  ;;  %v272_v49 = vunpack.c.h.bf16 %v4509_v3  ;;  %v336_v60 = vunpack.c.h.bf16 %v4511_v4  ;;  %v392_v53 = vunpack.c.h.bf16 %v4527_v27 }
  0x44   :  { %630 = vmatpush.msrb.mxu2 %v428_v50  ;;  %651 = vmatpush.msrb.mxu3 %v488_v1  ;;  %v4631_v31 = vld.sshfl [vmem:[#allocation1] sm:$0xff pattern:$0x73625140]  ;;  %v4635_v35 = vld.sshfl [vmem:[#allocation1 + $0x8] sm:$0xff pattern:$0x73625140]  ;;  %v460_v56 = vunpack.c.h.bf16 %v4517_v14  ;;  %v268_v57 = vunpack.c.h.bf16 %v4521_v17  ;;  %v332_v10 = vunpack.c.h.bf16 %v4523_v21  ;;  %v388_v61 = vunpack.c.h.bf16 %v7088_v38 }
  0x45   :  { %590 = vmatpush.msrb.mxu0 %v300_v59  ;;  %610 = vmatpush.msrb.mxu1 %v364_v28  ;;  %v7089_v3 = vld [vmem:[#allocation19_spill] sm:$0xff]  ;;  %v264_v4 = vunpack.c.h.bf16 %v7090_v33  ;;  %v7091_v27 = vld [vmem:[#allocation21_spill] sm:$0xff]  ;;  %v384_v14 = vunpack.c.h.bf16 %v4551_v62  ;;  %v7093_v50 = vld [vmem:[#allocation24_spill] sm:$0xff]  ;;  %v380_v0 = vunpack.c.h.bf16 %v4563_v37 }
  0x46   :  { %631 = vmatpush.msrb.mxu2 %v424_v2  ;;  %652 = vmatpush.msrb.mxu3 %v484_v8  ;;  %v456_v32 = vunpack.c.h.bf16 %v7089_v3  ;;  %v328_v41 = vunpack.c.h.bf16 %v7091_v27  ;;  %v7092_v17 = vld [vmem:[#allocation23_spill] sm:$0xff]  ;;  %v260_v21 = vunpack.c.h.bf16 %v7093_v50  ;;  %v7094_v51 = vld [vmem:[#allocation25_spill] sm:$0xff]  ;;  %v7095_v2 = vld [vmem:[#allocation26_spill] sm:$0xff] }
  0x47   :  { %591 = vmatpush.msrb.mxu0 %v296_v7  ;;  %611 = vmatpush.msrb.mxu1 %v360_v11  ;;  %v452_v42 = vunpack.c.h.bf16 %v7092_v17  ;;  %v324_v58 = vunpack.c.h.bf16 %v7094_v51  ;;  %v448_v59 = vunpack.c.h.bf16 %v7095_v2  ;;  %v7096_v28 = vld [vmem:[#allocation27_spill] sm:$0xff]  ;;  %v7097_v62 = vld [vmem:[#allocation28_spill] sm:$0xff]  ;;  %v376_v7 = vunpack.c.h.bf16 %v4575_v55  ;;  %v7098_v11 = vld [vmem:[#allocation29_spill] sm:$0xff] }
  0x48   :  { %632 = vmatpush.msrb.mxu2 %v420_v6  ;;  %653 = vmatpush.msrb.mxu3 %v480_v23  ;;  %v256_v1 = vunpack.c.h.bf16 %v7096_v28  ;;  %v320_v6 = vunpack.c.h.bf16 %v7097_v62  ;;  %v444_v8 = vunpack.c.h.bf16 %v7098_v11  ;;  %v7100_v37 = vld [vmem:[#allocation31_spill] sm:$0xff]  ;;  %v372_v23 = vunpack.c.h.bf16 %v4587_v16  ;;  %v4733_v17 = vld [vmem:[#allocation5 + $0x3b8] sm:$0xff] }
  0x49   :  { %592 = vmatpush.msrb.mxu0 %v292_v13  ;;  %565 = vmatmul.f32.vlgmr.msra.gmra.mxu2 %v4620_v18  ;;  %v436_v16 = vunpack.c.h.bf16 %v4589_v5  ;;  %v308_v5 = vunpack.c.h.bf16 %v4597_v47  ;;  %v4707_v47 = vld [vmem:[#allocation5 + $0x3d8] sm:$0xff]  ;;  %v4722_v3 = vld [vmem:[#allocation5 + $0xc8] sm:$0xff] }
  0x4a   :  { %633 = vmatpush.msrb.mxu2 %v416_v12  ;;  %612 = vmatpush.msrb.mxu1 %v356_v19  ;;  %v7099_v12 = vld [vmem:[#allocation30_spill] sm:$0xff]  ;;  %v4729_v27 = vld [vmem:[#allocation5 + $0x2a8] sm:$0xff] }
  0x4b   :  { %585 = vmatmul.f32.vlgmr.msra.gmra.mxu3 %v4625_v24  ;;  %593 = vmatpush.msrb.mxu0 %v288_v25  ;;  %v252_v13 = vunpack.c.h.bf16 %v7099_v12  ;;  %v4671_v19 = vld [vmem:[#allocation5 + $0x2f8] sm:$0xff]  ;;  %v440_v25 = vunpack.c.h.bf16 %v4577_v54  ;;  %v413_v2 = vunpack.c.l.bf16 %v4729_v27  ;;  %v4747_v28 = vld [vmem:[#allocation5 + $0xa8] sm:$0xff] }
  0x4c   :  { %634 = vmatpush.msrb.mxu2 %v412_v20  ;;  %613 = vmatpush.msrb.mxu1 %v352_v29  ;;  %v316_v20 = vunpack.c.h.bf16 %v7100_v37  ;;  %v4676_v29 = vld [vmem:[#allocation5 + $0x2e8] sm:$0xff]  ;;  %v433_v55 = vunpack.c.l.bf16 %v4671_v19  ;;  %v4739_v51 = vld [vmem:[#allocation5 + $0x1b8] sm:$0xff] }
  0x4d   :  { %654 = vmatpush.msrb.mxu3 %v476_v46  ;;  %525 = vmatmul.f32.vlgmr.msra.gmra.mxu0 %v4631_v31  ;;  %v4680_v46 = vld [vmem:[#allocation5 + $0x3f8] sm:$0xff]  ;;  %v429_v54 = vunpack.c.l.bf16 %v4676_v29  ;;  %v353_v11 = vunpack.c.l.bf16 %v4739_v51 }
  0x4e   :  { %635 = vmatpush.msrb.mxu2 %v408_v30  ;;  %545 = vmatmul.f32.vlgmr.msra.gmra.mxu1 %v4635_v35  ;;  %v248_v30 = vunpack.c.h.bf16 %v4581_v22  ;;  %v244_v22 = vunpack.c.h.bf16 %v4595_v26  ;;  %v4757_v12 = vld [vmem:[#allocation5 + $0x398] sm:$0xff] }
  0x4f   :  { %594 = vmatpush.msrb.mxu0 %v284_v34  ;;  %614 = vmatpush.msrb.mxu1 %v348_v36  ;;  %v7101_v34 = vld [vmem:[#allocation32_spill] sm:$0xff] }
  0x50   :  { %636 = vmatpush.msrb.mxu2 %v404_v43  ;;  %655 = vmatpush.msrb.mxu3 %v472_v63  ;;  %v312_v36 = vunpack.c.h.bf16 %v7101_v34  ;;  %v4685_v43 = vld [vmem:[#allocation5 + $0xf8] sm:$0xff]  ;;  %v497_v63 = vunpack.c.l.bf16 %v4680_v46  ;;  %v4769_v34 = vld [vmem:[#allocation5 + $0x388] sm:$0xff] }
  0x51   :  { %595 = vmatpush.msrb.mxu0 %v280_v39  ;;  %615 = vmatpush.msrb.mxu1 %v344_v40  ;;  %v4690_v39 = vld [vmem:[#allocation5 + $0x1f8] sm:$0xff] }
  0x52   :  { %637 = vmatpush.msrb.mxu2 %v400_v9  ;;  %656 = vmatpush.msrb.mxu3 %v468_v44  ;;  %v4692_v40 = vld [vmem:[#allocation5 + $0x2d8] sm:$0xff]  ;;  %v4695_v9 = vld [vmem:[#allocation5 + $0x3e8] sm:$0xff]  ;;  %v369_v26 = vunpack.c.l.bf16 %v4690_v39 }
  0x53   :  { %596 = vmatpush.msrb.mxu0 %v276_v52  ;;  %616 = vmatpush.msrb.mxu1 %v340_v45  ;;  %v4697_v44 = vld [vmem:[#allocation5 + $0xe8] sm:$0xff]  ;;  %v305_v52 = vunpack.c.l.bf16 %v4685_v43 }
  0x54   :  { %638 = vmatpush.msrb.mxu2 %v396_v48  ;;  %657 = vmatpush.msrb.mxu3 %v464_v15  ;;  %v4700_v45 = vld [vmem:[#allocation5 + $0x1e8] sm:$0xff]  ;;  %v425_v15 = vunpack.c.l.bf16 %v4692_v40 }
  0x55   :  { %597 = vmatpush.msrb.mxu0 %v272_v49  ;;  %617 = vmatpush.msrb.mxu1 %v336_v60  ;;  %v4702_v48 = vld [vmem:[#allocation5 + $0x2c8] sm:$0xff]  ;;  %v4709_v49 = vld [vmem:[#allocation5 + $0xd8] sm:$0xff]  ;;  %v493_v60 = vunpack.c.l.bf16 %v4695_v9 }
  0x56   :  { %639 = vmatpush.msrb.mxu2 %v392_v53  ;;  %658 = vmatpush.msrb.mxu3 %v460_v56  ;;  %v301_v53 = vunpack.c.l.bf16 %v4697_v44  ;;  %v4713_v56 = vld [vmem:[#allocation5 + $0x1d8] sm:$0xff]  ;;  %v421_v38 = vunpack.c.l.bf16 %v4702_v48  ;;  %v297_v33 = vunpack.c.l.bf16 %v4709_v49 }
  0x57   :  { %598 = vmatpush.msrb.mxu0 %v268_v57  ;;  %618 = vmatpush.msrb.mxu1 %v332_v10  ;;  %v4715_v57 = vld [vmem:[#allocation5 + $0x2b8] sm:$0xff]  ;;  %v365_v10 = vunpack.c.l.bf16 %v4700_v45 }
  0x58   :  { %640 = vmatpush.msrb.mxu2 %v388_v61  ;;  %659 = vmatpush.msrb.mxu3 %v456_v32  ;;  %v4720_v61 = vld [vmem:[#allocation5 + $0x3c8] sm:$0xff]  ;;  %v489_v32 = vunpack.c.l.bf16 %v4707_v47 }
  0x59   :  { %599 = vmatpush.msrb.mxu0 %v264_v4  ;;  %619 = vmatpush.msrb.mxu1 %v328_v41  ;;  %v4727_v4 = vld [vmem:[#allocation5 + $0x1c8] sm:$0xff]  ;;  %v361_v41 = vunpack.c.l.bf16 %v4713_v56  ;;  %v485_v50 = vunpack.c.l.bf16 %v4720_v61 }
  0x5a   :  { %641 = vmatpush.msrb.mxu2 %v384_v14  ;;  %660 = vmatpush.msrb.mxu3 %v452_v42  ;;  %v417_v14 = vunpack.c.l.bf16 %v4715_v57  ;;  %v4735_v42 = vld [vmem:[#allocation5 + $0xb8] sm:$0xff] }
  0x5b   :  { %600 = vmatpush.msrb.mxu0 %v260_v21  ;;  %620 = vmatpush.msrb.mxu1 %v324_v58  ;;  %v293_v21 = vunpack.c.l.bf16 %v4722_v3  ;;  %v4741_v58 = vld [vmem:[#allocation5 + $0x298] sm:$0xff]  ;;  %v289_v62 = vunpack.c.l.bf16 %v4735_v42 }
  0x5c   :  { %642 = vmatpush.msrb.mxu2 %v380_v0  ;;  %661 = vmatpush.msrb.mxu3 %v448_v59  ;;  %v357_v0 = vunpack.c.l.bf16 %v4727_v4  ;;  %v4745_v59 = vld [vmem:[#allocation5 + $0x3a8] sm:$0xff] }
  0x5d   :  { %601 = vmatpush.msrb.mxu0 %v256_v1  ;;  %621 = vmatpush.msrb.mxu1 %v320_v6  ;;  %v481_v1 = vunpack.c.l.bf16 %v4733_v17  ;;  %v4751_v6 = vld [vmem:[#allocation5 + $0x1a8] sm:$0xff]  ;;  %v477_v37 = vunpack.c.l.bf16 %v4745_v59 }
  0x5e   :  { %643 = vmatpush.msrb.mxu2 %v376_v7  ;;  %662 = vmatpush.msrb.mxu3 %v444_v8  ;;  %v4753_v7 = vld [vmem:[#allocation5 + $0x288] sm:$0xff]  ;;  %v409_v8 = vunpack.c.l.bf16 %v4741_v58 }
  0x5f   :  { %602 = vmatpush.msrb.mxu0 %v252_v13  ;;  %622 = vmatpush.msrb.mxu1 %v316_v20  ;;  %v4759_v13 = vld [vmem:[#allocation5 + $0x98] sm:$0xff]  ;;  %v285_v20 = vunpack.c.l.bf16 %v4747_v28 }
  0x60   :  { %644 = vmatpush.msrb.mxu2 %v372_v23  ;;  %663 = vmatpush.msrb.mxu3 %v440_v25  ;;  %v4763_v23 = vld [vmem:[#allocation5 + $0x198] sm:$0xff] }
  0x61   :  { %645 = vmatmul.f32.vlgmr.msrb.gmra.mxu2 %v4620_v18  ;;  %603 = vmatpush.msrb.mxu0 %v248_v30  ;;  %v4765_v25 = vld [vmem:[#allocation5 + $0x278] sm:$0xff]  ;;  %v405_v30 = vunpack.c.l.bf16 %v4753_v7 }
  0x62   :  { %709 = vmatpush.msra.mxu2 %v433_v55  ;;  %623 = vmatpush.msrb.mxu1 %v312_v36  ;;  %v349_v55 = vunpack.c.l.bf16 %v4751_v6  ;;  %v4771_v36 = vld [vmem:[#allocation5 + $0x88] sm:$0xff] }
  0x63   :  { %664 = vmatpush.msrb.mxu3 %v436_v16  ;;  %604 = vmatpush.msrb.mxu0 %v244_v22  ;;  %v473_v16 = vunpack.c.l.bf16 %v4757_v12  ;;  %v4777_v22 = vld [vmem:[#allocation5 + $0x268] sm:$0xff] }
  0x64   :  { %665 = vmatmul.f32.vlgmr.msrb.gmra.mxu3 %v4625_v24  ;;  %710 = vmatpush.msra.mxu2 %v429_v54  ;;  %v281_v54 = vunpack.c.l.bf16 %v4759_v13 }
  0x65   :  { %729 = vmatpush.msra.mxu3 %v497_v63  ;;  %624 = vmatpush.msrb.mxu1 %v308_v5  ;;  %v4775_v63 = vld [vmem:[#allocation5 + $0x188] sm:$0xff]  ;;  %v345_v5 = vunpack.c.l.bf16 %v4763_v23 }
  0x66   :  { %605 = vmatmul.f32.vlgmr.msrb.gmra.mxu0 %v4631_v31  ;;  %625 = vmatmul.f32.vlgmr.msrb.gmra.mxu1 %v4635_v35 }
  0x67   :  { %669 = vmatpush.msra.mxu0 %v305_v52  ;;  %689 = vmatpush.msra.mxu1 %v369_v26  ;;  %v401_v52 = vunpack.c.l.bf16 %v4765_v25  ;;  %v4781_v26 = vld [vmem:[#allocation5 + $0x378] sm:$0xff] }
  0x68   :  { %711 = vmatpush.msra.mxu2 %v425_v15  ;;  %730 = vmatpush.msra.mxu3 %v493_v60  ;;  %v4783_v15 = vld [vmem:[#allocation5 + $0x78] sm:$0xff]  ;;  %v469_v60 = vunpack.c.l.bf16 %v4769_v34 }
  0x69   :  { %670 = vmatpush.msra.mxu0 %v301_v53  ;;  %690 = vmatpush.msra.mxu1 %v365_v10  ;;  %v277_v53 = vunpack.c.l.bf16 %v4771_v36  ;;  %v4787_v10 = vld [vmem:[#allocation5 + $0x178] sm:$0xff] }
  0x6a   :  { %712 = vmatpush.msra.mxu2 %v421_v38  ;;  %731 = vmatpush.msra.mxu3 %v489_v32  ;;  %v4789_v38 = vld [vmem:[#allocation5 + $0x258] sm:$0xff]  ;;  %v341_v32 = vunpack.c.l.bf16 %v4775_v63 }
  0x6b   :  { %671 = vmatpush.msra.mxu0 %v297_v33  ;;  %691 = vmatpush.msra.mxu1 %v361_v41  ;;  %v397_v33 = vunpack.c.l.bf16 %v4777_v22  ;;  %v4793_v41 = vld [vmem:[#allocation5 + $0x368] sm:$0xff] }
  0x6c   :  { %713 = vmatpush.msra.mxu2 %v417_v14  ;;  %732 = vmatpush.msra.mxu3 %v485_v50  ;;  %7102 = vst [vmem:[#allocation22_spill] sm:$0xff] %v4793_v41  ;;  %v4795_v14 = vld [vmem:[#allocation5 + $0x68] sm:$0xff]  ;;  %v465_v50 = vunpack.c.l.bf16 %v4781_v26 }
  0x6d   :  { %672 = vmatpush.msra.mxu0 %v293_v21  ;;  %692 = vmatpush.msra.mxu1 %v357_v0  ;;  %7103 = vst [vmem:[#allocation19_spill] sm:$0xff] %v4795_v14  ;;  %v273_v21 = vunpack.c.l.bf16 %v4783_v15  ;;  %v4799_v0 = vld [vmem:[#allocation5 + $0x168] sm:$0xff] }
  0x6e   :  { %714 = vmatpush.msra.mxu2 %v413_v2  ;;  %733 = vmatpush.msra.mxu3 %v481_v1  ;;  %7104 = vst [vmem:[#allocation20_spill] sm:$0xff] %v4799_v0  ;;  %v4801_v2 = vld [vmem:[#allocation5 + $0x248] sm:$0xff]  ;;  %v337_v1 = vunpack.c.l.bf16 %v4787_v10 }
  0x6f   :  { %673 = vmatpush.msra.mxu0 %v289_v62  ;;  %693 = vmatpush.msra.mxu1 %v353_v11  ;;  %7105 = vst [vmem:[#allocation21_spill] sm:$0xff] %v4801_v2  ;;  %v393_v62 = vunpack.c.l.bf16 %v4789_v38  ;;  %v4805_v11 = vld [vmem:[#allocation5 + $0x358] sm:$0xff] }
  0x70   :  { %715 = vmatpush.msra.mxu2 %v409_v8  ;;  %734 = vmatpush.msra.mxu3 %v477_v37  ;;  %7106 = vst [vmem:[#allocation23_spill] sm:$0xff] %v4805_v11  ;;  %v4807_v8 = vld [vmem:[#allocation5 + $0x58] sm:$0xff]  ;;  %v461_v37 = vunpack.c.l.bf16 %v4793_v41  ;;  %v4825_v41 = vld [vmem:[#allocation5 + $0x228] sm:$0xff] }
  0x71   :  { %674 = vmatpush.msra.mxu0 %v285_v20  ;;  %694 = vmatpush.msra.mxu1 %v349_v55  ;;  %7107 = vst [vmem:[#allocation24_spill] sm:$0xff] %v4807_v8  ;;  %v269_v20 = vunpack.c.l.bf16 %v4795_v14  ;;  %v4811_v55 = vld [vmem:[#allocation5 + $0x158] sm:$0xff]  ;;  %v4823_v14 = vld [vmem:[#allocation5 + $0x148] sm:$0xff] }
  0x72   :  { %716 = vmatpush.msra.mxu2 %v405_v30  ;;  %735 = vmatpush.msra.mxu3 %v473_v16  ;;  %7108 = vst [vmem:[#allocation25_spill] sm:$0xff] %v4811_v55  ;;  %v4813_v30 = vld [vmem:[#allocation5 + $0x238] sm:$0xff]  ;;  %v333_v16 = vunpack.c.l.bf16 %v4799_v0 }
  0x73   :  { %675 = vmatpush.msra.mxu0 %v281_v54  ;;  %695 = vmatpush.msra.mxu1 %v345_v5  ;;  %7109 = vst [vmem:[#allocation26_spill] sm:$0xff] %v4813_v30  ;;  %v389_v54 = vunpack.c.l.bf16 %v4801_v2  ;;  %v4817_v5 = vld [vmem:[#allocation5 + $0x348] sm:$0xff]  ;;  %v4829_v2 = vld [vmem:[#allocation5 + $0x338] sm:$0xff] }
  0x74   :  { %717 = vmatpush.msra.mxu2 %v401_v52  ;;  %736 = vmatpush.msra.mxu3 %v469_v60  ;;  %7110 = vst [vmem:[#allocation27_spill] sm:$0xff] %v4817_v5  ;;  %v4819_v52 = vld [vmem:[#allocation5 + $0x48] sm:$0xff]  ;;  %v457_v60 = vunpack.c.l.bf16 %v4805_v11  ;;  %v4831_v0 = vld [vmem:[#allocation5 + $0x38] sm:$0xff] }
  0x75   :  { %676 = vmatpush.msra.mxu0 %v277_v53  ;;  %696 = vmatpush.msra.mxu1 %v341_v32  ;;  %7111 = vst [vmem:[#allocation28_spill] sm:$0xff] %v4819_v52  ;;  %v265_v53 = vunpack.c.l.bf16 %v4807_v8  ;;  %v329_v32 = vunpack.c.l.bf16 %v4811_v55  ;;  %v4835_v8 = vld [vmem:[#allocation5 + $0x138] sm:$0xff]  ;;  %v4843_v55 = vld [vmem:[#allocation5 + $0x28] sm:$0xff] }
  0x76   :  { %718 = vmatpush.msra.mxu2 %v397_v33  ;;  %737 = vmatpush.msra.mxu3 %v465_v50  ;;  %7112 = vst [vmem:[#allocation29_spill] sm:$0xff] %v4825_v41  ;;  %v385_v33 = vunpack.c.l.bf16 %v4813_v30  ;;  %v453_v50 = vunpack.c.l.bf16 %v4817_v5  ;;  %v4837_v11 = vld [vmem:[#allocation5 + $0x218] sm:$0xff]  ;;  %v4841_v30 = vld [vmem:[#allocation5 + $0x328] sm:$0xff] }
  0x77   :  { %677 = vmatpush.msra.mxu0 %v273_v21  ;;  %697 = vmatpush.msra.mxu1 %v337_v1  ;;  %7113 = vst [vmem:[#allocation30_spill] sm:$0xff] %v4829_v2  ;;  %v261_v21 = vunpack.c.l.bf16 %v4819_v52  ;;  %v325_v1 = vunpack.c.l.bf16 %v4823_v14  ;;  %v4847_v52 = vld [vmem:[#allocation5 + $0x128] sm:$0xff] }
  0x78   :  { %719 = vmatpush.msra.mxu2 %v393_v62  ;;  %7114 = vst [vmem:[#allocation31_spill] sm:$0xff] %v4831_v0  ;;  %738 = vmatpush.msra.mxu3 %v461_v37  ;;  %v381_v62 = vunpack.c.l.bf16 %v4825_v41  ;;  %v449_v37 = vunpack.c.l.bf16 %v4829_v2  ;;  %v4849_v5 = vld [vmem:[#allocation5 + $0x208] sm:$0xff]  ;;  %v4853_v41 = vld [vmem:[#allocation5 + $0x318] sm:$0xff] }
  0x79   :  { %678 = vmatpush.msra.mxu0 %v269_v20  ;;  %7115 = vst [vmem:[#allocation32_spill] sm:$0xff] %v4835_v8  ;;  %698 = vmatpush.msra.mxu1 %v333_v16  ;;  %v257_v20 = vunpack.c.l.bf16 %v4831_v0  ;;  %v321_v16 = vunpack.c.l.bf16 %v4835_v8  ;;  %v4857_v2 = vld [vmem:[#allocation5 + $0x18] sm:$0xff]  ;;  %v4863_v8 = vld [vmem:[#allocation5 + $0x308] sm:$0xff] }
  0x7a   :  { %720 = vmatpush.msra.mxu2 %v389_v54  ;;  %7116 = vst [vmem:[#allocation33_spill] sm:$0xff] %v4841_v30  ;;  %739 = vmatpush.msra.mxu3 %v457_v60  ;;  %v377_v54 = vunpack.c.l.bf16 %v4837_v11  ;;  %v445_v60 = vunpack.c.l.bf16 %v4841_v30  ;;  %v4859_v0 = vld [vmem:[#allocation5 + $0x118] sm:$0xff] }
  0x7b   :  { %7117 = vst [vmem:[#allocation34_spill] sm:$0xff] %v4843_v55  ;;  %679 = vmatpush.msra.mxu0 %v265_v53  ;;  %699 = vmatpush.msra.mxu1 %v329_v32  ;;  %v253_v53 = vunpack.c.l.bf16 %v4843_v55  ;;  %v317_v32 = vunpack.c.l.bf16 %v4847_v52  ;;  %v249_v55 = vunpack.c.l.bf16 %v4857_v2  ;;  %v313_v30 = vunpack.c.l.bf16 %v4859_v0 }
  0x7c   :  { %7118 = vst [vmem:[#allocation35_spill] sm:$0xff] %v4849_v5  ;;  %721 = vmatpush.msra.mxu2 %v385_v33  ;;  %740 = vmatpush.msra.mxu3 %v453_v50  ;;  %v373_v33 = vunpack.c.l.bf16 %v4849_v5  ;;  %v441_v50 = vunpack.c.l.bf16 %v4853_v41  ;;  %v437_v5 = vunpack.c.l.bf16 %v4863_v8 }
  0x7d   :  { %680 = vmatpush.msra.mxu0 %v261_v21  ;;  %700 = vmatpush.msra.mxu1 %v325_v1  ;;  %v434_v21 = vunpack.c.h.bf16 %v4671_v19  ;;  %v4869_v1 = vld [vmem:[#allocation5 + $0x8] sm:$0xff]  ;;  %v498_v19 = vunpack.c.h.bf16 %v4680_v46  ;;  %v302_v46 = vunpack.c.h.bf16 %v4697_v44  ;;  %v418_v44 = vunpack.c.h.bf16 %v4715_v57 }
  0x7e   :  { %722 = vmatpush.msra.mxu2 %v381_v62  ;;  %741 = vmatpush.msra.mxu3 %v449_v37  ;;  %v4871_v62 = vld [vmem:[#allocation5 + $0x108] sm:$0xff]  ;;  %v430_v37 = vunpack.c.h.bf16 %v4676_v29  ;;  %v494_v29 = vunpack.c.h.bf16 %v4695_v9  ;;  %v362_v9 = vunpack.c.h.bf16 %v4713_v56  ;;  %v290_v56 = vunpack.c.h.bf16 %v4735_v42 }
  0x7f   :  { %681 = vmatpush.msra.mxu0 %v257_v20  ;;  %701 = vmatpush.msra.mxu1 %v321_v16  ;;  %v245_v20 = vunpack.c.l.bf16 %v4869_v1  ;;  %v309_v16 = vunpack.c.l.bf16 %v4871_v62  ;;  %v354_v57 = vunpack.c.h.bf16 %v4739_v51  ;;  %v474_v42 = vunpack.c.h.bf16 %v4757_v12 }
  0x80   :  { %723 = vmatpush.msra.mxu2 %v377_v54  ;;  %742 = vmatpush.msra.mxu3 %v445_v60  ;;  %v306_v54 = vunpack.c.h.bf16 %v4685_v43  ;;  %v370_v60 = vunpack.c.h.bf16 %v4690_v39  ;;  %v366_v43 = vunpack.c.h.bf16 %v4700_v45  ;;  %v490_v39 = vunpack.c.h.bf16 %v4707_v47 }
  0x81   :  { %682 = vmatpush.msra.mxu0 %v253_v53  ;;  %702 = vmatpush.msra.mxu1 %v317_v32  ;;  %v426_v53 = vunpack.c.h.bf16 %v4692_v40  ;;  %v298_v40 = vunpack.c.h.bf16 %v4709_v49  ;;  %v486_v45 = vunpack.c.h.bf16 %v4720_v61  ;;  %v358_v47 = vunpack.c.h.bf16 %v4727_v4  ;;  %v7120_v32 = vld [vmem:[#allocation19_spill] sm:$0xff] }
  0x82   :  { %724 = vmatpush.msra.mxu2 %v373_v33  ;;  %743 = vmatpush.msra.mxu3 %v441_v50  ;;  %v414_v49 = vunpack.c.h.bf16 %v4729_v27  ;;  %v410_v61 = vunpack.c.h.bf16 %v4741_v58  ;;  %v286_v4 = vunpack.c.h.bf16 %v4747_v28  ;;  %v350_v27 = vunpack.c.h.bf16 %v4751_v6  ;;  %v7122_v50 = vld [vmem:[#allocation21_spill] sm:$0xff] }
  0x83   :  { %683 = vmatpush.msra.mxu0 %v249_v55  ;;  %703 = vmatpush.msra.mxu1 %v313_v30  ;;  %v422_v55 = vunpack.c.h.bf16 %v4702_v48  ;;  %v294_v48 = vunpack.c.h.bf16 %v4722_v3  ;;  %v482_v30 = vunpack.c.h.bf16 %v4733_v17  ;;  %v478_v3 = vunpack.c.h.bf16 %v4745_v59 }
  0x84   :  { %789 = vmatpush.msrb.mxu2 %v434_v21  ;;  %744 = vmatpush.msra.mxu3 %v437_v5  ;;  %v406_v17 = vunpack.c.h.bf16 %v4753_v7  ;;  %v282_v51 = vunpack.c.h.bf16 %v4759_v13  ;;  %v346_v58 = vunpack.c.h.bf16 %v4763_v23  ;;  %v402_v59 = vunpack.c.h.bf16 %v4765_v25 }
  0x85   :  { %725 = vmatmul.f32.vlgmr.msra.gmra.mxu2 %v4620_v18  ;;  %684 = vmatpush.msra.mxu0 %v245_v20  ;;  %v470_v28 = vunpack.c.h.bf16 %v4769_v34  ;;  %v278_v6 = vunpack.c.h.bf16 %v4771_v36  ;;  %v342_v7 = vunpack.c.h.bf16 %v4775_v63  ;;  %v398_v12 = vunpack.c.h.bf16 %v4777_v22  ;;  %v7119_v36 = vld [vmem:[#allocation22_spill] sm:$0xff]  ;;  %v7121_v22 = vld [vmem:[#allocation20_spill] sm:$0xff] }
  0x86   :  { %790 = vmatpush.msrb.mxu2 %v430_v37  ;;  %809 = vmatpush.msrb.mxu3 %v498_v19  ;;  %v466_v13 = vunpack.c.h.bf16 %v4781_v26  ;;  %v274_v23 = vunpack.c.h.bf16 %v4783_v15  ;;  %v338_v25 = vunpack.c.h.bf16 %v4787_v10  ;;  %v394_v34 = vunpack.c.h.bf16 %v4789_v38  ;;  %v7123_v15 = vld [vmem:[#allocation23_spill] sm:$0xff]  ;;  %v7124_v37 = vld [vmem:[#allocation24_spill] sm:$0xff]  ;;  %v7125_v38 = vld [vmem:[#allocation25_spill] sm:$0xff] }
  0x87   :  { %704 = vmatpush.msra.mxu1 %v309_v16  ;;  %745 = vmatmul.f32.vlgmr.msra.gmra.mxu3 %v4625_v24  ;;  %v462_v5 = vunpack.c.h.bf16 %v7119_v36  ;;  %v270_v63 = vunpack.c.h.bf16 %v7120_v32  ;;  %v334_v33 = vunpack.c.h.bf16 %v7121_v22  ;;  %v390_v26 = vunpack.c.h.bf16 %v7122_v50  ;;  %v7126_v20 = vld [vmem:[#allocation26_spill] sm:$0xff] }
  0x88   :  { %749 = vmatpush.msrb.mxu0 %v306_v54  ;;  %791 = vmatpush.msrb.mxu2 %v426_v53  ;;  %v458_v21 = vunpack.c.h.bf16 %v7123_v15  ;;  %v266_v10 = vunpack.c.h.bf16 %v7124_v37  ;;  %v330_v19 = vunpack.c.h.bf16 %v7125_v38  ;;  %v386_v16 = vunpack.c.h.bf16 %v7126_v20  ;;  %v7127_v54 = vld [vmem:[#allocation27_spill] sm:$0xff]  ;;  %v7128_v53 = vld [vmem:[#allocation28_spill] sm:$0xff] }
  0x89   :  { %769 = vmatpush.msrb.mxu1 %v370_v60  ;;  %810 = vmatpush.msrb.mxu3 %v494_v29  ;;  %v454_v60 = vunpack.c.h.bf16 %v7127_v54  ;;  %v262_v29 = vunpack.c.h.bf16 %v7128_v53  ;;  %v4970_v32 = vld [vmem:[#allocation5 + $0x4c0] sm:$0xff]  ;;  %v4982_v37 = vld [vmem:[#allocation5 + $0x5b0] sm:$0xff] }
  0x8a   :  { %685 = vmatmul.f32.vlgmr.msra.gmra.mxu0 %v4631_v31  ;;  %705 = vmatmul.f32.vlgmr.msra.gmra.mxu1 %v4635_v35  ;;  %v1203_v50 = vunpack.c.l.bf16 %v4970_v32  ;;  %v4987_v54 = vld [vmem:[#allocation5 + $0x4a0] sm:$0xff] }
  0x8b   :  { %750 = vmatpush.msrb.mxu0 %v302_v46  ;;  %770 = vmatpush.msrb.mxu1 %v366_v43  ;;  %v326_v46 = vunpack.c.h.bf16 %v4823_v14  ;;  %v7129_v43 = vld [vmem:[#allocation29_spill] sm:$0xff] }
  0x8c   :  { %792 = vmatpush.msrb.mxu2 %v422_v55  ;;  %811 = vmatpush.msrb.mxu3 %v490_v39  ;;  %v382_v55 = vunpack.c.h.bf16 %v7129_v43  ;;  %v7130_v39 = vld [vmem:[#allocation30_spill] sm:$0xff] }
  0x8d   :  { %751 = vmatpush.msrb.mxu0 %v298_v40  ;;  %771 = vmatpush.msrb.mxu1 %v362_v9  ;;  %v450_v40 = vunpack.c.h.bf16 %v7130_v39  ;;  %v7131_v9 = vld [vmem:[#allocation31_spill] sm:$0xff]  ;;  %v4994_v39 = vld [vmem:[#allocation5 + $0x490] sm:$0xff] }
  0x8e   :  { %793 = vmatpush.msrb.mxu2 %v418_v44  ;;  %812 = vmatpush.msrb.mxu3 %v486_v45  ;;  %v258_v44 = vunpack.c.h.bf16 %v7131_v9  ;;  %v7132_v45 = vld [vmem:[#allocation32_spill] sm:$0xff]  ;;  %v1191_v9 = vunpack.c.l.bf16 %v4994_v39 }
  0x8f   :  { %752 = vmatpush.msrb.mxu0 %v294_v48  ;;  %772 = vmatpush.msrb.mxu1 %v358_v47  ;;  %v322_v48 = vunpack.c.h.bf16 %v7132_v45  ;;  %v378_v47 = vunpack.c.h.bf16 %v4837_v11  ;;  %v250_v11 = vunpack.c.h.bf16 %v4857_v2 }
  0x90   :  { %794 = vmatpush.msrb.mxu2 %v414_v49  ;;  %813 = vmatpush.msrb.mxu3 %v482_v30  ;;  %v7133_v49 = vld [vmem:[#allocation33_spill] sm:$0xff] }
  0x91   :  { %753 = vmatpush.msrb.mxu0 %v290_v56  ;;  %773 = vmatpush.msrb.mxu1 %v354_v57  ;;  %v446_v30 = vunpack.c.h.bf16 %v7133_v49  ;;  %v7134_v56 = vld [vmem:[#allocation34_spill] sm:$0xff]  ;;  %v318_v57 = vunpack.c.h.bf16 %v4847_v52  ;;  %v246_v52 = vunpack.c.h.bf16 %v4869_v1  ;;  %v4951_v1 = vld [vmem:[#allocation5 + $0x5f0] sm:$0xff] }
  0x92   :  { %795 = vmatpush.msrb.mxu2 %v410_v61  ;;  %814 = vmatpush.msrb.mxu3 %v478_v3  ;;  %v254_v14 = vunpack.c.h.bf16 %v7134_v56  ;;  %v7135_v61 = vld [vmem:[#allocation35_spill] sm:$0xff] }
  0x93   :  { %754 = vmatpush.msrb.mxu0 %v286_v4  ;;  %774 = vmatpush.msrb.mxu1 %v350_v27  ;;  %v374_v3 = vunpack.c.h.bf16 %v7135_v61  ;;  %v442_v4 = vunpack.c.h.bf16 %v4853_v41  ;;  %v314_v27 = vunpack.c.h.bf16 %v4859_v0  ;;  %v4356_v41 = vmov 2.0   ;;  %v5002_v49 = vld [vmem:[#allocation5 + $0x580] sm:$0xff] }
  0x94   :  { %796 = vmatpush.msrb.mxu2 %v406_v17  ;;  %815 = vmatpush.msrb.mxu3 %v474_v42  ;;  %v438_v17 = vunpack.c.h.bf16 %v4863_v8  ;;  %v310_v42 = vunpack.c.h.bf16 %v4871_v62  ;;  %4122 = vrcp.f32 %v4356_v41  ;;  %v5016_v41 = vld [vmem:[#allocation5 + $0x560] sm:$0xff] }
  0x95   :  { %755 = vmatpush.msrb.mxu0 %v282_v51  ;;  %775 = vmatpush.msrb.mxu1 %v346_v58  ;;  %v1279_v58 = vunpack.c.l.bf16 %v4951_v1 }
  0x96   :  { %797 = vmatpush.msrb.mxu2 %v402_v59  ;;  %816 = vmatpush.msrb.mxu3 %v470_v28  ;;  %v4956_v59 = vld [vmem:[#allocation5 + $0x4e0] sm:$0xff] }
  0x97   :  { %756 = vmatpush.msrb.mxu0 %v278_v6  ;;  %776 = vmatpush.msrb.mxu1 %v342_v7  ;;  %v1211_v7 = vunpack.c.l.bf16 %v4956_v59 }
  0x98   :  { %798 = vmatpush.msrb.mxu2 %v398_v12  ;;  %817 = vmatpush.msrb.mxu3 %v466_v13  ;;  %v4962_v13 = vld [vmem:[#allocation5 + $0x4d0] sm:$0xff] }
  0x99   :  { %757 = vmatpush.msrb.mxu0 %v274_v23  ;;  %777 = vmatpush.msrb.mxu1 %v338_v25  ;;  %v4964_v23 = vld [vmem:[#allocation5 + $0x5d0] sm:$0xff] }
  0x9a   :  { %799 = vmatpush.msrb.mxu2 %v394_v34  ;;  %818 = vmatpush.msrb.mxu3 %v462_v5  ;;  %v4947_v0 = vpop.eup %4122  ;;  %v1207_v34 = vunpack.c.l.bf16 %v4962_v13  ;;  %v1271_v36 = vunpack.c.l.bf16 %v4964_v23 }
  0x9b   :  { %758 = vmatpush.msrb.mxu0 %v270_v63  ;;  %778 = vmatpush.msrb.mxu1 %v334_v33  ;;  %v4972_v63 = vld [vmem:[#allocation5 + $0x5c0] sm:$0xff]  ;;  %vm863_vm1 = vweird.f32 %v4947_v0 }
  0x9c   :  { %800 = vmatpush.msrb.mxu2 %v390_v26  ;;  %819 = vmatpush.msrb.mxu3 %v458_v21  ;;  %v1267_v26 = vunpack.c.l.bf16 %v4972_v63  ;;  %v4980_v21 = vld [vmem:[#allocation5 + $0x4b0] sm:$0xff] }
  0x9d   :  { %759 = vmatpush.msrb.mxu0 %v266_v10  ;;  %779 = vmatpush.msrb.mxu1 %v330_v19  ;;  %v1199_v38 = vunpack.c.l.bf16 %v4980_v21  ;;  %v1263_v19 = vunpack.c.l.bf16 %v4982_v37 }
  0x9e   :  { %801 = vmatpush.msrb.mxu2 %v386_v16  ;;  %820 = vmatpush.msrb.mxu3 %v454_v60  ;;  %v4989_v60 = vld [vmem:[#allocation5 + $0x5a0] sm:$0xff] }
  0x9f   :  { %760 = vmatpush.msrb.mxu0 %v262_v29  ;;  %780 = vmatpush.msrb.mxu1 %v326_v46  ;;  %v1195_v29 = vunpack.c.l.bf16 %v4987_v54  ;;  %v1259_v46 = vunpack.c.l.bf16 %v4989_v60 }
  0xa0   :  { %802 = vmatpush.msrb.mxu2 %v382_v55  ;;  %821 = vmatpush.msrb.mxu3 %v450_v40  ;;  %v4996_v40 = vld [vmem:[#allocation5 + $0x590] sm:$0xff] }
  0xa1   :  { %761 = vmatpush.msrb.mxu0 %v258_v44  ;;  %781 = vmatpush.msrb.mxu1 %v322_v48  ;;  %v1255_v44 = vunpack.c.l.bf16 %v4996_v40 }
  0xa2   :  { %803 = vmatpush.msrb.mxu2 %v378_v47  ;;  %822 = vmatpush.msrb.mxu3 %v446_v30  ;;  %v5000_v47 = vld [vmem:[#allocation5 + $0x480] sm:$0xff] }
  0xa3   :  { %762 = vmatpush.msrb.mxu0 %v254_v14  ;;  %782 = vmatpush.msrb.mxu1 %v318_v57  ;;  %v1187_v56 = vunpack.c.l.bf16 %v5000_v47  ;;  %v1251_v14 = vunpack.c.l.bf16 %v5002_v49 }
  0xa4   :  { %804 = vmatpush.msrb.mxu2 %v374_v3  ;;  %823 = vmatpush.msrb.mxu3 %v442_v4  ;;  %v5008_v3 = vld [vmem:[#allocation5 + $0x470] sm:$0xff] }
  0xa5   :  { %805 = vmatmul.f32.vlgmr.msrb.gmra.mxu2 %v4620_v18  ;;  %763 = vmatpush.msrb.mxu0 %v250_v11  ;;  %v4949_v18 = vld [vmem:[#allocation5 + $0x4f0] sm:$0xff]  ;;  %v1183_v11 = vunpack.c.l.bf16 %v5008_v3 }
  0xa6   :  { %783 = vmatpush.msrb.mxu1 %v314_v27  ;;  %824 = vmatpush.msrb.mxu3 %v438_v17  ;;  %v5010_v4 = vld [vmem:[#allocation5 + $0x570] sm:$0xff] }
  0xa7   :  { %825 = vmatmul.f32.vlgmr.msrb.gmra.mxu3 %v4625_v24  ;;  %764 = vmatpush.msrb.mxu0 %v246_v52  ;;  %v1215_v24 = vunpack.c.l.bf16 %v4949_v18  ;;  %v1247_v27 = vunpack.c.l.bf16 %v5010_v4 }
  0xa8   :  { %784 = vmatpush.msrb.mxu1 %v310_v42  ;;  %765 = vmatmul.f32.vlgmr.msrb.gmra.mxu0 %v4631_v31  ;;  %v859_v31 = vmul.f32 2.0, %v4947_v0  ;;  %v5014_v42 = vld [vmem:[#allocation5 + $0x460] sm:$0xff] }
  0xa9   :  { %785 = vmatmul.f32.vlgmr.msrb.gmra.mxu1 %v4635_v35  ;;  %v4958_v35 = vld [vmem:[#allocation5 + $0x5e0] sm:$0xff]  ;;  %1411 = vmatpush.msra.mxu0 %v1215_v24  ;;  %v5025_v24 = vld [vmem:[#allocation5 + $0x550] sm:$0xff] }
  0xaa   :  { %1431 = vmatpush.msra.mxu1 %v1279_v58  ;;  %v1275_v12 = vunpack.c.l.bf16 %v4958_v35  ;;  %v860_v5 = vsub.f32 1.0, %v859_v31  ;;  %v1239_v31 = vunpack.c.l.bf16 %v5025_v24 }
  0xab   :  { %1412 = vmatpush.msra.mxu0 %v1211_v7  ;;  %v5034_v7 = vld [vmem:[#allocation5 + $0x540] sm:$0xff] }
  0xac   :  { %1432 = vmatpush.msra.mxu1 %v1275_v12  ;;  %v861_v53 = vmul.f32 %v4947_v0, %v860_v5 }
  0xad   :  { %1413 = vmatpush.msra.mxu0 %v1207_v34 }
  0xae   :  { %1433 = vmatpush.msra.mxu1 %v1271_v36  ;;  %v862_v30 = vadd.f32 %v4947_v0, %v861_v53  ;;  %v1235_v36 = vunpack.c.l.bf16 %v5034_v7 }
  0xaf   :  { %1414 = vmatpush.msra.mxu0 %v1203_v50  ;;  %v5040_v50 = vld [vmem:[#allocation5 + $0x530] sm:$0xff] }
  0xb0   :  { %1434 = vmatpush.msra.mxu1 %v1267_v26 }
  0xb1   :  { %1415 = vmatpush.msra.mxu0 %v1199_v38 }
  0xb2   :  { %1435 = vmatpush.msra.mxu1 %v1263_v19 }
  0xb3   :  { %1416 = vmatpush.msra.mxu0 %v1195_v29 }
  0xb4   :  { %1436 = vmatpush.msra.mxu1 %v1259_v46 }
  0xb5   :  { %1417 = vmatpush.msra.mxu0 %v1191_v9  ;;  %v5055_v9 = vld [vmem:[#allocation5 + $0x510] sm:$0xff] }
  0xb6   :  { %1437 = vmatpush.msra.mxu1 %v1255_v44 }
  0xb7   :  { %1418 = vmatpush.msra.mxu0 %v1187_v56  ;;  %v5061_v56 = vld [vmem:[#allocation5 + $0x400] sm:$0xff] }
  0xb8   :  { %1438 = vmatpush.msra.mxu1 %v1251_v14  ;;  %v5063_v14 = vld [vmem:[#allocation5 + $0x500] sm:$0xff] }
  0xb9   :  { %1419 = vmatpush.msra.mxu0 %v1183_v11  ;;  %v1155_v11 = vunpack.c.l.bf16 %v5061_v56 }
  0xba   :  { %1439 = vmatpush.msra.mxu1 %v1247_v27  ;;  %v1219_v27 = vunpack.c.l.bf16 %v5063_v14 }
  0xca   :  { %v526_v2 = vpop.f32.mrf.mxu0 }
  0xcb   :  { %v546_v8 = vpop.f32.mrf.mxu1 }
  0xcc   :  { %v547_v62 = vadd.f32 %v546_v8, %v526_v2  ;;  %v566_v51 = vpop.f32.mrf.mxu2  ;;  %v5019_v2 = vsel %vm863_vm1, %v4947_v0, %v862_v30  ;;  %v1179_v8 = vunpack.c.l.bf16 %v5014_v42 }
  0xce   :  { %v567_v28 = vadd.f32 %v566_v51, %v547_v62  ;;  %v586_v6 = vpop.f32.mrf.mxu3  ;;  %v1243_v62 = vunpack.c.l.bf16 %v5016_v41  ;;  %v5023_v51 = vld [vmem:[#allocation5 + $0x450] sm:$0xff]  ;;  %1420 = vmatpush.msra.mxu0 %v1179_v8  ;;  %v1280_v8 = vunpack.c.h.bf16 %v4951_v1  ;;  %v1272_v1 = vunpack.c.h.bf16 %v4964_v23 }
  0xcf   :  { %v1175_v58 = vunpack.c.l.bf16 %v5023_v51 }
  0xd0   :  { %v4966_v25 = vadd.f32 %v586_v6, %v567_v28  ;;  %1440 = vmatpush.msra.mxu1 %v1243_v62  ;;  %v5032_v6 = vld [vmem:[#allocation5 + $0x440] sm:$0xff] }
  0xd1   :  { %1421 = vmatpush.msra.mxu0 %v1175_v58  ;;  %v1171_v34 = vunpack.c.l.bf16 %v5032_v6 }
  0xd2   :  { %v830_v22 = vsel %vm829_vm0, %v4966_v25, 0.0  ;;  %v869_v33 = vmul.f32 %v4966_v25, %v4966_v25  ;;  %1441 = vmatpush.msra.mxu1 %v1239_v31 }
  0xd3   :  { %v831_v15 = vrot.slane %v830_v22, 4  ;;  %1422 = vmatpush.msra.mxu0 %v1171_v34 }
  0xd4   :  { %v873_v10 = vsel %vm829_vm0, %v869_v33, 0.0  ;;  %v5038_v33 = vld [vmem:[#allocation5 + $0x430] sm:$0xff]  ;;  %1442 = vmatpush.msra.mxu1 %v1235_v36 }
  0xd5   :  { %v832_v20 = vadd.f32 %v831_v15, %v830_v22  ;;  %v874_v16 = vrot.slane %v873_v10, 4  ;;  %v1167_v15 = vunpack.c.l.bf16 %v5038_v33 }
  0xd7   :  { %v833_v43 = vrot.slane %v832_v20, 2  ;;  %v875_v55 = vadd.f32 %v874_v16, %v873_v10  ;;  %v1231_v10 = vunpack.c.l.bf16 %v5040_v50  ;;  %v5049_v16 = vld [vmem:[#allocation5 + $0x520] sm:$0xff]  ;;  %1423 = vmatpush.msra.mxu0 %v1167_v15  ;;  %v1204_v15 = vunpack.c.h.bf16 %v4970_v32 }
  0xd9   :  { %v834_v45 = vadd.f32 %v833_v43, %v832_v20  ;;  %v876_v48 = vrot.slane %v875_v55, 2  ;;  %v5047_v20 = vld [vmem:[#allocation5 + $0x420] sm:$0xff]  ;;  %1443 = vmatpush.msra.mxu1 %v1231_v10  ;;  %v1227_v43 = vunpack.c.l.bf16 %v5049_v16 }
  0xda   :  { %v1163_v46 = vunpack.c.l.bf16 %v5047_v20 }
  0xdb   :  { %v835_v57 = vrot.slane %v834_v45, 1  ;;  %v877_v61 = vadd.f32 %v876_v48, %v875_v55  ;;  %v5053_v55 = vld [vmem:[#allocation5 + $0x410] sm:$0xff]  ;;  %1444 = vmatpush.msra.mxu1 %v1227_v43  ;;  %v1223_v48 = vunpack.c.l.bf16 %v5055_v9 }
  0xdc   :  { %1424 = vmatpush.msra.mxu0 %v1163_v46  ;;  %v1192_v46 = vunpack.c.h.bf16 %v4994_v39  ;;  %v1184_v39 = vunpack.c.h.bf16 %v5008_v3 }
  0xdd   :  { %v836_v17 = vadd.f32 %v835_v57, %v834_v45  ;;  %v878_v52 = vrot.slane %v877_v61, 1  ;;  %v1159_v45 = vunpack.c.l.bf16 %v5053_v55  ;;  %1445 = vmatpush.msra.mxu1 %v1223_v48 }
  0xdf   :  { %v5030_v28 = vmul.f32 %v5019_v2, %v836_v17  ;;  %v879_v0 = vadd.f32 %v878_v52, %v877_v61  ;;  %1425 = vmatpush.msra.mxu0 %v1159_v45  ;;  %v1216_v52 = vunpack.c.h.bf16 %v4949_v18  ;;  %1446 = vmatpush.msra.mxu1 %v1219_v27  ;;  %v1208_v18 = vunpack.c.h.bf16 %v4962_v13 }
  0xe0   :  { %v1252_v45 = vunpack.c.h.bf16 %v5002_v49  ;;  %v1240_v49 = vunpack.c.h.bf16 %v5025_v24  ;;  %v1236_v27 = vunpack.c.h.bf16 %v5034_v7  ;;  %v1228_v24 = vunpack.c.h.bf16 %v5049_v16 }
  0xe1   :  { %v901_v38 = vmul.f32 %v879_v0, %v5019_v2  ;;  %v905_v19 = vmul.f32 %v5030_v28, %v5030_v28  ;;  %1426 = vmatpush.msra.mxu0 %v1155_v11  ;;  %1511 = vmatpush.msrb.mxu1 %v1280_v8  ;;  %v1212_v0 = vunpack.c.h.bf16 %v4956_v59  ;;  %v1268_v59 = vunpack.c.h.bf16 %v4972_v63 }
  0xe2   :  { %v1244_v11 = vunpack.c.h.bf16 %v5016_v41  ;;  %v1232_v41 = vunpack.c.h.bf16 %v5040_v50  ;;  %v1160_v7 = vunpack.c.h.bf16 %v5053_v55  ;;  %v1220_v16 = vunpack.c.h.bf16 %v5063_v14  ;;  %v5128_v14 = vld [vmem:[#allocation5 + $0x7e0] sm:$0xff] }
  0xe3   :  { %v606_v12 = vpop.f32.mrf.mxu0  ;;  %v626_v5 = vpop.f32.mrf.mxu1  ;;  %v909_v30 = vsub.f32 %v901_v38, %v905_v19  ;;  %1491 = vmatpush.msrb.mxu0 %v1216_v52  ;;  %v1200_v38 = vunpack.c.h.bf16 %v4980_v21  ;;  %v1264_v19 = vunpack.c.h.bf16 %v4982_v37  ;;  %v1256_v21 = vunpack.c.h.bf16 %v4996_v40 }
  0xe4   :  { %v646_v22 = vpop.f32.mrf.mxu2  ;;  %v627_v26 = vadd.f32 %v626_v5, %v606_v12  ;;  %v1276_v12 = vunpack.c.h.bf16 %v4958_v35  ;;  %v1248_v40 = vunpack.c.h.bf16 %v5010_v4  ;;  %v1172_v4 = vunpack.c.h.bf16 %v5032_v6 }
  0xe5   :  { %v5076_v34 = vadd.f32 1e-05, %v909_v30  ;;  %1492 = vmatpush.msrb.mxu0 %v1212_v0 }
  0xe6   :  { %v647_v53 = vadd.f32 %v646_v22, %v627_v26  ;;  %1512 = vmatpush.msrb.mxu1 %v1276_v12  ;;  %v5118_v12 = vld [vmem:[#allocation5 + $0x6f0] sm:$0xff] }
  0xe7   :  { %v666_v29 = vpop.f32.mrf.mxu3  ;;  %1493 = vmatpush.msrb.mxu0 %v1208_v18  ;;  %4124 = vrsqrt.f32 %v5076_v34  ;;  %vm923_vm4 = vweird.f32 %v5076_v34 }
  0xe8   :  { %v5057_v44 = vadd.f32 %v666_v29, %v647_v53  ;;  %1513 = vmatpush.msrb.mxu1 %v1272_v1  ;;  %v1196_v53 = vunpack.c.h.bf16 %v4987_v54  ;;  %v1260_v29 = vunpack.c.h.bf16 %v4989_v60  ;;  %v1188_v60 = vunpack.c.h.bf16 %v5000_v47 }
  0xe9   :  { %1494 = vmatpush.msrb.mxu0 %v1204_v15  ;;  %v1176_v47 = vunpack.c.h.bf16 %v5023_v51  ;;  %v1164_v51 = vunpack.c.h.bf16 %v5047_v20  ;;  %v1156_v20 = vunpack.c.h.bf16 %v5061_v56  ;;  %v5126_v56 = vld [vmem:[#allocation5 + $0x6e0] sm:$0xff] }
  0xea   :  { %v837_v57 = vsel %vm829_vm0, %v5057_v44, 0.0  ;;  %v870_v61 = vmul.f32 %v5057_v44, %v5057_v44  ;;  %1514 = vmatpush.msrb.mxu1 %v1268_v59  ;;  %v1339_v15 = vunpack.c.l.bf16 %v5126_v56  ;;  %v1403_v59 = vunpack.c.l.bf16 %v5128_v14 }
  0xeb   :  { %v838_v17 = vrot.slane %v837_v57, 4  ;;  %1495 = vmatpush.msrb.mxu0 %v1200_v38  ;;  %v5141_v38 = vld [vmem:[#allocation5 + $0x6d0] sm:$0xff] }
  0xec   :  { %v880_v62 = vsel %vm829_vm0, %v870_v61, 0.0  ;;  %1515 = vmatpush.msrb.mxu1 %v1264_v19  ;;  %v1180_v61 = vunpack.c.h.bf16 %v5014_v42  ;;  %v1168_v42 = vunpack.c.h.bf16 %v5038_v33  ;;  %v1224_v33 = vunpack.c.h.bf16 %v5055_v9  ;;  %v5143_v19 = vld [vmem:[#allocation5 + $0x7d0] sm:$0xff] }
  0xed   :  { %v839_v58 = vadd.f32 %v838_v17, %v837_v57  ;;  %v881_v31 = vrot.slane %v880_v62, 4  ;;  %1496 = vmatpush.msrb.mxu0 %v1196_v53  ;;  %v5092_v43 = vpop.eup %4124  ;;  %v1343_v9 = vunpack.c.l.bf16 %v5118_v12 }
  0xee   :  { %1516 = vmatpush.msrb.mxu1 %v1260_v29  ;;  %v918_v30 = vmul.f32 %v5092_v43, %v5076_v34  ;;  %vm924_vm5 = vweird.f32 %v5092_v43  ;;  %v1335_v29 = vunpack.c.l.bf16 %v5141_v38 }
  0xef   :  { %v840_v36 = vrot.slane %v839_v58, 2  ;;  %v882_v5 = vadd.f32 %v881_v31, %v880_v62  ;;  %1497 = vmatpush.msrb.mxu0 %v1192_v46  ;;  %1451 = vmatpush.msra.mxu2 %v1343_v9  ;;  %vm5154_vm7 = vmor %vm923_vm4, %vm924_vm5 }
  0xf0   :  { %1517 = vmatpush.msrb.mxu1 %v1256_v21  ;;  %v919_v3 = vmul.f32 %v5092_v43, %v918_v30  ;;  %v1399_v21 = vunpack.c.l.bf16 %v5143_v19  ;;  %v5168_v30 = vld [vmem:[#allocation5 + $0x6b0] sm:$0xff] }
  0xf1   :  { %v841_v22 = vadd.f32 %v840_v36, %v839_v58  ;;  %v883_v26 = vrot.slane %v882_v5, 2  ;;  %1498 = vmatpush.msrb.mxu0 %v1188_v60  ;;  %v5120_v36 = vld [vmem:[#allocation5 + $0x7f0] sm:$0xff]  ;;  %1452 = vmatpush.msra.mxu2 %v1339_v15 }
  0xf2   :  { %1518 = vmatpush.msrb.mxu1 %v1252_v45  ;;  %v920_v17 = vmul.f32 0.5, %v919_v3  ;;  %v1407_v1 = vunpack.c.l.bf16 %v5120_v36 }
  0xf3   :  { %v842_v35 = vrot.slane %v841_v22, 1  ;;  %v884_v10 = vadd.f32 %v883_v26, %v882_v5  ;;  %1499 = vmatpush.msrb.mxu0 %v1184_v39  ;;  %1453 = vmatpush.msra.mxu2 %v1335_v29  ;;  %v5210_v29 = vld [vmem:[#allocation5 + $0x650] sm:$0xff] }
  0xf4   :  { %1519 = vmatpush.msrb.mxu1 %v1248_v40  ;;  %v921_v31 = vsub.f32 1.5, %v920_v17  ;;  %1471 = vmatpush.msra.mxu3 %v1407_v1  ;;  %v5203_v1 = vld [vmem:[#allocation5 + $0x660] sm:$0xff] }
  0xf5   :  { %v843_v13 = vadd.f32 %v842_v35, %v841_v22  ;;  %v885_v23 = vrot.slane %v884_v10, 1  ;;  %1500 = vmatpush.msrb.mxu0 %v1180_v61 }
  0xf6   :  { %1520 = vmatpush.msrb.mxu1 %v1244_v11  ;;  %v922_v35 = vmul.f32 %v5092_v43, %v921_v31  ;;  %1472 = vmatpush.msra.mxu3 %v1403_v59  ;;  %v1327_v11 = vunpack.c.l.bf16 %v5168_v30 }
  0xf7   :  { %v5088_v32 = vmul.f32 %v5019_v2, %v843_v13  ;;  %v886_v63 = vadd.f32 %v885_v23, %v884_v10  ;;  %1501 = vmatpush.msrb.mxu0 %v1176_v47 }
  0xf8   :  { %1521 = vmatpush.msrb.mxu1 %v1240_v49  ;;  %1473 = vmatpush.msra.mxu3 %v1399_v21  ;;  %v926_v61 = vsel %vm5154_vm7, %v5092_v43, %v922_v35  ;;  %v1303_v21 = vunpack.c.l.bf16 %v5210_v29 }
  0xf9   :  { %v902_v37 = vmul.f32 %v886_v63, %v5019_v2  ;;  %v906_v54 = vmul.f32 %v5088_v32, %v5088_v32  ;;  %1502 = vmatpush.msrb.mxu0 %v1172_v4  ;;  %v5178_v4 = vld [vmem:[#allocation5 + $0x6a0] sm:$0xff]  ;;  %v5212_v63 = vld [vmem:[#allocation5 + $0x750] sm:$0xff] }
  0xfa   :  { %1522 = vmatpush.msrb.mxu1 %v1236_v27  ;;  %v5180_v27 = vld [vmem:[#allocation5 + $0x7a0] sm:$0xff]  ;;  %v1323_v17 = vunpack.c.l.bf16 %v5178_v4 }
  0xfb   :  { %v910_v48 = vsub.f32 %v902_v37, %v906_v54  ;;  %1503 = vmatpush.msrb.mxu0 %v1168_v42  ;;  %v5159_v37 = vld [vmem:[#allocation5 + $0x6c0] sm:$0xff]  ;;  %v1387_v43 = vunpack.c.l.bf16 %v5180_v27 }
  0xfc   :  { %1523 = vmatpush.msrb.mxu1 %v1232_v41  ;;  %v5161_v54 = vld [vmem:[#allocation5 + $0x7c0] sm:$0xff]  ;;  %v1331_v45 = vunpack.c.l.bf16 %v5159_v37 }
  0xfd   :  { %v914_v57 = vadd.f32 1e-05, %v910_v48  ;;  %1504 = vmatpush.msrb.mxu0 %v1164_v51  ;;  %v1395_v34 = vunpack.c.l.bf16 %v5161_v54  ;;  %v111_v48 = vld [vmem:[#allocation7] sm:$0xff]  ;;  %v5186_v51 = vld [vmem:[#allocation5 + $0x790] sm:$0xff] }
  0xfe   :  { %1524 = vmatpush.msrb.mxu1 %v1228_v24  ;;  %1454 = vmatpush.msra.mxu2 %v1331_v45 }
  0xff   :  { %4126 = vrsqrt.f32 %v914_v57  ;;  %vm933_vm2 = vweird.f32 %v914_v57  ;;  %1505 = vmatpush.msrb.mxu0 %v1160_v7  ;;  %1474 = vmatpush.msra.mxu3 %v1395_v34  ;;  %v5192_v7 = vld [vmem:[#allocation5 + $0x780] sm:$0xff]  ;;  %v1367_v34 = vunpack.c.l.bf16 %v5212_v63 }
 0x100   :  { %1525 = vmatpush.msrb.mxu1 %v1224_v33  ;;  %1455 = vmatpush.msra.mxu2 %v1327_v11  ;;  %v5221_v11 = vld [vmem:[#allocation5 + $0x4f8] sm:$0xff] }
 0x101   :  { %1506 = vmatpush.msrb.mxu0 %v1156_v20  ;;  %v1379_v20 = vunpack.c.l.bf16 %v5192_v7 }
 0x102   :  { %1526 = vmatpush.msrb.mxu1 %v1220_v16  ;;  %1456 = vmatpush.msra.mxu2 %v1323_v17  ;;  %v5197_v16 = vld [vmem:[#allocation5 + $0x670] sm:$0xff] }
 0x105   :  { %v4127_v52 = vpop.eup %4126 }
 0x106   :  { %v928_v8 = vmul.f32 %v4127_v52, %v914_v57  ;;  %vm934_vm3 = vweird.f32 %v4127_v52  ;;  %v5170_v57 = vld [vmem:[#allocation5 + $0x7b0] sm:$0xff] }
 0x107   :  { %v686_v62 = vpop.f32.mrf.mxu0  ;;  %v706_v6 = vpop.f32.mrf.mxu1  ;;  %vm5137_vm6 = vmor %vm933_vm2, %vm934_vm3  ;;  %v1391_v47 = vunpack.c.l.bf16 %v5170_v57 }
 0x108   :  { %v726_v58 = vpop.f32.mrf.mxu2  ;;  %v929_v50 = vmul.f32 %v4127_v52, %v928_v8  ;;  %v707_v0 = vadd.f32 %v706_v6, %v686_v62  ;;  %v1383_v6 = vunpack.c.l.bf16 %v5186_v51 }
 0x109   :  { %1475 = vmatpush.msra.mxu3 %v1391_v47 }
 0x10a   :  { %v930_v5 = vmul.f32 0.5, %v929_v50  ;;  %v727_v18 = vadd.f32 %v726_v58, %v707_v0  ;;  %v746_v55 = vpop.f32.mrf.mxu3  ;;  %v5190_v58 = vld [vmem:[#allocation5 + $0x680] sm:$0xff] }
 0x10b   :  { %1476 = vmatpush.msra.mxu3 %v1387_v43  ;;  %v1315_v0 = vunpack.c.l.bf16 %v5190_v58  ;;  %v5227_v43 = vld [vmem:[#allocation5 + $0x5f8] sm:$0xff] }
 0x10c   :  { %v931_v22 = vsub.f32 1.5, %v930_v5  ;;  %v5130_v26 = vadd.f32 %v746_v55, %v727_v18  ;;  %v5199_v5 = vld [vmem:[#allocation5 + $0x770] sm:$0xff] }
 0x10d   :  { %1477 = vmatpush.msra.mxu3 %v1383_v6  ;;  %v113_v18 = vld [vmem:[#allocation8] sm:$0xff]  ;;  %v1375_v10 = vunpack.c.l.bf16 %v5199_v5 }
 0x10e   :  { %7136 = vst [vmem:[#allocation22_spill] sm:$0xff] %v5130_v26  ;;  %v932_v13 = vmul.f32 %v4127_v52, %v931_v22  ;;  %v844_v23 = vsel %vm829_vm0, %v5130_v26, 0.0  ;;  %v871_v53 = vmul.f32 %v5130_v26, %v5130_v26  ;;  %v5205_v22 = vld [vmem:[#allocation5 + $0x760] sm:$0xff] }
 0x10f   :  { %v845_v46 = vrot.slane %v844_v23, 4  ;;  %1478 = vmatpush.msra.mxu3 %v1379_v20 }
 0x110   :  { %v936_v60 = vsel %vm5137_vm6, %v4127_v52, %v932_v13  ;;  %v887_v40 = vsel %vm829_vm0, %v871_v53, 0.0  ;;  %v5184_v52 = vld [vmem:[#allocation5 + $0x690] sm:$0xff] }
 0x111   :  { %v961_v39 = vrot.slane %v936_v60, 4  ;;  %v846_v3 = vadd.f32 %v845_v46, %v844_v23  ;;  %v888_v41 = vrot.slane %v887_v40, 4  ;;  %v1319_v62 = vunpack.c.l.bf16 %v5184_v52  ;;  %1479 = vmatpush.msra.mxu3 %v1375_v10 }
 0x112   :  { %v1371_v46 = vunpack.c.l.bf16 %v5205_v22 }
 0x113   :  { %v964_v49 = vsel %vm963_vm8, %v926_v61, %v961_v39  ;;  %v847_v31 = vrot.slane %v846_v3, 2  ;;  %v889_v50 = vadd.f32 %v888_v41, %v887_v40  ;;  %1457 = vmatpush.msra.mxu2 %v1319_v62  ;;  %v5219_v39 = vld [vmem:[#allocation5 + $0x740] sm:$0xff]  ;;  %v5233_v62 = vld [vmem:[#allocation5 + $0x4e8] sm:$0xff] }
 0x114   :  { %v968_v42 = vmul.f32 %v964_v49, %v111_v48  ;;  %v5217_v48 = vld [vmem:[#allocation5 + $0x640] sm:$0xff]  ;;  %1480 = vmatpush.msra.mxu3 %v1371_v46  ;;  %v1363_v49 = vunpack.c.l.bf16 %v5219_v39 }
 0x115   :  { %1458 = vmatpush.msra.mxu2 %v1315_v0  ;;  %v848_v59 = vadd.f32 %v847_v31, %v846_v3  ;;  %v890_v35 = vrot.slane %v889_v50, 2  ;;  %v1299_v47 = vunpack.c.l.bf16 %v5217_v48  ;;  %v5241_v0 = vld [vmem:[#allocation5 + $0x720] sm:$0xff] }
 0x116   :  { %v972_v24 = vperm.slane %v968_v42, 0  ;;  %v973_v8 = vperm.slane %v968_v42, 4  ;;  %1481 = vmatpush.msra.mxu3 %v1367_v34 }
 0x117   :  { %v849_v40 = vrot.slane %v848_v59, 1  ;;  %v891_v61 = vadd.f32 %v890_v35, %v889_v50  ;;  %v5237_v50 = vld [vmem:[#allocation5 + $0x5e8] sm:$0xff] }
 0x118   :  { %v981_v33 = vmul.f32 %v973_v8, %v5088_v32  ;;  %v980_v55 = vmul.f32 %v972_v24, %v5030_v28  ;;  %v1311_v32 = vunpack.c.l.bf16 %v5197_v16  ;;  %v997_v23 = vperm.slane %v973_v8, 0  ;;  %v5231_v8 = vld [vmem:[#allocation5 + $0x730] sm:$0xff]  ;;  %1482 = vmatpush.msra.mxu3 %v1363_v49 }
 0x119   :  { %v996_v53 = vperm.slane %v972_v24, 0  ;;  %v1307_v28 = vunpack.c.l.bf16 %v5203_v1  ;;  %v5229_v24 = vld [vmem:[#allocation5 + $0x630] sm:$0xff]  ;;  %v850_v20 = vadd.f32 %v849_v40, %v848_v59  ;;  %v1355_v59 = vunpack.c.l.bf16 %v5241_v0 }
 0x11a   :  { %v988_v9 = vrot.slane %v981_v33, 4  ;;  %1459 = vmatpush.msra.mxu2 %v1311_v32  ;;  %v1001_v3 = vmul.f32 %v997_v23, %v5057_v44  ;;  %v1295_v6 = vunpack.c.l.bf16 %v5229_v24  ;;  %v1359_v33 = vunpack.c.l.bf16 %v5231_v8  ;;  %v5245_v32 = vld [vmem:[#allocation5 + $0x4d8] sm:$0xff] }
 0x11b   :  { %v1000_v41 = vmul.f32 %v996_v53, %v4966_v25  ;;  %v5239_v25 = vld [vmem:[#allocation5 + $0x620] sm:$0xff]  ;;  %v5255_v53 = vld [vmem:[#allocation5 + $0x610] sm:$0xff] }
 0x11c   :  { %v990_v15 = vsel %vm963_vm8, %v980_v55, %v988_v9  ;;  %1460 = vmatpush.msra.mxu2 %v1307_v28  ;;  %v1217_v55 = vunpack.c.l.bf16 %v5221_v11  ;;  %v1281_v9 = vunpack.c.l.bf16 %v5227_v43  ;;  %v1291_v23 = vunpack.c.l.bf16 %v5239_v25  ;;  %v5257_v28 = vld [vmem:[#allocation5 + $0x710] sm:$0xff]  ;;  %1483 = vmatpush.msra.mxu3 %v1359_v33 }
 0x11d   :  { %v994_v13 = vsub.f32 %v113_v18, %v990_v15  ;;  %v892_v18 = vrot.slane %v891_v61, 1  ;;  %7141 = vst [vmem:[#allocation19_spill] sm:$0xff] %v5257_v28  ;;  %v1287_v49 = vunpack.c.l.bf16 %v5255_v53  ;;  %v1209_v33 = vunpack.c.l.bf16 %v5245_v32 }
 0x11e   :  { %1461 = vmatpush.msra.mxu2 %v1303_v21  ;;  %v1213_v21 = vunpack.c.l.bf16 %v5233_v62  ;;  %1484 = vmatpush.msra.mxu3 %v1355_v59 }
 0x11f   :  { %v1007_v60 = vperm.slane %v994_v13, 4  ;;  %v1006_v45 = vperm.slane %v994_v13, 0  ;;  %v5251_v13 = vld [vmem:[#allocation5 + $0x5d8] sm:$0xff] }
 0x120   :  { %1462 = vmatpush.msra.mxu2 %v1299_v47  ;;  %v5265_v47 = vld [vmem:[#allocation5 + $0x5c8] sm:$0xff] }
 0x121   :  { %v1015_v42 = vperm.slane %v1007_v60, 0  ;;  %v1014_v17 = vperm.slane %v1006_v45, 0  ;;  %v1277_v60 = vunpack.c.l.bf16 %v5237_v50  ;;  %v5261_v45 = vld [vmem:[#allocation5 + $0x4c8] sm:$0xff] }
 0x122   :  { %1463 = vmatpush.msra.mxu2 %v1295_v6  ;;  %v893_v6 = vadd.f32 %v892_v18, %v891_v61  ;;  %v1205_v61 = vunpack.c.l.bf16 %v5261_v45  ;;  %v1269_v18 = vunpack.c.l.bf16 %v5265_v47 }
 0x123   :  { %v1019_v31 = vadd.f32 %v1015_v42, %v1001_v3  ;;  %v1018_v44 = vadd.f32 %v1014_v17, %v1000_v41  ;;  %v1351_v3 = vunpack.c.l.bf16 %v5257_v28  ;;  %v5269_v42 = vld [vmem:[#allocation5 + $0x600] sm:$0xff]  ;;  %v5274_v17 = vmul.f32 %v5019_v2, %v850_v20 }
 0x124   :  { %7142 = vst [vmem:[#allocation20_spill] sm:$0xff] %v5269_v42  ;;  %v5271_v41 = vld [vmem:[#allocation5 + $0x700] sm:$0xff]  ;;  %1464 = vmatpush.msra.mxu2 %v1291_v23  ;;  %v1283_v26 = vunpack.c.l.bf16 %v5269_v42  ;;  %v903_v23 = vmul.f32 %v893_v6, %v5019_v2  ;;  %v1344_v6 = vunpack.c.h.bf16 %v5118_v12  ;;  %v5315_v12 = vld [vmem:[#allocation5 + $0x588] sm:$0xff]  ;;  %v5322_v42 = vld [vmem:[#allocation5 + $0x578] sm:$0xff] }
 0x125   :  { %v766_v15 = vpop.f32.mrf.mxu0  ;;  %v5247_v35 = vmax.f32 %v1018_v44, 0.0  ;;  %v5249_v10 = vmax.f32 %v1019_v31, 0.0  ;;  %7143 = vst [vmem:[#allocation21_spill] sm:$0xff] %v5271_v41  ;;  %v1273_v31 = vunpack.c.l.bf16 %v5251_v13  ;;  %v1347_v28 = vunpack.c.l.bf16 %v5271_v41  ;;  %1485 = vmatpush.msra.mxu3 %v1351_v3  ;;  %v5303_v3 = vld [vmem:[#allocation5 + $0x598] sm:$0xff] }
 0x126   :  { %v786_v46 = vpop.f32.mrf.mxu1  ;;  %7144 = vst [vmem:[#allocation23_spill] sm:$0xff] %v5274_v17  ;;  %1465 = vmatpush.msra.mxu2 %v1287_v49  ;;  %v907_v59 = vmul.f32 %v5274_v17, %v5274_v17 }
 0x127   :  { %v787_v34 = vadd.f32 %v786_v46, %v766_v15  ;;  %1427 = vmatmul.f32.vlgmr.msra.gmra.mxu0 %v5247_v35  ;;  %1447 = vmatmul.f32.vlgmr.msra.gmra.mxu1 %v5249_v10  ;;  %v5278_v15 = vld [vmem:[#allocation5 + $0x4b8] sm:$0xff] }
 0x128   :  { %v806_v40 = vpop.f32.mrf.mxu2  ;;  %1571 = vmatpush.msra.mxu0 %v1217_v55  ;;  %1591 = vmatpush.msra.mxu1 %v1281_v9  ;;  %7145 = vst [vmem:[#allocation24_spill] sm:$0xff] %v5278_v15  ;;  %v5280_v46 = vld [vmem:[#allocation5 + $0x5b8] sm:$0xff]  ;;  %v5288_v9 = vld [vmem:[#allocation5 + $0x4a8] sm:$0xff] }
 0x129   :  { %v807_v44 = vadd.f32 %v806_v40, %v787_v34  ;;  %7146 = vst [vmem:[#allocation25_spill] sm:$0xff] %v5280_v46  ;;  %v5290_v34 = vld [vmem:[#allocation5 + $0x5a8] sm:$0xff]  ;;  %v5297_v40 = vld [vmem:[#allocation5 + $0x498] sm:$0xff]  ;;  %1466 = vmatpush.msra.mxu2 %v1283_v26  ;;  %1486 = vmatpush.msra.mxu3 %v1347_v28 }
 0x12a   :  { %v826_v20 = vpop.f32.mrf.mxu3  ;;  %1572 = vmatpush.msra.mxu0 %v1213_v21  ;;  %1592 = vmatpush.msra.mxu1 %v1277_v60  ;;  %7148 = vst [vmem:[#allocation27_spill] sm:$0xff] %v5288_v9  ;;  %v1201_v21 = vunpack.c.l.bf16 %v5278_v15  ;;  %v1265_v60 = vunpack.c.l.bf16 %v5280_v46  ;;  %v1261_v17 = vunpack.c.l.bf16 %v5290_v34  ;;  %v1193_v26 = vunpack.c.l.bf16 %v5297_v40  ;;  %v5313_v28 = vld [vmem:[#allocation5 + $0x488] sm:$0xff] }
 0x12b   :  { %v5286_v55 = vadd.f32 %v826_v20, %v807_v44  ;;  %7149 = vst [vmem:[#allocation28_spill] sm:$0xff] %v5290_v34  ;;  %v1197_v20 = vunpack.c.l.bf16 %v5288_v9  ;;  %v5320_v34 = vld [vmem:[#allocation5 + $0x478] sm:$0xff]  ;;  %1531 = vmatpush.msrb.mxu2 %v1344_v6  ;;  %v1400_v46 = vunpack.c.h.bf16 %v5143_v19  ;;  %v1396_v19 = vunpack.c.h.bf16 %v5161_v54 }
 0x12c   :  { %1573 = vmatpush.msra.mxu0 %v1209_v33  ;;  %1593 = vmatpush.msra.mxu1 %v1273_v31  ;;  %7150 = vst [vmem:[#allocation29_spill] sm:$0xff] %v5297_v40  ;;  %v1408_v33 = vunpack.c.h.bf16 %v5120_v36  ;;  %v1340_v36 = vunpack.c.h.bf16 %v5126_v56  ;;  %v1336_v40 = vunpack.c.h.bf16 %v5141_v38  ;;  %v1332_v38 = vunpack.c.h.bf16 %v5159_v37  ;;  %v5338_v6 = vld [vmem:[#allocation5 + $0x458] sm:$0xff] }
 0x12d   :  { %7147 = vst [vmem:[#allocation26_spill] sm:$0xff] %v5286_v55  ;;  %v851_v44 = vsel %vm829_vm0, %v5286_v55, 0.0  ;;  %v872_v49 = vmul.f32 %v5286_v55, %v5286_v55  ;;  %v1392_v37 = vunpack.c.h.bf16 %v5170_v57  ;;  %v1388_v57 = vunpack.c.h.bf16 %v5180_v27 }
 0x12e   :  { %v852_v31 = vrot.slane %v851_v44, 4  ;;  %1574 = vmatpush.msra.mxu0 %v1205_v61  ;;  %1594 = vmatpush.msra.mxu1 %v1269_v18  ;;  %v1404_v61 = vunpack.c.h.bf16 %v5128_v14  ;;  %v911_v18 = vsub.f32 %v903_v23, %v907_v59  ;;  %v1189_v14 = vunpack.c.l.bf16 %v5313_v28 }
 0x12f   :  { %v894_v41 = vsel %vm829_vm0, %v872_v49, 0.0  ;;  %1507 = vmatmul.f32.vlgmr.msrb.gmra.mxu0 %v5247_v35  ;;  %1527 = vmatmul.f32.vlgmr.msrb.gmra.mxu1 %v5249_v10  ;;  %v1257_v49 = vunpack.c.l.bf16 %v5303_v3  ;;  %v1253_v23 = vunpack.c.l.bf16 %v5315_v12  ;;  %v1185_v59 = vunpack.c.l.bf16 %v5320_v34 }
 0x130   :  { %v853_v55 = vadd.f32 %v852_v31, %v851_v44  ;;  %v895_v9 = vrot.slane %v894_v41, 4  ;;  %1575 = vmatpush.msra.mxu0 %v1201_v21  ;;  %1595 = vmatpush.msra.mxu1 %v1265_v60  ;;  %v5329_v21 = vld [vmem:[#allocation5 + $0x468] sm:$0xff]  ;;  %v5335_v44 = vadd.f32 1e-05, %v911_v18  ;;  %v1328_v31 = vunpack.c.h.bf16 %v5168_v30 }
 0x131   :  { %1551 = vmatpush.msrb.mxu3 %v1408_v33  ;;  %v5331_v60 = vld [vmem:[#allocation5 + $0x568] sm:$0xff]  ;;  %1532 = vmatpush.msrb.mxu2 %v1340_v36  ;;  %v5340_v33 = vld [vmem:[#allocation5 + $0x558] sm:$0xff]  ;;  %v1177_v36 = vunpack.c.l.bf16 %v5338_v6  ;;  %v1324_v30 = vunpack.c.h.bf16 %v5178_v4  ;;  %v1384_v4 = vunpack.c.h.bf16 %v5186_v51  ;;  %v1380_v51 = vunpack.c.h.bf16 %v5192_v7 }
 0x132   :  { %v854_v56 = vrot.slane %v853_v55, 2  ;;  %v896_v15 = vadd.f32 %v895_v9, %v894_v41  ;;  %1576 = vmatpush.msra.mxu0 %v1197_v20  ;;  %1596 = vmatpush.msra.mxu1 %v1261_v17  ;;  %v1249_v9 = vunpack.c.l.bf16 %v5322_v42  ;;  %v5349_v18 = vld [vmem:[#allocation5 + $0x548] sm:$0xff]  ;;  %4128 = vrsqrt.f32 %v5335_v44 }
 0x133   :  { %1552 = vmatpush.msrb.mxu3 %v1404_v61  ;;  %1533 = vmatpush.msrb.mxu2 %v1336_v40  ;;  %v5347_v61 = vld [vmem:[#allocation5 + $0x448] sm:$0xff]  ;;  %v1241_v40 = vunpack.c.l.bf16 %v5340_v33  ;;  %v1376_v7 = vunpack.c.h.bf16 %v5199_v5  ;;  %vm943_vm9 = vweird.f32 %v5335_v44 }
 0x134   :  { %v855_v41 = vadd.f32 %v854_v56, %v853_v55  ;;  %v897_v17 = vrot.slane %v896_v15, 2  ;;  %1577 = vmatpush.msra.mxu0 %v1193_v26  ;;  %1597 = vmatpush.msra.mxu1 %v1257_v49  ;;  %v1181_v55 = vunpack.c.l.bf16 %v5329_v21  ;;  %v1245_v26 = vunpack.c.l.bf16 %v5331_v60  ;;  %v5355_v49 = vld [vmem:[#allocation5 + $0x438] sm:$0xff] }
 0x135   :  { %1553 = vmatpush.msrb.mxu3 %v1400_v46  ;;  %1534 = vmatpush.msrb.mxu2 %v1332_v38  ;;  %v5357_v56 = vld [vmem:[#allocation5 + $0x538] sm:$0xff]  ;;  %v1237_v38 = vunpack.c.l.bf16 %v5349_v18 }
 0x136   :  { %v856_v20 = vrot.slane %v855_v41, 1  ;;  %v898_v54 = vadd.f32 %v897_v17, %v896_v15  ;;  %1578 = vmatpush.msra.mxu0 %v1189_v14  ;;  %1598 = vmatpush.msra.mxu1 %v1253_v23  ;;  %v1320_v14 = vunpack.c.h.bf16 %v5184_v52  ;;  %v1316_v52 = vunpack.c.h.bf16 %v5190_v58 }
 0x137   :  { %1554 = vmatpush.msrb.mxu3 %v1396_v19  ;;  %1535 = vmatpush.msrb.mxu2 %v1328_v31  ;;  %v5366_v19 = vld [vmem:[#allocation5 + $0x428] sm:$0xff]  ;;  %v1169_v31 = vunpack.c.l.bf16 %v5355_v49  ;;  %v1312_v58 = vunpack.c.h.bf16 %v5197_v16  ;;  %v1372_v16 = vunpack.c.h.bf16 %v5205_v22 }
 0x138   :  { %v857_v15 = vadd.f32 %v856_v20, %v855_v41  ;;  %v899_v46 = vrot.slane %v898_v54, 1  ;;  %1579 = vmatpush.msra.mxu0 %v1185_v59  ;;  %1599 = vmatpush.msra.mxu1 %v1249_v9  ;;  %v1173_v59 = vunpack.c.l.bf16 %v5347_v61  ;;  %v5368_v41 = vld [vmem:[#allocation5 + $0x528] sm:$0xff]  ;;  %v5377_v20 = vld [vmem:[#allocation5 + $0x418] sm:$0xff] }
 0x139   :  { %1555 = vmatpush.msrb.mxu3 %v1392_v37  ;;  %1536 = vmatpush.msrb.mxu2 %v1324_v30  ;;  %v1233_v37 = vunpack.c.l.bf16 %v5357_v56  ;;  %v1229_v30 = vunpack.c.l.bf16 %v5368_v41 }
 0x13a   :  { %v5362_v27 = vmul.f32 %v5019_v2, %v857_v15  ;;  %v900_v23 = vadd.f32 %v899_v46, %v898_v54  ;;  %1580 = vmatpush.msra.mxu0 %v1181_v55  ;;  %1600 = vmatpush.msra.mxu1 %v1245_v26  ;;  %v5379_v54 = vld [vmem:[#allocation5 + $0x518] sm:$0xff]  ;;  %v5383_v55 = vpop.eup %4128  ;;  %v5389_v15 = vld [vmem:[#allocation5 + $0x508] sm:$0xff]  ;;  %v1308_v46 = vunpack.c.h.bf16 %v5203_v1 }
 0x13b   :  { %1556 = vmatpush.msrb.mxu3 %v1388_v57  ;;  %1537 = vmatpush.msrb.mxu2 %v1320_v14  ;;  %v5387_v57 = vld [vmem:[#allocation5 + $0x408] sm:$0xff]  ;;  %v1225_v14 = vunpack.c.l.bf16 %v5379_v54  ;;  %v1221_v22 = vunpack.c.l.bf16 %v5389_v15  ;;  %vm944_vm10 = vweird.f32 %v5383_v55 }
 0x13c   :  { %v904_v17 = vmul.f32 %v900_v23, %v5019_v2  ;;  %v908_v9 = vmul.f32 %v5362_v27, %v5362_v27  ;;  %1581 = vmatpush.msra.mxu0 %v1177_v36  ;;  %1601 = vmatpush.msra.mxu1 %v1241_v40  ;;  %v1165_v36 = vunpack.c.l.bf16 %v5366_v19  ;;  %v1161_v40 = vunpack.c.l.bf16 %v5377_v20  ;;  %vm5437_vm12 = vmor %vm943_vm9, %vm944_vm10 }
 0x13d   :  { %1557 = vmatpush.msrb.mxu3 %v1384_v4  ;;  %1538 = vmatpush.msrb.mxu2 %v1316_v52  ;;  %v938_v4 = vmul.f32 %v5383_v55, %v5335_v44  ;;  %v1304_v23 = vunpack.c.h.bf16 %v5210_v29  ;;  %v1157_v1 = vunpack.c.l.bf16 %v5387_v57  ;;  %v1282_v52 = vunpack.c.h.bf16 %v5227_v43 }
 0x13e   :  { %v912_v26 = vsub.f32 %v904_v17, %v908_v9  ;;  %1582 = vmatpush.msra.mxu0 %v1173_v59  ;;  %1602 = vmatpush.msra.mxu1 %v1237_v38  ;;  %v1368_v59 = vunpack.c.h.bf16 %v5212_v63  ;;  %v1218_v38 = vunpack.c.h.bf16 %v5221_v11  ;;  %v1300_v63 = vunpack.c.h.bf16 %v5217_v48 }
 0x13f   :  { %1558 = vmatpush.msrb.mxu3 %v1380_v51  ;;  %1539 = vmatpush.msrb.mxu2 %v1312_v58  ;;  %v939_v29 = vmul.f32 %v5383_v55, %v938_v4  ;;  %v1364_v51 = vunpack.c.h.bf16 %v5219_v39  ;;  %v1214_v17 = vunpack.c.h.bf16 %v5233_v62  ;;  %v1278_v9 = vunpack.c.h.bf16 %v5237_v50 }
 0x140   :  { %v5393_v5 = vadd.f32 1e-05, %v912_v26  ;;  %1583 = vmatpush.msra.mxu0 %v1169_v31  ;;  %1603 = vmatpush.msra.mxu1 %v1233_v37  ;;  %v1296_v11 = vunpack.c.h.bf16 %v5229_v24  ;;  %v1360_v43 = vunpack.c.h.bf16 %v5231_v8  ;;  %v1210_v48 = vunpack.c.h.bf16 %v5245_v32 }
 0x141   :  { %1559 = vmatpush.msrb.mxu3 %v1376_v7  ;;  %1540 = vmatpush.msrb.mxu2 %v1308_v46  ;;  %v1274_v39 = vunpack.c.h.bf16 %v5251_v13  ;;  %v940_v37 = vmul.f32 0.5, %v939_v29  ;;  %v1292_v50 = vunpack.c.h.bf16 %v5239_v25  ;;  %v1356_v58 = vunpack.c.h.bf16 %v5241_v0  ;;  %v7151_v13 = vld [vmem:[#allocation19_spill] sm:$0xff]  ;;  %v7153_v25 = vld [vmem:[#allocation25_spill] sm:$0xff] }
 0x142   :  { %4130 = vrsqrt.f32 %v5393_v5  ;;  %1584 = vmatpush.msra.mxu0 %v1165_v36  ;;  %1604 = vmatpush.msra.mxu1 %v1229_v30  ;;  %v1206_v24 = vunpack.c.h.bf16 %v5261_v45  ;;  %v1270_v8 = vunpack.c.h.bf16 %v5265_v47  ;;  %v1288_v32 = vunpack.c.h.bf16 %v5255_v53  ;;  %v7152_v36 = vld [vmem:[#allocation24_spill] sm:$0xff]  ;;  %v7155_v47 = vld [vmem:[#allocation21_spill] sm:$0xff]  ;;  %v7156_v53 = vld [vmem:[#allocation27_spill] sm:$0xff] }
 0x143   :  { %1560 = vmatpush.msrb.mxu3 %v1372_v16  ;;  %1541 = vmatpush.msrb.mxu2 %v1304_v23  ;;  %v1352_v26 = vunpack.c.h.bf16 %v7151_v13  ;;  %v1202_v30 = vunpack.c.h.bf16 %v7152_v36  ;;  %v1266_v46 = vunpack.c.h.bf16 %v7153_v25  ;;  %v941_v0 = vsub.f32 1.5, %v940_v37  ;;  %v7154_v45 = vld [vmem:[#allocation20_spill] sm:$0xff] }
 0x144   :  { %1585 = vmatpush.msra.mxu0 %v1161_v40  ;;  %1605 = vmatpush.msra.mxu1 %v1225_v14  ;;  %v1284_v40 = vunpack.c.h.bf16 %v7154_v45  ;;  %v1348_v14 = vunpack.c.h.bf16 %v7155_v47  ;;  %v1198_v4 = vunpack.c.h.bf16 %v7156_v53  ;;  %v7157_v23 = vld [vmem:[#allocation28_spill] sm:$0xff]  ;;  %vm953_vm13 = vweird.f32 %v5393_v5  ;;  %v5469_v45 = vld [vmem:[#allocation5 + $0x6f8] sm:$0xff] }
 0x145   :  { %1561 = vmatpush.msrb.mxu3 %v1368_v59  ;;  %1542 = vmatpush.msrb.mxu2 %v1300_v63  ;;  %v1262_v59 = vunpack.c.h.bf16 %v7157_v23  ;;  %v942_v29 = vmul.f32 %v5383_v55, %v941_v0  ;;  %v1186_v44 = vunpack.c.h.bf16 %v5320_v34  ;;  %v1178_v37 = vunpack.c.h.bf16 %v5338_v6  ;;  %v7161_v6 = vld [vmem:[#allocation23_spill] sm:$0xff]  ;;  %v5499_v63 = vld [vmem:[#allocation5 + $0x6b8] sm:$0xff] }
 0x146   :  { %1586 = vmatpush.msra.mxu0 %v1157_v1  ;;  %1606 = vmatpush.msra.mxu1 %v1221_v22  ;;  %v7158_v22 = vld [vmem:[#allocation29_spill] sm:$0xff]  ;;  %v1242_v34 = vunpack.c.h.bf16 %v5340_v33  ;;  %v1158_v36 = vunpack.c.h.bf16 %v5387_v57  ;;  %v5473_v57 = vld [vmem:[#allocation5 + $0x6e8] sm:$0xff] }
 0x147   :  { %1587 = vmatmul.f32.vlgmr.msra.gmra.mxu0 %v5247_v35  ;;  %1607 = vmatmul.f32.vlgmr.msra.gmra.mxu1 %v5249_v10 }
 0x148   :  { %v4131_v31 = vpop.eup %4130  ;;  %1651 = vmatpush.msrb.mxu0 %v1218_v38  ;;  %1671 = vmatpush.msrb.mxu1 %v1282_v52  ;;  %v1194_v38 = vunpack.c.h.bf16 %v7158_v22  ;;  %v1258_v52 = vunpack.c.h.bf16 %v5303_v3  ;;  %v1254_v3 = vunpack.c.h.bf16 %v5315_v12  ;;  %v1246_v12 = vunpack.c.h.bf16 %v5331_v60 }
 0x149   :  { %v948_v62 = vmul.f32 %v4131_v31, %v5393_v5  ;;  %1562 = vmatpush.msrb.mxu3 %v1364_v51  ;;  %1543 = vmatpush.msrb.mxu2 %v1296_v11  ;;  %vm954_vm11 = vweird.f32 %v4131_v31  ;;  %v112_v11 = vld [vmem:[#allocation7 + $0x8] sm:$0xff]  ;;  %v946_v5 = vsel %vm5437_vm12, %v5383_v55, %v942_v29  ;;  %v1174_v55 = vunpack.c.h.bf16 %v5347_v61 }
 0x14a   :  { %1652 = vmatpush.msrb.mxu0 %v1214_v17  ;;  %1672 = vmatpush.msrb.mxu1 %v1278_v9  ;;  %vm955_vm14 = vmor %vm953_vm13, %vm954_vm11  ;;  %v1190_v17 = vunpack.c.h.bf16 %v5313_v28  ;;  %v1182_v28 = vunpack.c.h.bf16 %v5329_v21  ;;  %v1170_v21 = vunpack.c.h.bf16 %v5355_v49  ;;  %v1234_v60 = vunpack.c.h.bf16 %v5357_v56 }
 0x14b   :  { %v949_v7 = vmul.f32 %v4131_v31, %v948_v62  ;;  %1563 = vmatpush.msrb.mxu3 %v1360_v43  ;;  %1544 = vmatpush.msrb.mxu2 %v1292_v50  ;;  %v1238_v50 = vunpack.c.h.bf16 %v5349_v18  ;;  %v1230_v61 = vunpack.c.h.bf16 %v5368_v41  ;;  %v1226_v49 = vunpack.c.h.bf16 %v5379_v54  ;;  %v7162_v41 = vld [vmem:[#allocation26_spill] sm:$0xff] }
 0x14c   :  { %1653 = vmatpush.msrb.mxu0 %v1210_v48  ;;  %1673 = vmatpush.msrb.mxu1 %v1274_v39  ;;  %v1250_v48 = vunpack.c.h.bf16 %v5322_v42  ;;  %v5471_v54 = vld [vmem:[#allocation5 + $0x7f8] sm:$0xff]  ;;  %v1341_v22 = vunpack.c.l.bf16 %v5473_v57 }
 0x14d   :  { %v950_v16 = vmul.f32 0.5, %v949_v7  ;;  %1564 = vmatpush.msrb.mxu3 %v1356_v58  ;;  %1545 = vmatpush.msrb.mxu2 %v1288_v32  ;;  %v1166_v7 = vunpack.c.h.bf16 %v5366_v19  ;;  %v1222_v19 = vunpack.c.h.bf16 %v5389_v15  ;;  %v5475_v15 = vld [vmem:[#allocation5 + $0x7e8] sm:$0xff]  ;;  %v1409_v53 = vunpack.c.l.bf16 %v5471_v54 }
 0x14e   :  { %1654 = vmatpush.msrb.mxu0 %v1206_v24  ;;  %1674 = vmatpush.msrb.mxu1 %v1270_v8  ;;  %v114_v24 = vld [vmem:[#allocation8 + $0x8] sm:$0xff] }
 0x14f   :  { %v951_v1 = vsub.f32 1.5, %v950_v16  ;;  %1565 = vmatpush.msrb.mxu3 %v1352_v26  ;;  %1546 = vmatpush.msrb.mxu2 %v1284_v40 }
 0x150   :  { %1655 = vmatpush.msrb.mxu0 %v1202_v30  ;;  %1675 = vmatpush.msrb.mxu1 %v1266_v46 }
 0x151   :  { %v952_v51 = vmul.f32 %v4131_v31, %v951_v1  ;;  %1566 = vmatpush.msrb.mxu3 %v1348_v14  ;;  %v1345_v14 = vunpack.c.l.bf16 %v5469_v45  ;;  %v5487_v1 = vld [vmem:[#allocation5 + $0x7d8] sm:$0xff] }
 0x152   :  { %1656 = vmatpush.msrb.mxu0 %v1198_v4  ;;  %1676 = vmatpush.msrb.mxu1 %v1262_v59  ;;  %v5485_v59 = vld [vmem:[#allocation5 + $0x6d8] sm:$0xff]  ;;  %v1401_v29 = vunpack.c.l.bf16 %v5487_v1 }
 0x153   :  { %v956_v9 = vsel %vm955_vm14, %v4131_v31, %v952_v51  ;;  %v5501_v51 = vld [vmem:[#allocation5 + $0x7b8] sm:$0xff] }
 0x154   :  { %v962_v43 = vrot.slane %v956_v9, 4  ;;  %1657 = vmatpush.msrb.mxu0 %v1194_v38  ;;  %1677 = vmatpush.msrb.mxu1 %v1258_v52  ;;  %v1405_v38 = vunpack.c.l.bf16 %v5475_v15  ;;  %v5493_v52 = vld [vmem:[#allocation5 + $0x6c8] sm:$0xff] }
 0x155   :  { %v5505_v9 = vld [vmem:[#allocation5 + $0x6a8] sm:$0xff] }
 0x156   :  { %v965_v39 = vsel %vm963_vm8, %v946_v5, %v962_v43  ;;  %1658 = vmatpush.msrb.mxu0 %v1190_v17  ;;  %1678 = vmatpush.msrb.mxu1 %v1254_v3  ;;  %v1333_v17 = vunpack.c.l.bf16 %v5493_v52  ;;  %v1329_v43 = vunpack.c.l.bf16 %v5499_v63  ;;  %v5513_v5 = vld [vmem:[#allocation5 + $0x798] sm:$0xff] }
 0x157   :  { %v969_v31 = vmul.f32 %v965_v39, %v112_v11  ;;  %v5507_v11 = vld [vmem:[#allocation5 + $0x7a8] sm:$0xff]  ;;  %v1325_v39 = vunpack.c.l.bf16 %v5505_v9 }
 0x158   :  { %1659 = vmatpush.msrb.mxu0 %v1186_v44  ;;  %1679 = vmatpush.msrb.mxu1 %v1250_v48  ;;  %v1393_v44 = vunpack.c.l.bf16 %v5501_v51  ;;  %v5511_v48 = vld [vmem:[#allocation5 + $0x698] sm:$0xff] }
 0x159   :  { %v974_v42 = vperm.slane %v969_v31, 0  ;;  %v975_v62 = vperm.slane %v969_v31, 4  ;;  %v5521_v31 = vld [vmem:[#allocation5 + $0x788] sm:$0xff] }
 0x15a   :  { %1660 = vmatpush.msrb.mxu0 %v1182_v28  ;;  %1680 = vmatpush.msrb.mxu1 %v1246_v12  ;;  %v1389_v28 = vunpack.c.l.bf16 %v5507_v11  ;;  %v5519_v12 = vld [vmem:[#allocation5 + $0x688] sm:$0xff] }
 0x15b   :  { %v983_v58 = vmul.f32 %v975_v62, %v5362_v27  ;;  %v982_v8 = vmul.f32 %v974_v42, %v7161_v6  ;;  %v1162_v27 = vunpack.c.h.bf16 %v5377_v20  ;;  %v999_v13 = vperm.slane %v975_v62, 0  ;;  %v7163_v20 = vld [vmem:[#allocation22_spill] sm:$0xff] }
 0x15c   :  { %1661 = vmatpush.msrb.mxu0 %v1178_v37  ;;  %1681 = vmatpush.msrb.mxu1 %v1242_v34  ;;  %v998_v56 = vperm.slane %v974_v42, 0  ;;  %v1321_v37 = vunpack.c.l.bf16 %v5511_v48  ;;  %v1385_v34 = vunpack.c.l.bf16 %v5513_v5  ;;  %v5525_v42 = vld [vmem:[#allocation5 + $0x678] sm:$0xff] }
 0x15d   :  { %v989_v33 = vrot.slane %v983_v58, 4  ;;  %v1003_v25 = vmul.f32 %v999_v13, %v7162_v41  ;;  %v5527_v62 = vld [vmem:[#allocation5 + $0x778] sm:$0xff]  ;;  %v5531_v58 = vld [vmem:[#allocation5 + $0x668] sm:$0xff] }
 0x15e   :  { %1662 = vmatpush.msrb.mxu0 %v1174_v55  ;;  %1682 = vmatpush.msrb.mxu1 %v1238_v50  ;;  %v1002_v0 = vmul.f32 %v998_v56, %v7163_v20  ;;  %v1317_v55 = vunpack.c.l.bf16 %v5519_v12  ;;  %v1381_v50 = vunpack.c.l.bf16 %v5521_v31  ;;  %v5537_v6 = vld [vmem:[#allocation5 + $0x658] sm:$0xff] }
 0x15f   :  { %v991_v18 = vsel %vm963_vm8, %v982_v8, %v989_v33  ;;  %v5539_v8 = vld [vmem:[#allocation5 + $0x758] sm:$0xff]  ;;  %v1309_v33 = vunpack.c.l.bf16 %v5531_v58 }
 0x160   :  { %v995_v32 = vsub.f32 %v114_v24, %v991_v18  ;;  %1663 = vmatpush.msrb.mxu0 %v1170_v21  ;;  %1683 = vmatpush.msrb.mxu1 %v1234_v60  ;;  %v5533_v21 = vld [vmem:[#allocation5 + $0x768] sm:$0xff]  ;;  %v1313_v60 = vunpack.c.l.bf16 %v5525_v42  ;;  %v1377_v24 = vunpack.c.l.bf16 %v5527_v62  ;;  %v5549_v13 = vld [vmem:[#allocation5 + $0x638] sm:$0xff] }
 0x161   :  { %v5545_v18 = vld [vmem:[#allocation5 + $0x748] sm:$0xff] }
 0x162   :  { %v1009_v26 = vperm.slane %v995_v32, 4  ;;  %1664 = vmatpush.msrb.mxu0 %v1166_v7  ;;  %1684 = vmatpush.msrb.mxu1 %v1230_v61  ;;  %v1008_v30 = vperm.slane %v995_v32, 0  ;;  %v1373_v7 = vunpack.c.l.bf16 %v5533_v21  ;;  %v5543_v61 = vld [vmem:[#allocation5 + $0x648] sm:$0xff]  ;;  %v1369_v32 = vunpack.c.l.bf16 %v5539_v8 }
 0x163   :  { %v1301_v56 = vunpack.c.l.bf16 %v5543_v61 }
 0x164   :  { %v1017_v46 = vperm.slane %v1009_v26, 0  ;;  %1665 = vmatpush.msrb.mxu0 %v1162_v27  ;;  %1685 = vmatpush.msrb.mxu1 %v1226_v49  ;;  %v1016_v16 = vperm.slane %v1008_v30, 0  ;;  %v1305_v27 = vunpack.c.l.bf16 %v5537_v6  ;;  %v5551_v49 = vld [vmem:[#allocation5 + $0x738] sm:$0xff]  ;;  %v1365_v26 = vunpack.c.l.bf16 %v5545_v18 }
 0x165   :  { %v1297_v30 = vunpack.c.l.bf16 %v5549_v13  ;;  %v1361_v41 = vunpack.c.l.bf16 %v5551_v49 }
 0x166   :  { %v1021_v40 = vadd.f32 %v1017_v46, %v1003_v25  ;;  %1666 = vmatpush.msrb.mxu0 %v1158_v36  ;;  %1686 = vmatpush.msrb.mxu1 %v1222_v19  ;;  %v1020_v47 = vadd.f32 %v1016_v16, %v1002_v0  ;;  %v5555_v36 = vld [vmem:[#allocation5 + $0x628] sm:$0xff]  ;;  %v5561_v25 = vld [vmem:[#allocation5 + $0x618] sm:$0xff] }
 0x167   :  { %1667 = vmatmul.f32.vlgmr.msrb.gmra.mxu0 %v5247_v35  ;;  %1687 = vmatmul.f32.vlgmr.msrb.gmra.mxu1 %v5249_v10  ;;  %v5495_v35 = vld [vmem:[#allocation5 + $0x7c8] sm:$0xff]  ;;  %v1337_v10 = vunpack.c.l.bf16 %v5485_v59  ;;  %v5563_v46 = vld [vmem:[#allocation5 + $0x718] sm:$0xff]  ;;  %v1293_v20 = vunpack.c.l.bf16 %v5555_v36 }
 0x168   :  { %v5481_v4 = vmax.f32 %v1020_v47, 0.0  ;;  %v5483_v23 = vmax.f32 %v1021_v40, 0.0  ;;  %v1397_v3 = vunpack.c.l.bf16 %v5495_v35  ;;  %v5557_v19 = vld [vmem:[#allocation5 + $0x728] sm:$0xff]  ;;  %v1289_v47 = vunpack.c.l.bf16 %v5561_v25 }
 0x169   :  { %v1357_v0 = vunpack.c.l.bf16 %v5557_v19  ;;  %v5567_v16 = vld [vmem:[#allocation5 + $0x608] sm:$0xff] }
 0x16a   :  { %1467 = vmatmul.f32.vlgmr.msra.gmra.mxu2 %v5481_v4  ;;  %1487 = vmatmul.f32.vlgmr.msra.gmra.mxu3 %v5483_v23  ;;  %v5569_v40 = vld [vmem:[#allocation5 + $0x708] sm:$0xff] }
 0x16b   :  { %1611 = vmatpush.msra.mxu2 %v1345_v14  ;;  %1631 = vmatpush.msra.mxu3 %v1409_v53  ;;  %v1353_v14 = vunpack.c.l.bf16 %v5563_v46  ;;  %v1285_v53 = vunpack.c.l.bf16 %v5567_v16 }
 0x16d   :  { %1612 = vmatpush.msra.mxu2 %v1341_v22  ;;  %1632 = vmatpush.msra.mxu3 %v1405_v38  ;;  %v1349_v22 = vunpack.c.l.bf16 %v5569_v40  ;;  %v1346_v38 = vunpack.c.h.bf16 %v5469_v45  ;;  %v1334_v45 = vunpack.c.h.bf16 %v5493_v52  ;;  %v1386_v52 = vunpack.c.h.bf16 %v5513_v5 }
 0x16e   :  { %v1306_v5 = vunpack.c.h.bf16 %v5537_v6 }
 0x16f   :  { %1613 = vmatpush.msra.mxu2 %v1337_v10  ;;  %1633 = vmatpush.msra.mxu3 %v1401_v29  ;;  %v1410_v10 = vunpack.c.h.bf16 %v5471_v54  ;;  %v1342_v29 = vunpack.c.h.bf16 %v5473_v57  ;;  %v1398_v54 = vunpack.c.h.bf16 %v5495_v35  ;;  %v1330_v57 = vunpack.c.h.bf16 %v5499_v63 }
 0x170   :  { %v1318_v35 = vunpack.c.h.bf16 %v5519_v12  ;;  %v1382_v63 = vunpack.c.h.bf16 %v5521_v31  ;;  %v1366_v12 = vunpack.c.h.bf16 %v5545_v18  ;;  %v1298_v31 = vunpack.c.h.bf16 %v5549_v13  ;;  %v5631_v13 = vld [vmem:[#allocation5 + $0x9c0] sm:$0xff] }
 0x171   :  { %1614 = vmatpush.msra.mxu2 %v1333_v17  ;;  %1634 = vmatpush.msra.mxu3 %v1397_v3  ;;  %v1406_v17 = vunpack.c.h.bf16 %v5475_v15  ;;  %v1338_v3 = vunpack.c.h.bf16 %v5485_v59  ;;  %v1394_v15 = vunpack.c.h.bf16 %v5501_v51  ;;  %v1390_v59 = vunpack.c.h.bf16 %v5507_v11 }
 0x172   :  { %1547 = vmatmul.f32.vlgmr.msrb.gmra.mxu2 %v5481_v4  ;;  %1567 = vmatmul.f32.vlgmr.msrb.gmra.mxu3 %v5483_v23  ;;  %v1314_v51 = vunpack.c.h.bf16 %v5525_v42  ;;  %v1310_v11 = vunpack.c.h.bf16 %v5531_v58  ;;  %v1358_v42 = vunpack.c.h.bf16 %v5557_v19  ;;  %v1350_v58 = vunpack.c.h.bf16 %v5569_v40  ;;  %v5647_v40 = vld [vmem:[#allocation5 + $0x890] sm:$0xff] }
 0x173   :  { %1615 = vmatpush.msra.mxu2 %v1329_v43  ;;  %1635 = vmatpush.msra.mxu3 %v1393_v44  ;;  %v1402_v43 = vunpack.c.h.bf16 %v5487_v1  ;;  %v1326_v44 = vunpack.c.h.bf16 %v5505_v9  ;;  %v1322_v1 = vunpack.c.h.bf16 %v5511_v48  ;;  %v1378_v9 = vunpack.c.h.bf16 %v5527_v62 }
 0x174   :  { %v1374_v48 = vunpack.c.h.bf16 %v5533_v21  ;;  %v1290_v62 = vunpack.c.h.bf16 %v5561_v25  ;;  %v5611_v21 = vld [vmem:[#allocation5 + $0x8f0] sm:$0xff]  ;;  %v5643_v25 = vld [vmem:[#allocation5 + $0x9a0] sm:$0xff] }
 0x175   :  { %1616 = vmatpush.msra.mxu2 %v1325_v39  ;;  %1636 = vmatpush.msra.mxu3 %v1389_v28  ;;  %v1370_v39 = vunpack.c.h.bf16 %v5539_v8  ;;  %v1302_v28 = vunpack.c.h.bf16 %v5543_v61  ;;  %v5617_v8 = vld [vmem:[#allocation5 + $0x8e0] sm:$0xff]  ;;  %v5623_v61 = vld [vmem:[#allocation5 + $0x8d0] sm:$0xff] }
 0x176   :  { %v2104_v18 = vunpack.c.l.bf16 %v5623_v61 }
 0x177   :  { %1617 = vmatpush.msra.mxu2 %v1321_v37  ;;  %1637 = vmatpush.msra.mxu3 %v1385_v34  ;;  %v1362_v37 = vunpack.c.h.bf16 %v5551_v49  ;;  %v1294_v34 = vunpack.c.h.bf16 %v5555_v36  ;;  %v5637_v36 = vld [vmem:[#allocation5 + $0x9b0] sm:$0xff] }
 0x179   :  { %1618 = vmatpush.msra.mxu2 %v1317_v55  ;;  %1638 = vmatpush.msra.mxu3 %v1381_v50  ;;  %v1354_v55 = vunpack.c.h.bf16 %v5563_v46  ;;  %v1286_v50 = vunpack.c.h.bf16 %v5567_v16  ;;  %v2156_v16 = vunpack.c.l.bf16 %v5643_v25 }
 0x17b   :  { %1619 = vmatpush.msra.mxu2 %v1313_v60  ;;  %1639 = vmatpush.msra.mxu3 %v1377_v24  ;;  %v5613_v60 = vld [vmem:[#allocation5 + $0x9f0] sm:$0xff]  ;;  %v2112_v24 = vunpack.c.l.bf16 %v5611_v21 }
 0x17c   :  { %v2176_v6 = vunpack.c.l.bf16 %v5613_v60 }
 0x17d   :  { %1620 = vmatpush.msra.mxu2 %v1309_v33  ;;  %1640 = vmatpush.msra.mxu3 %v1373_v7  ;;  %v5619_v33 = vld [vmem:[#allocation5 + $0x9e0] sm:$0xff]  ;;  %v2108_v7 = vunpack.c.l.bf16 %v5617_v8 }
 0x17e   :  { %2308 = vmatpush.msra.mxu0 %v2112_v24  ;;  %2328 = vmatpush.msra.mxu1 %v2176_v6  ;;  %v5692_v24 = vld [vmem:[#allocation5 + $0x930] sm:$0xff] }
 0x17f   :  { %1621 = vmatpush.msra.mxu2 %v1305_v27  ;;  %1641 = vmatpush.msra.mxu3 %v1369_v32  ;;  %v5629_v32 = vld [vmem:[#allocation5 + $0x8c0] sm:$0xff] }
 0x180   :  { %2309 = vmatpush.msra.mxu0 %v2108_v7  ;;  %v2100_v49 = vunpack.c.l.bf16 %v5629_v32 }
 0x181   :  { %1622 = vmatpush.msra.mxu2 %v1301_v56  ;;  %1642 = vmatpush.msra.mxu3 %v1365_v26  ;;  %v2164_v56 = vunpack.c.l.bf16 %v5631_v13  ;;  %v5635_v26 = vld [vmem:[#allocation5 + $0x8b0] sm:$0xff] }
 0x182   :  { %2310 = vmatpush.msra.mxu0 %v2104_v18  ;;  %v2096_v19 = vunpack.c.l.bf16 %v5635_v26 }
 0x183   :  { %1623 = vmatpush.msra.mxu2 %v1297_v30  ;;  %1643 = vmatpush.msra.mxu3 %v1361_v41  ;;  %v2160_v30 = vunpack.c.l.bf16 %v5637_v36  ;;  %v5641_v41 = vld [vmem:[#allocation5 + $0x8a0] sm:$0xff] }
 0x184   :  { %2311 = vmatpush.msra.mxu0 %v2100_v49 }
 0x185   :  { %1624 = vmatpush.msra.mxu2 %v1293_v20  ;;  %1644 = vmatpush.msra.mxu3 %v1357_v0  ;;  %v2092_v0 = vunpack.c.l.bf16 %v5641_v41 }
 0x186   :  { %2312 = vmatpush.msra.mxu0 %v2096_v19  ;;  %v5698_v19 = vld [vmem:[#allocation5 + $0x920] sm:$0xff] }
 0x187   :  { %1625 = vmatpush.msra.mxu2 %v1289_v47  ;;  %1645 = vmatpush.msra.mxu3 %v1353_v14  ;;  %v5649_v47 = vld [vmem:[#allocation5 + $0x990] sm:$0xff]  ;;  %v2088_v14 = vunpack.c.l.bf16 %v5647_v40 }
 0x188   :  { %2313 = vmatpush.msra.mxu0 %v2092_v0 }
 0x189   :  { %1626 = vmatpush.msra.mxu2 %v1285_v53  ;;  %1646 = vmatpush.msra.mxu3 %v1349_v22  ;;  %v2152_v53 = vunpack.c.l.bf16 %v5649_v47  ;;  %v5653_v22 = vld [vmem:[#allocation5 + $0x880] sm:$0xff] }
 0x18a   :  { %1627 = vmatmul.f32.vlgmr.msra.gmra.mxu2 %v5481_v4  ;;  %1647 = vmatmul.f32.vlgmr.msra.gmra.mxu3 %v5483_v23 }
 0x18b   :  { %1691 = vmatpush.msrb.mxu2 %v1346_v38  ;;  %1711 = vmatpush.msrb.mxu3 %v1410_v10  ;;  %v5655_v38 = vld [vmem:[#allocation5 + $0x980] sm:$0xff]  ;;  %v2084_v10 = vunpack.c.l.bf16 %v5653_v22 }
 0x18c   :  { %2314 = vmatpush.msra.mxu0 %v2088_v14 }
 0x18d   :  { %1692 = vmatpush.msrb.mxu2 %v1342_v29  ;;  %1712 = vmatpush.msrb.mxu3 %v1406_v17  ;;  %v2148_v29 = vunpack.c.l.bf16 %v5655_v38 }
 0x18e   :  { %2315 = vmatpush.msra.mxu0 %v2084_v10  ;;  %v5706_v10 = vld [vmem:[#allocation5 + $0x910] sm:$0xff] }
 0x18f   :  { %1693 = vmatpush.msrb.mxu2 %v1338_v3  ;;  %1713 = vmatpush.msrb.mxu3 %v1402_v43  ;;  %v5659_v3 = vld [vmem:[#allocation5 + $0x870] sm:$0xff] }
 0x190   :  { %v5661_v43 = vld [vmem:[#allocation5 + $0x970] sm:$0xff] }
 0x191   :  { %1694 = vmatpush.msrb.mxu2 %v1334_v45  ;;  %1714 = vmatpush.msrb.mxu3 %v1398_v54 }
 0x193   :  { %1695 = vmatpush.msrb.mxu2 %v1330_v57  ;;  %1715 = vmatpush.msrb.mxu3 %v1394_v15  ;;  %v2080_v57 = vunpack.c.l.bf16 %v5659_v3  ;;  %v2144_v15 = vunpack.c.l.bf16 %v5661_v43 }
 0x195   :  { %1696 = vmatpush.msrb.mxu2 %v1326_v44  ;;  %1716 = vmatpush.msrb.mxu3 %v1390_v59  ;;  %v5665_v59 = vld [vmem:[#allocation5 + $0x860] sm:$0xff] }
 0x196   :  { %2316 = vmatpush.msra.mxu0 %v2080_v57 }
 0x197   :  { %1697 = vmatpush.msrb.mxu2 %v1322_v1  ;;  %1717 = vmatpush.msrb.mxu3 %v1386_v52  ;;  %v5667_v1 = vld [vmem:[#allocation5 + $0x960] sm:$0xff]  ;;  %v2076_v52 = vunpack.c.l.bf16 %v5665_v59 }
 0x199   :  { %1698 = vmatpush.msrb.mxu2 %v1318_v35  ;;  %1718 = vmatpush.msrb.mxu3 %v1382_v63  ;;  %v2140_v35 = vunpack.c.l.bf16 %v5667_v1 }
 0x19a   :  { %2317 = vmatpush.msra.mxu0 %v2076_v52  ;;  %v5716_v52 = vld [vmem:[#allocation5 + $0x900] sm:$0xff] }
 0x19b   :  { %1699 = vmatpush.msrb.mxu2 %v1314_v51  ;;  %1719 = vmatpush.msrb.mxu3 %v1378_v9  ;;  %v5673_v51 = vld [vmem:[#allocation5 + $0x850] sm:$0xff] }
 0x19c   :  { %v5675_v9 = vld [vmem:[#allocation5 + $0x950] sm:$0xff] }
 0x19d   :  { %1700 = vmatpush.msrb.mxu2 %v1310_v11  ;;  %1720 = vmatpush.msrb.mxu3 %v1374_v48 }
 0x19f   :  { %1701 = vmatpush.msrb.mxu2 %v1306_v5  ;;  %1721 = vmatpush.msrb.mxu3 %v1370_v39  ;;  %v2072_v5 = vunpack.c.l.bf16 %v5673_v51  ;;  %v2136_v39 = vunpack.c.l.bf16 %v5675_v9 }
 0x1a1   :  { %1702 = vmatpush.msrb.mxu2 %v1302_v28  ;;  %1722 = vmatpush.msrb.mxu3 %v1366_v12 }
 0x1a2   :  { %2318 = vmatpush.msra.mxu0 %v2072_v5 }
 0x1a3   :  { %1703 = vmatpush.msrb.mxu2 %v1298_v31  ;;  %1723 = vmatpush.msrb.mxu3 %v1362_v37  ;;  %v5683_v31 = vld [vmem:[#allocation5 + $0x840] sm:$0xff] }
 0x1a4   :  { %v1428_v46 = vpop.f32.mrf.mxu0  ;;  %v1448_v20 = vpop.f32.mrf.mxu1  ;;  %v5685_v37 = vld [vmem:[#allocation5 + $0x940] sm:$0xff] }
 0x1a5   :  { %1704 = vmatpush.msrb.mxu2 %v1294_v34  ;;  %1724 = vmatpush.msrb.mxu3 %v1358_v42  ;;  %v1449_v17 = vadd.f32 %v1448_v20, %v1428_v46  ;;  %v2068_v42 = vunpack.c.l.bf16 %v5683_v31 }
 0x1a7   :  { %1705 = vmatpush.msrb.mxu2 %v1290_v62  ;;  %1725 = vmatpush.msrb.mxu3 %v1354_v55  ;;  %v2132_v62 = vunpack.c.l.bf16 %v5685_v37 }
 0x1a8   :  { %2319 = vmatpush.msra.mxu0 %v2068_v42 }
 0x1a9   :  { %1706 = vmatpush.msrb.mxu2 %v1286_v50  ;;  %1726 = vmatpush.msrb.mxu3 %v1350_v58  ;;  %v5690_v58 = vld [vmem:[#allocation5 + $0x830] sm:$0xff] }
 0x1aa   :  { %1707 = vmatmul.f32.vlgmr.msrb.gmra.mxu2 %v5481_v4  ;;  %1727 = vmatmul.f32.vlgmr.msrb.gmra.mxu3 %v5483_v23  ;;  %v2172_v4 = vunpack.c.l.bf16 %v5619_v33  ;;  %v5625_v23 = vld [vmem:[#allocation5 + $0x9d0] sm:$0xff]  ;;  %v2064_v18 = vunpack.c.l.bf16 %v5690_v58 }
 0x1ab   :  { %v2168_v27 = vunpack.c.l.bf16 %v5625_v23 }
 0x1ac   :  { %2329 = vmatpush.msra.mxu1 %v2172_v4  ;;  %v1508_v11 = vpop.f32.mrf.mxu0  ;;  %v1528_v48 = vpop.f32.mrf.mxu1  ;;  %2320 = vmatpush.msra.mxu0 %v2064_v18 }
 0x1ad   :  { %v1529_v55 = vadd.f32 %v1528_v48, %v1508_v11 }
 0x1ae   :  { %2330 = vmatpush.msra.mxu1 %v2168_v27  ;;  %v2128_v27 = vunpack.c.l.bf16 %v5692_v24 }
 0x1b0   :  { %2331 = vmatpush.msra.mxu1 %v2164_v56  ;;  %v5696_v56 = vld [vmem:[#allocation5 + $0x820] sm:$0xff] }
 0x1b1   :  { %v2060_v0 = vunpack.c.l.bf16 %v5696_v56 }
 0x1b2   :  { %2332 = vmatpush.msra.mxu1 %v2160_v30 }
 0x1b3   :  { %2321 = vmatpush.msra.mxu0 %v2060_v0  ;;  %v2165_v0 = vunpack.c.h.bf16 %v5631_v13 }
 0x1b4   :  { %2333 = vmatpush.msra.mxu1 %v2156_v16  ;;  %v2124_v16 = vunpack.c.l.bf16 %v5698_v19 }
 0x1b6   :  { %2334 = vmatpush.msra.mxu1 %v2152_v53  ;;  %v5704_v53 = vld [vmem:[#allocation5 + $0x810] sm:$0xff] }
 0x1b8   :  { %2335 = vmatpush.msra.mxu1 %v2148_v29 }
 0x1ba   :  { %2336 = vmatpush.msra.mxu1 %v2144_v15 }
 0x1bc   :  { %2337 = vmatpush.msra.mxu1 %v2140_v35 }
 0x1be   :  { %2338 = vmatpush.msra.mxu1 %v2136_v39 }
 0x1c0   :  { %2339 = vmatpush.msra.mxu1 %v2132_v62 }
 0x1c2   :  { %2340 = vmatpush.msra.mxu1 %v2128_v27 }
 0x1c4   :  { %2341 = vmatpush.msra.mxu1 %v2124_v16 }
 0x1ed   :  { %v1468_v45 = vpop.f32.mrf.mxu2  ;;  %v1488_v54 = vpop.f32.mrf.mxu3 }
 0x1ee   :  { %v1469_v44 = vadd.f32 %v1468_v45, %v1449_v17  ;;  %v2056_v45 = vunpack.c.l.bf16 %v5704_v53 }
 0x1f0   :  { %v5671_v63 = vadd.f32 %v1488_v54, %v1469_v44  ;;  %v2120_v54 = vunpack.c.l.bf16 %v5706_v10  ;;  %v5714_v44 = vld [vmem:[#allocation5 + $0x800] sm:$0xff]  ;;  %2322 = vmatpush.msra.mxu0 %v2056_v45 }
 0x1f1   :  { %v2052_v5 = vunpack.c.l.bf16 %v5714_v44 }
 0x1f2   :  { %v1731_v28 = vsel %vm829_vm0, %v5671_v63, 0.0  ;;  %v1763_v12 = vmul.f32 %v5671_v63, %v5671_v63  ;;  %2342 = vmatpush.msra.mxu1 %v2120_v54 }
 0x1f3   :  { %v1732_v34 = vrot.slane %v1731_v28, 4  ;;  %2323 = vmatpush.msra.mxu0 %v2052_v5 }
 0x1f4   :  { %v1767_v50 = vsel %vm829_vm0, %v1763_v12, 0.0  ;;  %v2113_v12 = vunpack.c.h.bf16 %v5611_v21  ;;  %v2105_v21 = vunpack.c.h.bf16 %v5623_v61  ;;  %v2097_v61 = vunpack.c.h.bf16 %v5635_v26 }
 0x1f5   :  { %v1733_v6 = vadd.f32 %v1732_v34, %v1731_v28  ;;  %v1768_v7 = vrot.slane %v1767_v50, 4  ;;  %v1548_v4 = vpop.f32.mrf.mxu2  ;;  %v1568_v20 = vpop.f32.mrf.mxu3  ;;  %v2116_v28 = vunpack.c.l.bf16 %v5716_v52  ;;  %v2177_v34 = vunpack.c.h.bf16 %v5613_v60 }
 0x1f6   :  { %v1549_v49 = vadd.f32 %v1548_v4, %v1529_v55  ;;  %2388 = vmatpush.msrb.mxu0 %v2113_v12  ;;  %v2169_v60 = vunpack.c.h.bf16 %v5625_v23  ;;  %v2161_v23 = vunpack.c.h.bf16 %v5637_v36  ;;  %v2089_v26 = vunpack.c.h.bf16 %v5647_v40 }
 0x1f7   :  { %v1734_v30 = vrot.slane %v1733_v6, 2  ;;  %v1769_v46 = vadd.f32 %v1768_v7, %v1767_v50  ;;  %2343 = vmatpush.msra.mxu1 %v2116_v28  ;;  %v2173_v7 = vunpack.c.h.bf16 %v5619_v33  ;;  %v2101_v33 = vunpack.c.h.bf16 %v5629_v32 }
 0x1f8   :  { %v5702_v14 = vadd.f32 %v1568_v20, %v1549_v49  ;;  %v2157_v32 = vunpack.c.h.bf16 %v5643_v25  ;;  %v2153_v36 = vunpack.c.h.bf16 %v5649_v47  ;;  %v2085_v25 = vunpack.c.h.bf16 %v5653_v22 }
 0x1f9   :  { %v1735_v29 = vadd.f32 %v1734_v30, %v1733_v6  ;;  %v1770_v17 = vrot.slane %v1769_v46, 2  ;;  %v2109_v6 = vunpack.c.h.bf16 %v5617_v8  ;;  %2408 = vmatpush.msrb.mxu1 %v2177_v34  ;;  %v2081_v40 = vunpack.c.h.bf16 %v5659_v3 }
 0x1fa   :  { %v1738_v57 = vsel %vm829_vm0, %v5702_v14, 0.0  ;;  %v1764_v15 = vmul.f32 %v5702_v14, %v5702_v14  ;;  %v2145_v47 = vunpack.c.h.bf16 %v5661_v43  ;;  %v2141_v3 = vunpack.c.h.bf16 %v5667_v1  ;;  %v5773_v1 = vld [vmem:[#allocation5 + $0xaf0] sm:$0xff] }
 0x1fb   :  { %v1736_v35 = vrot.slane %v1735_v29, 1  ;;  %v1771_v11 = vadd.f32 %v1770_v17, %v1769_v46  ;;  %v1739_v48 = vrot.slane %v1738_v57, 4  ;;  %2389 = vmatpush.msrb.mxu0 %v2109_v6  ;;  %2409 = vmatpush.msrb.mxu1 %v2173_v7  ;;  %v2073_v7 = vunpack.c.h.bf16 %v5673_v51 }
 0x1fc   :  { %v1774_v39 = vsel %vm829_vm0, %v1764_v15, 0.0  ;;  %v2093_v15 = vunpack.c.h.bf16 %v5641_v41  ;;  %v2133_v51 = vunpack.c.h.bf16 %v5685_v37 }
 0x1fd   :  { %v1737_v42 = vadd.f32 %v1736_v35, %v1735_v29  ;;  %v1772_v62 = vrot.slane %v1771_v11, 1  ;;  %v1740_v55 = vadd.f32 %v1739_v48, %v1738_v57  ;;  %v1775_v50 = vrot.slane %v1774_v39, 4  ;;  %2390 = vmatpush.msrb.mxu0 %v2105_v21  ;;  %2410 = vmatpush.msrb.mxu1 %v2169_v60  ;;  %v1608_v48 = vpop.f32.mrf.mxu1  ;;  %v5775_v21 = vld [vmem:[#allocation5 + $0xbf0] sm:$0xff] }
 0x1ff   :  { %v5726_v4 = vmul.f32 %v1737_v42, %v5019_v2  ;;  %v1773_v18 = vadd.f32 %v1772_v62, %v1771_v11  ;;  %v1741_v27 = vrot.slane %v1740_v55, 2  ;;  %v1776_v49 = vadd.f32 %v1775_v50, %v1774_v39  ;;  %2391 = vmatpush.msrb.mxu0 %v2101_v33  ;;  %2411 = vmatpush.msrb.mxu1 %v2165_v0  ;;  %v1588_v11 = vpop.f32.mrf.mxu0  ;;  %v5785_v33 = vld [vmem:[#allocation5 + $0xae0] sm:$0xff] }
 0x200   :  { %v2149_v39 = vunpack.c.h.bf16 %v5655_v38  ;;  %v1609_v12 = vadd.f32 %v1608_v48, %v1588_v11  ;;  %v2077_v38 = vunpack.c.h.bf16 %v5665_v59  ;;  %v5787_v0 = vld [vmem:[#allocation5 + $0xbe0] sm:$0xff] }
 0x201   :  { %v1795_v30 = vmul.f32 %v1773_v18, %v5019_v2  ;;  %v1799_v46 = vmul.f32 %v5726_v4, %v5726_v4  ;;  %v1742_v8 = vadd.f32 %v1741_v27, %v1740_v55  ;;  %v1777_v20 = vrot.slane %v1776_v49, 2  ;;  %2392 = vmatpush.msrb.mxu0 %v2097_v61  ;;  %2412 = vmatpush.msrb.mxu1 %v2161_v23  ;;  %v5808_v11 = vld [vmem:[#allocation5 + $0xbc0] sm:$0xff] }
 0x202   :  { %v2137_v18 = vunpack.c.h.bf16 %v5675_v9  ;;  %v2240_v9 = vunpack.c.l.bf16 %v5773_v1  ;;  %v2300_v61 = vunpack.c.l.bf16 %v5787_v0 }
 0x203   :  { %v1803_v16 = vsub.f32 %v1795_v30, %v1799_v46  ;;  %v1743_v29 = vrot.slane %v1742_v8, 1  ;;  %v1778_v17 = vadd.f32 %v1777_v20, %v1776_v49  ;;  %2393 = vmatpush.msrb.mxu0 %v2093_v15  ;;  %2413 = vmatpush.msrb.mxu1 %v2157_v32  ;;  %v2069_v49 = vunpack.c.h.bf16 %v5683_v31 }
 0x204   :  { %v2304_v30 = vunpack.c.l.bf16 %v5775_v21  ;;  %v2065_v20 = vunpack.c.h.bf16 %v5690_v58  ;;  %v2129_v31 = vunpack.c.h.bf16 %v5692_v24  ;;  %2348 = vmatpush.msra.mxu2 %v2240_v9  ;;  %v2061_v58 = vunpack.c.h.bf16 %v5696_v56  ;;  %v5796_v24 = vld [vmem:[#allocation5 + $0xad0] sm:$0xff] }
 0x205   :  { %v5737_v45 = vadd.f32 1e-05, %v1803_v16  ;;  %v1744_v54 = vadd.f32 %v1743_v29, %v1742_v8  ;;  %v1779_v57 = vrot.slane %v1778_v17, 1  ;;  %2394 = vmatpush.msrb.mxu0 %v2089_v26  ;;  %2414 = vmatpush.msrb.mxu1 %v2153_v36  ;;  %v2232_v15 = vunpack.c.l.bf16 %v5796_v24  ;;  %v5806_v36 = vld [vmem:[#allocation5 + $0xac0] sm:$0xff] }
 0x206   :  { %2368 = vmatpush.msra.mxu3 %v2304_v30  ;;  %v2057_v56 = vunpack.c.h.bf16 %v5704_v53  ;;  %v2117_v53 = vunpack.c.h.bf16 %v5716_v52 }
 0x207   :  { %4132 = vrsqrt.f32 %v5737_v45  ;;  %v5743_v13 = vmul.f32 %v1744_v54, %v5019_v2  ;;  %v1780_v35 = vadd.f32 %v1779_v57, %v1778_v17  ;;  %2395 = vmatpush.msrb.mxu0 %v2085_v25  ;;  %2415 = vmatpush.msrb.mxu1 %v2149_v39  ;;  %v2236_v17 = vunpack.c.l.bf16 %v5785_v33  ;;  %v5798_v54 = vld [vmem:[#allocation5 + $0xbd0] sm:$0xff] }
 0x208   :  { %v2125_v57 = vunpack.c.h.bf16 %v5698_v19  ;;  %2369 = vmatpush.msra.mxu3 %v2300_v61  ;;  %v2296_v26 = vunpack.c.l.bf16 %v5798_v54  ;;  %v2121_v19 = vunpack.c.h.bf16 %v5706_v10  ;;  %v2292_v39 = vunpack.c.l.bf16 %v5808_v11  ;;  %v5858_v61 = vld [vmem:[#allocation5 + $0xa60] sm:$0xff] }
 0x209   :  { %v1796_v5 = vmul.f32 %v1780_v35, %v5019_v2  ;;  %v1800_v41 = vmul.f32 %v5743_v13, %v5743_v13  ;;  %2396 = vmatpush.msrb.mxu0 %v2081_v40  ;;  %2416 = vmatpush.msrb.mxu1 %v2145_v47  ;;  %v5817_v40 = vld [vmem:[#allocation5 + $0xbb0] sm:$0xff]  ;;  %vm1817_vm4 = vweird.f32 %v5737_v45 }
 0x20a   :  { %2349 = vmatpush.msra.mxu2 %v2236_v17  ;;  %2370 = vmatpush.msra.mxu3 %v2296_v26  ;;  %v2288_v10 = vunpack.c.l.bf16 %v5817_v40  ;;  %v5864_v26 = vld [vmem:[#allocation5 + $0xa50] sm:$0xff] }
 0x20b   :  { %v1804_v28 = vsub.f32 %v1796_v5, %v1800_v41  ;;  %2397 = vmatpush.msrb.mxu0 %v2077_v38  ;;  %2417 = vmatpush.msrb.mxu1 %v2141_v3  ;;  %v2228_v41 = vunpack.c.l.bf16 %v5806_v36 }
 0x20c   :  { %2350 = vmatpush.msra.mxu2 %v2232_v15  ;;  %2371 = vmatpush.msra.mxu3 %v2292_v39  ;;  %v5872_v39 = vld [vmem:[#allocation5 + $0xb40] sm:$0xff] }
 0x20d   :  { %v5754_v34 = vpop.eup %4132  ;;  %v5756_v42 = vadd.f32 1e-05, %v1804_v28  ;;  %v1628_v62 = vpop.f32.mrf.mxu2  ;;  %2398 = vmatpush.msrb.mxu0 %v2073_v7  ;;  %2418 = vmatpush.msrb.mxu1 %v2137_v18  ;;  %v2053_v28 = vunpack.c.h.bf16 %v5714_v44  ;;  %v5824_v44 = vld [vmem:[#allocation5 + $0xba0] sm:$0xff]  ;;  %v5832_v7 = vld [vmem:[#allocation5 + $0xa90] sm:$0xff] }
 0x20e   :  { %v1812_v55 = vmul.f32 %v5754_v34, %v5737_v45  ;;  %v1629_v22 = vadd.f32 %v1628_v62, %v1609_v12  ;;  %v1648_v50 = vpop.f32.mrf.mxu3  ;;  %v5815_v12 = vld [vmem:[#allocation5 + $0xab0] sm:$0xff]  ;;  %2351 = vmatpush.msra.mxu2 %v2228_v41  ;;  %vm1818_vm1 = vweird.f32 %v5754_v34  ;;  %2372 = vmatpush.msra.mxu3 %v2288_v10  ;;  %v2260_v10 = vunpack.c.l.bf16 %v5872_v39 }
 0x20f   :  { %4134 = vrsqrt.f32 %v5756_v42  ;;  %2399 = vmatpush.msrb.mxu0 %v2069_v49  ;;  %2419 = vmatpush.msrb.mxu1 %v2133_v51  ;;  %v2224_v47 = vunpack.c.l.bf16 %v5815_v12  ;;  %vm1827_vm2 = vweird.f32 %v5756_v42  ;;  %v5834_v18 = vld [vmem:[#allocation5 + $0xb90] sm:$0xff]  ;;  %v5842_v49 = vld [vmem:[#allocation5 + $0xa80] sm:$0xff]  ;;  %vm1819_vm5 = vmor %vm1817_vm4, %vm1818_vm1 }
 0x210   :  { %v1813_v43 = vmul.f32 %v5754_v34, %v1812_v55  ;;  %v5764_v6 = vadd.f32 %v1648_v50, %v1629_v22  ;;  %v5822_v55 = vld [vmem:[#allocation5 + $0xaa0] sm:$0xff]  ;;  %v2284_v22 = vunpack.c.l.bf16 %v5824_v44  ;;  %v2212_v9 = vunpack.c.l.bf16 %v5842_v49 }
 0x211   :  { %2400 = vmatpush.msrb.mxu0 %v2065_v20  ;;  %2420 = vmatpush.msrb.mxu1 %v2129_v31  ;;  %v2220_v52 = vunpack.c.l.bf16 %v5822_v55  ;;  %v5851_v20 = vld [vmem:[#allocation5 + $0xa70] sm:$0xff] }
 0x212   :  { %v1745_v27 = vsel %vm829_vm0, %v5764_v6, 0.0  ;;  %v1765_v59 = vmul.f32 %v5764_v6, %v5764_v6  ;;  %v5780_v46 = vmul.f32 0.5, %v1813_v43  ;;  %2352 = vmatpush.msra.mxu2 %v2224_v47  ;;  %2373 = vmatpush.msra.mxu3 %v2284_v22  ;;  %v5853_v31 = vld [vmem:[#allocation5 + $0xb70] sm:$0xff] }
 0x213   :  { %v1746_v60 = vrot.slane %v1745_v27, 4  ;;  %2401 = vmatpush.msrb.mxu0 %v2061_v58  ;;  %2421 = vmatpush.msrb.mxu1 %v2125_v57  ;;  %v4156_v57 = vld [vmem:[#allocation7] sm:$0xff] }
 0x214   :  { %v1781_v8 = vsel %vm829_vm0, %v1765_v59, 0.0  ;;  %v1815_v32 = vsub.f32 1.5, %v5780_v46  ;;  %2353 = vmatpush.msra.mxu2 %v2220_v52 }
 0x215   :  { %v5789_v16 = vpop.eup %4134  ;;  %v1747_v37 = vadd.f32 %v1746_v60, %v1745_v27  ;;  %v1782_v29 = vrot.slane %v1781_v8, 4  ;;  %2402 = vmatpush.msrb.mxu0 %v2057_v56  ;;  %2422 = vmatpush.msrb.mxu1 %v2121_v19  ;;  %v2280_v27 = vunpack.c.l.bf16 %v5834_v18  ;;  %v5844_v60 = vld [vmem:[#allocation5 + $0xb80] sm:$0xff]  ;;  %v5866_v56 = vld [vmem:[#allocation5 + $0xb50] sm:$0xff] }
 0x216   :  { %v1822_v23 = vmul.f32 %v5789_v16, %v5756_v42  ;;  %vm1828_vm15 = vweird.f32 %v5789_v16  ;;  %v1816_v38 = vmul.f32 %v5754_v34, %v1815_v32  ;;  %v2216_v42 = vunpack.c.l.bf16 %v5832_v7 }
 0x217   :  { %v1748_v48 = vrot.slane %v1747_v37, 2  ;;  %v1783_v5 = vadd.f32 %v1782_v29, %v1781_v8  ;;  %2403 = vmatpush.msrb.mxu0 %v2053_v28  ;;  %2423 = vmatpush.msrb.mxu1 %v2117_v53  ;;  %vm1829_vm3 = vmor %vm1827_vm2, %vm1828_vm15  ;;  %v2276_v45 = vunpack.c.l.bf16 %v5844_v60  ;;  %v2272_v29 = vunpack.c.l.bf16 %v5853_v31  ;;  %v1668_v28 = vpop.f32.mrf.mxu0  ;;  %v1688_v53 = vpop.f32.mrf.mxu1 }
 0x218   :  { %v1823_v35 = vmul.f32 %v5789_v16, %v1822_v23  ;;  %2354 = vmatpush.msra.mxu2 %v2216_v42  ;;  %v1820_v30 = vsel %vm1819_vm5, %v5754_v34, %v1816_v38  ;;  %2374 = vmatpush.msra.mxu3 %v2280_v27  ;;  %v5860_v34 = vld [vmem:[#allocation5 + $0xb60] sm:$0xff]  ;;  %v2204_v23 = vunpack.c.l.bf16 %v5858_v61  ;;  %v5880_v38 = vld [vmem:[#allocation5 + $0xa30] sm:$0xff]  ;;  %v1689_v42 = vadd.f32 %v1688_v53, %v1668_v28 }
 0x219   :  { %v1749_v3 = vadd.f32 %v1748_v48, %v1747_v37  ;;  %v1784_v43 = vrot.slane %v1783_v5, 2  ;;  %v2208_v37 = vunpack.c.l.bf16 %v5851_v20  ;;  %v2268_v58 = vunpack.c.l.bf16 %v5860_v34  ;;  %v4157_v28 = vld [vmem:[#allocation8] sm:$0xff] }
 0x21a   :  { %v1824_v25 = vmul.f32 0.5, %v1823_v35  ;;  %2355 = vmatpush.msra.mxu2 %v2212_v9  ;;  %2375 = vmatpush.msra.mxu3 %v2276_v45  ;;  %v2200_v48 = vunpack.c.l.bf16 %v5864_v26 }
 0x21b   :  { %v1750_v46 = vrot.slane %v1749_v3, 1  ;;  %v1785_v8 = vadd.f32 %v1784_v43, %v1783_v5  ;;  %v2264_v5 = vunpack.c.l.bf16 %v5866_v56 }
 0x21c   :  { %v1825_v62 = vsub.f32 1.5, %v1824_v25  ;;  %2356 = vmatpush.msra.mxu2 %v2208_v37  ;;  %2376 = vmatpush.msra.mxu3 %v2272_v29  ;;  %v5870_v25 = vld [vmem:[#allocation5 + $0xa40] sm:$0xff]  ;;  %v5897_v37 = vld [vmem:[#allocation5 + $0xa10] sm:$0xff] }
 0x21d   :  { %v1751_v32 = vadd.f32 %v1750_v46, %v1749_v3  ;;  %v1786_v35 = vrot.slane %v1785_v8, 1  ;;  %v2196_v47 = vunpack.c.l.bf16 %v5870_v25  ;;  %v2192_v3 = vunpack.c.l.bf16 %v5880_v38  ;;  %v5899_v29 = vld [vmem:[#allocation5 + $0xb10] sm:$0xff] }
 0x21e   :  { %v1826_v50 = vmul.f32 %v5789_v16, %v1825_v62  ;;  %2357 = vmatpush.msra.mxu2 %v2204_v23  ;;  %2377 = vmatpush.msra.mxu3 %v2268_v58  ;;  %v2184_v58 = vunpack.c.l.bf16 %v5897_v37 }
 0x21f   :  { %v5878_v52 = vmul.f32 %v1751_v32, %v5019_v2  ;;  %v1787_v22 = vadd.f32 %v1786_v35, %v1785_v8 }
 0x220   :  { %v1830_v59 = vsel %vm1829_vm3, %v5789_v16, %v1826_v50  ;;  %2358 = vmatpush.msra.mxu2 %v2200_v48  ;;  %2378 = vmatpush.msra.mxu3 %v2264_v5  ;;  %v5882_v50 = vld [vmem:[#allocation5 + $0xb30] sm:$0xff]  ;;  %v5905_v48 = vld [vmem:[#allocation5 + $0xa00] sm:$0xff] }
 0x221   :  { %v1855_v51 = vrot.slane %v1830_v59, 4  ;;  %v2256_v43 = vunpack.c.l.bf16 %v5882_v50  ;;  %v1797_v45 = vmul.f32 %v1787_v22, %v5019_v2  ;;  %v5907_v5 = vld [vmem:[#allocation5 + $0xb00] sm:$0xff] }
 0x222   :  { %2359 = vmatpush.msra.mxu2 %v2196_v47  ;;  %2379 = vmatpush.msra.mxu3 %v2260_v10  ;;  %v2180_v47 = vunpack.c.l.bf16 %v5905_v48  ;;  %v2244_v10 = vunpack.c.l.bf16 %v5907_v5 }
 0x223   :  { %v1857_v16 = vsel %vm963_vm8, %v1820_v30, %v1855_v51  ;;  %v5889_v51 = vld [vmem:[#allocation5 + $0xb20] sm:$0xff] }
 0x224   :  { %v1859_v17 = vrot.slane %v1857_v16, 7  ;;  %2360 = vmatpush.msra.mxu2 %v2192_v3  ;;  %v2252_v46 = vunpack.c.l.bf16 %v5889_v51  ;;  %v1801_v16 = vmul.f32 %v5878_v52, %v5878_v52  ;;  %2380 = vmatpush.msra.mxu3 %v2256_v43 }
 0x226   :  { %v1863_v15 = vmul.f32 %v4156_v57, %v1859_v17  ;;  %v2248_v57 = vunpack.c.l.bf16 %v5899_v29  ;;  %2381 = vmatpush.msra.mxu3 %v2252_v46 }
 0x228   :  { %v1867_v19 = vperm.slane %v1863_v15, 1  ;;  %v1868_v41 = vperm.slane %v1863_v15, 5  ;;  %2382 = vmatpush.msra.mxu3 %v2248_v57 }
 0x22a   :  { %v1876_v62 = vmul.f32 %v1868_v41, %v5743_v13  ;;  %v1875_v27 = vmul.f32 %v1867_v19, %v5726_v4  ;;  %v5887_v13 = vld [vmem:[#allocation5 + $0xa20] sm:$0xff]  ;;  %v1894_v15 = vperm.slane %v1868_v41, 1  ;;  %v1893_v35 = vperm.slane %v1867_v19, 1  ;;  %2383 = vmatpush.msra.mxu3 %v2244_v10 }
 0x22b   :  { %v2188_v30 = vunpack.c.l.bf16 %v5887_v13 }
 0x22c   :  { %v1883_v59 = vrot.slane %v1876_v62, 4  ;;  %v1805_v62 = vsub.f32 %v1797_v45, %v1801_v16 }
 0x22d   :  { %v1708_v9 = vpop.f32.mrf.mxu2  ;;  %v1728_v23 = vpop.f32.mrf.mxu3  ;;  %2361 = vmatpush.msra.mxu2 %v2188_v30  ;;  %v2305_v30 = vunpack.c.h.bf16 %v5775_v21  ;;  %v5928_v21 = vld [vmem:[#allocation5 + $0x9e8] sm:$0xff] }
 0x22e   :  { %v1885_v8 = vsel %vm963_vm8, %v1875_v27, %v1883_v59  ;;  %v1709_v4 = vadd.f32 %v1708_v9, %v1689_v42  ;;  %v2241_v42 = vunpack.c.h.bf16 %v5773_v1  ;;  %v1898_v27 = vmul.f32 %v1894_v15, %v5702_v14  ;;  %v5926_v15 = vld [vmem:[#allocation5 + $0x8e8] sm:$0xff] }
 0x22f   :  { %v1887_v17 = vrot.slane %v1885_v8, 7  ;;  %2362 = vmatpush.msra.mxu2 %v2184_v58  ;;  %v1897_v9 = vmul.f32 %v1893_v35, %v5671_v63  ;;  %2448 = vmatpush.msrb.mxu3 %v2305_v30  ;;  %v2237_v1 = vunpack.c.h.bf16 %v5785_v33  ;;  %v2301_v14 = vunpack.c.h.bf16 %v5787_v0 }
 0x230   :  { %v5903_v32 = vadd.f32 %v1728_v23, %v1709_v4  ;;  %v5920_v4 = vld [vmem:[#allocation5 + $0x8f8] sm:$0xff]  ;;  %v5930_v35 = vadd.f32 1e-05, %v1805_v62  ;;  %v2233_v33 = vunpack.c.h.bf16 %v5796_v24  ;;  %v2110_v62 = vunpack.c.l.bf16 %v5926_v15 }
 0x231   :  { %v1891_v53 = vsub.f32 %v4157_v28, %v1887_v17  ;;  %2363 = vmatpush.msra.mxu2 %v2180_v47  ;;  %v5922_v17 = vld [vmem:[#allocation5 + $0x9f8] sm:$0xff]  ;;  %v2114_v28 = vunpack.c.l.bf16 %v5920_v4  ;;  %2449 = vmatpush.msrb.mxu3 %v2301_v14  ;;  %v2293_v30 = vunpack.c.h.bf16 %v5808_v11  ;;  %v2289_v11 = vunpack.c.h.bf16 %v5817_v40 }
 0x232   :  { %v1752_v22 = vsel %vm829_vm0, %v5903_v32, 0.0  ;;  %v1766_v41 = vmul.f32 %v5903_v32, %v5903_v32  ;;  %4136 = vrsqrt.f32 %v5930_v35  ;;  %v2221_v14 = vunpack.c.h.bf16 %v5822_v55 }
 0x233   :  { %v1904_v19 = vperm.slane %v1891_v53, 5  ;;  %v1753_v3 = vrot.slane %v1752_v22, 4  ;;  %v1903_v43 = vperm.slane %v1891_v53, 1  ;;  %2428 = vmatpush.msrb.mxu2 %v2241_v42  ;;  %v2178_v53 = vunpack.c.l.bf16 %v5922_v17 }
 0x234   :  { %v1788_v59 = vsel %vm829_vm0, %v1766_v41, 0.0  ;;  %v5939_v41 = vld [vmem:[#allocation5 + $0x8d8] sm:$0xff]  ;;  %v2229_v42 = vunpack.c.h.bf16 %v5806_v36  ;;  %vm1837_vm11 = vweird.f32 %v5930_v35 }
 0x235   :  { %v1912_v46 = vperm.slane %v1904_v19, 1  ;;  %v1754_v8 = vadd.f32 %v1753_v3, %v1752_v22  ;;  %v1789_v45 = vrot.slane %v1788_v59, 4  ;;  %v1911_v16 = vperm.slane %v1903_v43, 1  ;;  %2429 = vmatpush.msrb.mxu2 %v2237_v1  ;;  %v5941_v19 = vld [vmem:[#allocation5 + $0x9d8] sm:$0xff] }
 0x236   :  { %v2174_v3 = vunpack.c.l.bf16 %v5928_v21  ;;  %v2297_v43 = vunpack.c.h.bf16 %v5798_v54  ;;  %v2106_v54 = vunpack.c.l.bf16 %v5939_v41  ;;  %v2170_v36 = vunpack.c.l.bf16 %v5941_v19  ;;  %v5960_v1 = vld [vmem:[#allocation5 + $0x9b8] sm:$0xff] }
 0x237   :  { %v1916_v23 = vadd.f32 %v1912_v46, %v1898_v27  ;;  %v1755_v58 = vrot.slane %v1754_v8, 2  ;;  %v1790_v63 = vadd.f32 %v1789_v45, %v1788_v59  ;;  %v1915_v57 = vadd.f32 %v1911_v16, %v1897_v9  ;;  %2430 = vmatpush.msrb.mxu2 %v2233_v33  ;;  %v5949_v59 = vld [vmem:[#allocation5 + $0x8c8] sm:$0xff]  ;;  %v5958_v16 = vld [vmem:[#allocation5 + $0x8b8] sm:$0xff] }
 0x238   :  { %v5951_v9 = vld [vmem:[#allocation5 + $0x9c8] sm:$0xff]  ;;  %v2225_v46 = vunpack.c.h.bf16 %v5815_v12  ;;  %2450 = vmatpush.msrb.mxu3 %v2297_v43  ;;  %v2098_v40 = vunpack.c.l.bf16 %v5958_v16  ;;  %v2162_v55 = vunpack.c.l.bf16 %v5960_v1  ;;  %v5984_v43 = vpop.eup %4136 }
 0x239   :  { %v1756_v47 = vadd.f32 %v1755_v58, %v1754_v8  ;;  %v1791_v0 = vrot.slane %v1790_v63, 2  ;;  %v5935_v10 = vmax.f32 %v1915_v57, 0.0  ;;  %v5937_v22 = vmax.f32 %v1916_v23, 0.0  ;;  %2431 = vmatpush.msrb.mxu2 %v2229_v42  ;;  %v5969_v57 = vld [vmem:[#allocation5 + $0x8a8] sm:$0xff] }
 0x23a   :  { %v2102_v23 = vunpack.c.l.bf16 %v5949_v59  ;;  %v2166_v58 = vunpack.c.l.bf16 %v5951_v9  ;;  %2451 = vmatpush.msrb.mxu3 %v2293_v30  ;;  %v2094_v42 = vunpack.c.l.bf16 %v5969_v57  ;;  %v5990_v30 = vld [vmem:[#allocation5 + $0x888] sm:$0xff]  ;;  %vm1838_vm7 = vweird.f32 %v5984_v43 }
 0x23b   :  { %v1757_v24 = vrot.slane %v1756_v47, 1  ;;  %v1792_v27 = vadd.f32 %v1791_v0, %v1790_v63  ;;  %2324 = vmatmul.f32.vlgmr.msra.gmra.mxu0 %v5935_v10  ;;  %2344 = vmatmul.f32.vlgmr.msra.gmra.mxu1 %v5937_v22  ;;  %v5980_v0 = vld [vmem:[#allocation5 + $0x998] sm:$0xff]  ;;  %vm1839_vm12 = vmor %vm1837_vm11, %vm1838_vm7 }
 0x23c   :  { %2468 = vmatpush.msra.mxu0 %v2114_v28  ;;  %2488 = vmatpush.msra.mxu1 %v2178_v53  ;;  %v5971_v28 = vld [vmem:[#allocation5 + $0x9a8] sm:$0xff] }
 0x23d   :  { %v1758_v8 = vadd.f32 %v1757_v24, %v1756_v47  ;;  %v1793_v45 = vrot.slane %v1792_v27, 1  ;;  %2432 = vmatpush.msrb.mxu2 %v2225_v46  ;;  %v5978_v47 = vld [vmem:[#allocation5 + $0x898] sm:$0xff]  ;;  %2452 = vmatpush.msrb.mxu3 %v2289_v11  ;;  %v2158_v24 = vunpack.c.l.bf16 %v5971_v28  ;;  %v2154_v46 = vunpack.c.l.bf16 %v5980_v0 }
 0x23e   :  { %2469 = vmatpush.msra.mxu0 %v2110_v62  ;;  %2489 = vmatpush.msra.mxu1 %v2174_v3  ;;  %v2285_v62 = vunpack.c.h.bf16 %v5824_v44  ;;  %v2217_v3 = vunpack.c.h.bf16 %v5832_v7  ;;  %v2281_v44 = vunpack.c.h.bf16 %v5834_v18  ;;  %v2213_v7 = vunpack.c.h.bf16 %v5842_v49  ;;  %v6002_v11 = vld [vmem:[#allocation5 + $0x878] sm:$0xff] }
 0x23f   :  { %v5967_v12 = vmul.f32 %v1758_v8, %v5019_v2  ;;  %v1794_v63 = vadd.f32 %v1793_v45, %v1792_v27  ;;  %2433 = vmatpush.msrb.mxu2 %v2221_v14  ;;  %v1832_v8 = vmul.f32 %v5984_v43, %v5930_v35  ;;  %v6004_v14 = vld [vmem:[#allocation5 + $0x978] sm:$0xff]  ;;  %v2277_v18 = vunpack.c.h.bf16 %v5844_v60 }
 0x240   :  { %2470 = vmatpush.msra.mxu0 %v2106_v54  ;;  %2490 = vmatpush.msra.mxu1 %v2170_v36  ;;  %v5992_v54 = vld [vmem:[#allocation5 + $0x988] sm:$0xff]  ;;  %v2090_v36 = vunpack.c.l.bf16 %v5978_v47  ;;  %v2209_v49 = vunpack.c.h.bf16 %v5851_v20  ;;  %v2205_v60 = vunpack.c.h.bf16 %v5858_v61  ;;  %v2082_v20 = vunpack.c.l.bf16 %v6002_v11 }
 0x241   :  { %v1798_v53 = vmul.f32 %v1794_v63, %v5019_v2  ;;  %v1802_v33 = vmul.f32 %v5967_v12, %v5967_v12  ;;  %2453 = vmatpush.msrb.mxu3 %v2285_v62  ;;  %2434 = vmatpush.msrb.mxu2 %v2217_v3  ;;  %v6011_v63 = vld [vmem:[#allocation5 + $0x868] sm:$0xff]  ;;  %v6020_v62 = vld [vmem:[#allocation5 + $0x858] sm:$0xff]  ;;  %v2175_v35 = vunpack.c.h.bf16 %v5928_v21  ;;  %v2167_v21 = vunpack.c.h.bf16 %v5951_v9 }
 0x242   :  { %2471 = vmatpush.msra.mxu0 %v2102_v23  ;;  %2491 = vmatpush.msra.mxu1 %v2166_v58  ;;  %v2086_v23 = vunpack.c.l.bf16 %v5990_v30  ;;  %v2150_v58 = vunpack.c.l.bf16 %v5992_v54  ;;  %v6022_v3 = vld [vmem:[#allocation5 + $0x958] sm:$0xff]  ;;  %v2078_v61 = vunpack.c.l.bf16 %v6011_v63  ;;  %v2091_v9 = vunpack.c.h.bf16 %v5978_v47 }
 0x243   :  { %v1806_v27 = vsub.f32 %v1798_v53, %v1802_v33  ;;  %2404 = vmatmul.f32.vlgmr.msrb.gmra.mxu0 %v5935_v10  ;;  %2424 = vmatmul.f32.vlgmr.msrb.gmra.mxu1 %v5937_v22  ;;  %v2146_v53 = vunpack.c.l.bf16 %v6004_v14  ;;  %v1833_v33 = vmul.f32 %v5984_v43, %v1832_v8 }
 0x244   :  { %2472 = vmatpush.msra.mxu0 %v2098_v40  ;;  %2492 = vmatpush.msra.mxu1 %v2162_v55  ;;  %v6013_v40 = vld [vmem:[#allocation5 + $0x968] sm:$0xff]  ;;  %v2273_v55 = vunpack.c.h.bf16 %v5853_v31  ;;  %v2201_v31 = vunpack.c.h.bf16 %v5864_v26  ;;  %v2138_v26 = vunpack.c.l.bf16 %v6022_v3 }
 0x245   :  { %v6000_v45 = vadd.f32 1e-05, %v1806_v27  ;;  %2454 = vmatpush.msrb.mxu3 %v2281_v44  ;;  %2435 = vmatpush.msrb.mxu2 %v2213_v7  ;;  %v6028_v27 = vld [vmem:[#allocation5 + $0x848] sm:$0xff]  ;;  %v2265_v7 = vunpack.c.h.bf16 %v5866_v56  ;;  %v1834_v8 = vmul.f32 0.5, %v1833_v33  ;;  %v2193_v56 = vunpack.c.h.bf16 %v5880_v38 }
 0x246   :  { %2473 = vmatpush.msra.mxu0 %v2094_v42  ;;  %2493 = vmatpush.msra.mxu1 %v2158_v24  ;;  %v2269_v42 = vunpack.c.h.bf16 %v5860_v34  ;;  %v2142_v24 = vunpack.c.l.bf16 %v6013_v40  ;;  %v6030_v44 = vld [vmem:[#allocation5 + $0x948] sm:$0xff]  ;;  %v2074_v34 = vunpack.c.l.bf16 %v6020_v62 }
 0x247   :  { %4138 = vrsqrt.f32 %v6000_v45  ;;  %2455 = vmatpush.msrb.mxu3 %v2277_v18  ;;  %2436 = vmatpush.msrb.mxu2 %v2209_v49  ;;  %v6038_v18 = vld [vmem:[#allocation5 + $0x838] sm:$0xff]  ;;  %vm1847_vm9 = vweird.f32 %v6000_v45 }
 0x248   :  { %2474 = vmatpush.msra.mxu0 %v2090_v36  ;;  %2494 = vmatpush.msra.mxu1 %v2154_v46  ;;  %v2197_v36 = vunpack.c.h.bf16 %v5870_v25  ;;  %v6040_v49 = vld [vmem:[#allocation5 + $0x938] sm:$0xff]  ;;  %v2066_v33 = vunpack.c.l.bf16 %v6038_v18 }
 0x249   :  { %2456 = vmatpush.msrb.mxu3 %v2273_v55  ;;  %2437 = vmatpush.msrb.mxu2 %v2205_v60  ;;  %v2134_v55 = vunpack.c.l.bf16 %v6030_v44  ;;  %v6048_v60 = vld [vmem:[#allocation5 + $0x828] sm:$0xff] }
 0x24a   :  { %2475 = vmatpush.msra.mxu0 %v2086_v23  ;;  %2495 = vmatpush.msra.mxu1 %v2150_v58  ;;  %v2261_v23 = vunpack.c.h.bf16 %v5872_v39  ;;  %v2070_v58 = vunpack.c.l.bf16 %v6028_v27  ;;  %v2189_v39 = vunpack.c.h.bf16 %v5887_v13 }
 0x24b   :  { %2457 = vmatpush.msrb.mxu3 %v2269_v42  ;;  %2438 = vmatpush.msrb.mxu2 %v2201_v31  ;;  %v2130_v42 = vunpack.c.l.bf16 %v6040_v49  ;;  %v1835_v31 = vsub.f32 1.5, %v1834_v8  ;;  %v6067_v8 = vld [vmem:[#allocation5 + $0x908] sm:$0xff] }
 0x24c   :  { %2476 = vmatpush.msra.mxu0 %v2082_v20  ;;  %2496 = vmatpush.msra.mxu1 %v2146_v53  ;;  %v6050_v20 = vld [vmem:[#allocation5 + $0x928] sm:$0xff]  ;;  %v2257_v53 = vunpack.c.h.bf16 %v5882_v50  ;;  %v2185_v50 = vunpack.c.h.bf16 %v5897_v37 }
 0x24d   :  { %v6036_v46 = vpop.eup %4138  ;;  %2458 = vmatpush.msrb.mxu3 %v2265_v7  ;;  %2439 = vmatpush.msrb.mxu2 %v2197_v36  ;;  %v2253_v7 = vunpack.c.h.bf16 %v5889_v51  ;;  %v2062_v36 = vunpack.c.l.bf16 %v6048_v60 }
 0x24e   :  { %v1842_v25 = vmul.f32 %v6036_v46, %v6000_v45  ;;  %2477 = vmatpush.msra.mxu0 %v2078_v61  ;;  %2497 = vmatpush.msra.mxu1 %v2142_v24  ;;  %v6057_v61 = vld [vmem:[#allocation5 + $0x818] sm:$0xff]  ;;  %vm1848_vm6 = vweird.f32 %v6036_v46  ;;  %v2179_v45 = vunpack.c.h.bf16 %v5922_v17  ;;  %v2107_v17 = vunpack.c.h.bf16 %v5939_v41 }
 0x24f   :  { %v6059_v24 = vld [vmem:[#allocation5 + $0x918] sm:$0xff]  ;;  %2459 = vmatpush.msrb.mxu3 %v2261_v23  ;;  %2440 = vmatpush.msrb.mxu2 %v2193_v56  ;;  %v2249_v23 = vunpack.c.h.bf16 %v5899_v29  ;;  %v2181_v56 = vunpack.c.h.bf16 %v5905_v48  ;;  %v2058_v37 = vunpack.c.l.bf16 %v6057_v61  ;;  %vm1849_vm10 = vmor %vm1847_vm9, %vm1848_vm6 }
 0x250   :  { %v1843_v38 = vmul.f32 %v6036_v46, %v1842_v25  ;;  %2478 = vmatpush.msra.mxu0 %v2074_v34  ;;  %2498 = vmatpush.msra.mxu1 %v2138_v26  ;;  %v2126_v34 = vunpack.c.l.bf16 %v6050_v20  ;;  %v6065_v26 = vld [vmem:[#allocation5 + $0x808] sm:$0xff]  ;;  %v2122_v25 = vunpack.c.l.bf16 %v6059_v24 }
 0x251   :  { %2460 = vmatpush.msrb.mxu3 %v2257_v53  ;;  %2441 = vmatpush.msrb.mxu2 %v2189_v39  ;;  %v2054_v48 = vunpack.c.l.bf16 %v6065_v26  ;;  %v2118_v53 = vunpack.c.l.bf16 %v6067_v8 }
 0x252   :  { %v1844_v13 = vmul.f32 0.5, %v1843_v38  ;;  %2479 = vmatpush.msra.mxu0 %v2070_v58  ;;  %2499 = vmatpush.msra.mxu1 %v2134_v55  ;;  %v1836_v58 = vmul.f32 %v5984_v43, %v1835_v31  ;;  %v2245_v55 = vunpack.c.h.bf16 %v5907_v5  ;;  %v2115_v5 = vunpack.c.h.bf16 %v5920_v4 }
 0x253   :  { %2461 = vmatpush.msrb.mxu3 %v2253_v7  ;;  %2442 = vmatpush.msrb.mxu2 %v2185_v50  ;;  %v2171_v31 = vunpack.c.h.bf16 %v5941_v19  ;;  %v2095_v19 = vunpack.c.h.bf16 %v5969_v57 }
 0x254   :  { %v1845_v51 = vsub.f32 1.5, %v1844_v13  ;;  %2480 = vmatpush.msra.mxu0 %v2066_v33  ;;  %2500 = vmatpush.msra.mxu1 %v2130_v42  ;;  %v1840_v33 = vsel %vm1839_vm12, %v5984_v43, %v1836_v58  ;;  %v2111_v42 = vunpack.c.h.bf16 %v5926_v15  ;;  %v4158_v43 = vld [vmem:[#allocation7 + $0x8] sm:$0xff]  ;;  %v2103_v15 = vunpack.c.h.bf16 %v5949_v59 }
 0x255   :  { %2462 = vmatpush.msrb.mxu3 %v2249_v23  ;;  %2443 = vmatpush.msrb.mxu2 %v2181_v56  ;;  %v2159_v23 = vunpack.c.h.bf16 %v5971_v28  ;;  %v2147_v28 = vunpack.c.h.bf16 %v6004_v14 }
 0x256   :  { %v1846_v29 = vmul.f32 %v6036_v46, %v1845_v51  ;;  %2481 = vmatpush.msra.mxu0 %v2062_v36  ;;  %2501 = vmatpush.msra.mxu1 %v2126_v34  ;;  %v2099_v36 = vunpack.c.h.bf16 %v5958_v16  ;;  %v2163_v34 = vunpack.c.h.bf16 %v5960_v1  ;;  %v2155_v51 = vunpack.c.h.bf16 %v5980_v0 }
 0x257   :  { %2463 = vmatpush.msrb.mxu3 %v2245_v55  ;;  %v2087_v1 = vunpack.c.h.bf16 %v5990_v30  ;;  %v2079_v0 = vunpack.c.h.bf16 %v6011_v63  ;;  %v2143_v55 = vunpack.c.h.bf16 %v6013_v40  ;;  %v2071_v63 = vunpack.c.h.bf16 %v6028_v27 }
 0x258   :  { %v1850_v39 = vsel %vm1849_vm10, %v6036_v46, %v1846_v29  ;;  %2482 = vmatpush.msra.mxu0 %v2058_v37  ;;  %2502 = vmatpush.msra.mxu1 %v2122_v25  ;;  %v4159_v37 = vld [vmem:[#allocation8 + $0x8] sm:$0xff]  ;;  %v2135_v40 = vunpack.c.h.bf16 %v6030_v44  ;;  %v2067_v27 = vunpack.c.h.bf16 %v6038_v18  ;;  %v2131_v44 = vunpack.c.h.bf16 %v6040_v49  ;;  %v6148_v49 = vld [vmem:[#allocation5 + $0xbc8] sm:$0xff] }
 0x259   :  { %v1856_v38 = vrot.slane %v1850_v39, 4  ;;  %v2127_v18 = vunpack.c.h.bf16 %v6050_v20  ;;  %v2294_v20 = vunpack.c.l.bf16 %v6148_v49 }
 0x25a   :  { %2483 = vmatpush.msra.mxu0 %v2054_v48  ;;  %2503 = vmatpush.msra.mxu1 %v2118_v53 }
 0x25b   :  { %v1858_v46 = vsel %vm963_vm8, %v1840_v33, %v1856_v38  ;;  %2484 = vmatmul.f32.vlgmr.msra.gmra.mxu0 %v5935_v10  ;;  %2504 = vmatmul.f32.vlgmr.msra.gmra.mxu1 %v5937_v22  ;;  %v6124_v33 = vld [vmem:[#allocation5 + $0xae8] sm:$0xff] }
 0x25c   :  { %v1860_v4 = vrot.slane %v1858_v46, 7  ;;  %2548 = vmatpush.msrb.mxu0 %v2115_v5  ;;  %2568 = vmatpush.msrb.mxu1 %v2179_v45  ;;  %v6118_v5 = vld [vmem:[#allocation5 + $0xaf8] sm:$0xff] }
 0x25d   :  { %v6120_v45 = vld [vmem:[#allocation5 + $0xbf8] sm:$0xff] }
 0x25e   :  { %v1864_v7 = vmul.f32 %v4158_v43, %v1860_v4  ;;  %2549 = vmatpush.msrb.mxu0 %v2111_v42  ;;  %2569 = vmatpush.msrb.mxu1 %v2175_v35  ;;  %v6136_v46 = vld [vmem:[#allocation5 + $0xad8] sm:$0xff]  ;;  %v2063_v43 = vunpack.c.h.bf16 %v6048_v60 }
 0x25f   :  { %v6138_v4 = vld [vmem:[#allocation5 + $0xbd8] sm:$0xff] }
 0x260   :  { %v1869_v50 = vperm.slane %v1864_v7, 1  ;;  %v1870_v13 = vperm.slane %v1864_v7, 5  ;;  %2550 = vmatpush.msrb.mxu0 %v2107_v17  ;;  %2570 = vmatpush.msrb.mxu1 %v2171_v31  ;;  %v2238_v17 = vunpack.c.l.bf16 %v6124_v33  ;;  %v6146_v7 = vld [vmem:[#allocation5 + $0xac8] sm:$0xff] }
 0x261   :  { %v2230_v60 = vunpack.c.l.bf16 %v6146_v7 }
 0x262   :  { %v1878_v41 = vmul.f32 %v1870_v13, %v5967_v12  ;;  %2551 = vmatpush.msrb.mxu0 %v2103_v15  ;;  %2571 = vmatpush.msrb.mxu1 %v2167_v21  ;;  %v1877_v59 = vmul.f32 %v1869_v50, %v5878_v52  ;;  %v2151_v12 = vunpack.c.h.bf16 %v5992_v54  ;;  %v2083_v52 = vunpack.c.h.bf16 %v6002_v11 }
 0x263   :  { %v1896_v47 = vperm.slane %v1870_v13, 1  ;;  %v1895_v58 = vperm.slane %v1869_v50, 1  ;;  %v2075_v54 = vunpack.c.h.bf16 %v6020_v62  ;;  %v2139_v11 = vunpack.c.h.bf16 %v6022_v3  ;;  %v6126_v3 = vld [vmem:[#allocation5 + $0xbe8] sm:$0xff] }
 0x264   :  { %v1884_v56 = vrot.slane %v1878_v41, 4  ;;  %2552 = vmatpush.msrb.mxu0 %v2099_v36  ;;  %2572 = vmatpush.msrb.mxu1 %v2163_v34  ;;  %v2302_v31 = vunpack.c.l.bf16 %v6126_v3  ;;  %v2234_v15 = vunpack.c.l.bf16 %v6136_v46  ;;  %v2298_v21 = vunpack.c.l.bf16 %v6138_v4  ;;  %v6156_v36 = vld [vmem:[#allocation5 + $0xab8] sm:$0xff] }
 0x265   :  { %v1900_v14 = vmul.f32 %v1896_v47, %v5903_v32  ;;  %v1899_v53 = vmul.f32 %v1895_v58, %v5764_v6  ;;  %v2242_v6 = vunpack.c.l.bf16 %v6118_v5  ;;  %v2306_v32 = vunpack.c.l.bf16 %v6120_v45  ;;  %v6158_v34 = vld [vmem:[#allocation5 + $0xbb8] sm:$0xff]  ;;  %v6192_v47 = vld [vmem:[#allocation5 + $0xb68] sm:$0xff] }
 0x266   :  { %v1886_v16 = vsel %vm963_vm8, %v1877_v59, %v1884_v56  ;;  %2553 = vmatpush.msrb.mxu0 %v2095_v19  ;;  %2573 = vmatpush.msrb.mxu1 %v2159_v23  ;;  %v2059_v50 = vunpack.c.h.bf16 %v6057_v61  ;;  %v2123_v13 = vunpack.c.h.bf16 %v6059_v24  ;;  %v2055_v41 = vunpack.c.h.bf16 %v6065_v26  ;;  %v6162_v61 = vld [vmem:[#allocation5 + $0xaa8] sm:$0xff]  ;;  %v6168_v56 = vld [vmem:[#allocation5 + $0xa98] sm:$0xff] }
 0x267   :  { %v1888_v57 = vrot.slane %v1886_v16, 7  ;;  %v2119_v19 = vunpack.c.h.bf16 %v6067_v8  ;;  %v6164_v24 = vld [vmem:[#allocation5 + $0xba8] sm:$0xff]  ;;  %v2226_v23 = vunpack.c.l.bf16 %v6156_v36  ;;  %v2290_v59 = vunpack.c.l.bf16 %v6158_v34  ;;  %v6196_v58 = vld [vmem:[#allocation5 + $0xa58] sm:$0xff] }
 0x268   :  { %2554 = vmatpush.msrb.mxu0 %v2091_v9  ;;  %2574 = vmatpush.msrb.mxu1 %v2155_v51  ;;  %v6170_v9 = vld [vmem:[#allocation5 + $0xb98] sm:$0xff]  ;;  %v2222_v26 = vunpack.c.l.bf16 %v6162_v61  ;;  %v2286_v8 = vunpack.c.l.bf16 %v6164_v24  ;;  %v6176_v51 = vld [vmem:[#allocation5 + $0xa88] sm:$0xff] }
 0x269   :  { %v1892_v25 = vsub.f32 %v4159_v37, %v1888_v57  ;;  %v6178_v16 = vld [vmem:[#allocation5 + $0xb88] sm:$0xff]  ;;  %v6184_v57 = vld [vmem:[#allocation5 + $0xa78] sm:$0xff] }
 0x26a   :  { %2555 = vmatpush.msrb.mxu0 %v2087_v1  ;;  %2575 = vmatpush.msrb.mxu1 %v2151_v12  ;;  %v2218_v1 = vunpack.c.l.bf16 %v6168_v56  ;;  %v2282_v12 = vunpack.c.l.bf16 %v6170_v9  ;;  %v2278_v37 = vunpack.c.l.bf16 %v6178_v16 }
 0x26b   :  { %v1906_v30 = vperm.slane %v1892_v25, 5  ;;  %v1905_v29 = vperm.slane %v1892_v25, 1  ;;  %v6190_v25 = vld [vmem:[#allocation5 + $0xa68] sm:$0xff] }
 0x26c   :  { %2556 = vmatpush.msrb.mxu0 %v2083_v52  ;;  %2576 = vmatpush.msrb.mxu1 %v2147_v28  ;;  %v6186_v52 = vld [vmem:[#allocation5 + $0xb78] sm:$0xff]  ;;  %v2214_v28 = vunpack.c.l.bf16 %v6176_v51 }
 0x26d   :  { %v1914_v48 = vperm.slane %v1906_v30, 1  ;;  %v1913_v39 = vperm.slane %v1905_v29, 1  ;;  %v2270_v30 = vunpack.c.l.bf16 %v6192_v47  ;;  %v6202_v29 = vld [vmem:[#allocation5 + $0xa48] sm:$0xff] }
 0x26e   :  { %2557 = vmatpush.msrb.mxu0 %v2079_v0  ;;  %2577 = vmatpush.msrb.mxu1 %v2143_v55  ;;  %v6198_v0 = vld [vmem:[#allocation5 + $0xb58] sm:$0xff]  ;;  %v2206_v55 = vunpack.c.l.bf16 %v6190_v25 }
 0x26f   :  { %v1918_v38 = vadd.f32 %v1914_v48, %v1900_v14  ;;  %v1917_v62 = vadd.f32 %v1913_v39, %v1899_v53  ;;  %v2266_v14 = vunpack.c.l.bf16 %v6198_v0  ;;  %v6208_v48 = vld [vmem:[#allocation5 + $0xa38] sm:$0xff]  ;;  %v2198_v39 = vunpack.c.l.bf16 %v6202_v29 }
 0x270   :  { %2558 = vmatpush.msrb.mxu0 %v2075_v54  ;;  %2578 = vmatpush.msrb.mxu1 %v2139_v11  ;;  %v6204_v54 = vld [vmem:[#allocation5 + $0xb48] sm:$0xff]  ;;  %v2202_v11 = vunpack.c.l.bf16 %v6196_v58  ;;  %v6210_v53 = vld [vmem:[#allocation5 + $0xb38] sm:$0xff] }
 0x271   :  { %v6130_v42 = vmax.f32 %v1917_v62, 0.0  ;;  %v6132_v35 = vmax.f32 %v1918_v38, 0.0  ;;  %v6216_v38 = vld [vmem:[#allocation5 + $0xb28] sm:$0xff]  ;;  %v2194_v62 = vunpack.c.l.bf16 %v6208_v48 }
 0x272   :  { %2559 = vmatpush.msrb.mxu0 %v2071_v63  ;;  %2579 = vmatpush.msrb.mxu1 %v2135_v40  ;;  %v2262_v63 = vunpack.c.l.bf16 %v6204_v54  ;;  %v6214_v40 = vld [vmem:[#allocation5 + $0xa28] sm:$0xff] }
 0x273   :  { %2364 = vmatmul.f32.vlgmr.msra.gmra.mxu2 %v6130_v42  ;;  %2384 = vmatmul.f32.vlgmr.msra.gmra.mxu3 %v6132_v35 }
 0x274   :  { %2508 = vmatpush.msra.mxu2 %v2242_v6  ;;  %2528 = vmatpush.msra.mxu3 %v2306_v32  ;;  %v2258_v6 = vunpack.c.l.bf16 %v6210_v53  ;;  %v6220_v32 = vld [vmem:[#allocation5 + $0xa18] sm:$0xff] }
 0x275   :  { %2560 = vmatpush.msrb.mxu0 %v2067_v27  ;;  %2580 = vmatpush.msrb.mxu1 %v2131_v44  ;;  %v6222_v27 = vld [vmem:[#allocation5 + $0xb18] sm:$0xff]  ;;  %v2190_v44 = vunpack.c.l.bf16 %v6214_v40 }
 0x276   :  { %2509 = vmatpush.msra.mxu2 %v2238_v17  ;;  %2529 = vmatpush.msra.mxu3 %v2302_v31  ;;  %v2254_v17 = vunpack.c.l.bf16 %v6216_v38  ;;  %v6226_v31 = vld [vmem:[#allocation5 + $0xa08] sm:$0xff] }
 0x277   :  { %2561 = vmatpush.msrb.mxu0 %v2063_v43  ;;  %2581 = vmatpush.msrb.mxu1 %v2127_v18  ;;  %v6228_v43 = vld [vmem:[#allocation5 + $0xb08] sm:$0xff]  ;;  %v2186_v18 = vunpack.c.l.bf16 %v6220_v32 }
 0x278   :  { %2510 = vmatpush.msra.mxu2 %v2234_v15  ;;  %2530 = vmatpush.msra.mxu3 %v2298_v21  ;;  %v2250_v15 = vunpack.c.l.bf16 %v6222_v27  ;;  %v2182_v21 = vunpack.c.l.bf16 %v6226_v31 }
 0x279   :  { %2562 = vmatpush.msrb.mxu0 %v2059_v50  ;;  %2582 = vmatpush.msrb.mxu1 %v2123_v13  ;;  %v2246_v50 = vunpack.c.l.bf16 %v6228_v43  ;;  %v2243_v13 = vunpack.c.h.bf16 %v6118_v5  ;;  %v2231_v5 = vunpack.c.h.bf16 %v6146_v7  ;;  %v2283_v7 = vunpack.c.h.bf16 %v6170_v9 }
 0x27a   :  { %2511 = vmatpush.msra.mxu2 %v2230_v60  ;;  %2531 = vmatpush.msra.mxu3 %v2294_v20  ;;  %v2307_v60 = vunpack.c.h.bf16 %v6120_v45  ;;  %v2239_v20 = vunpack.c.h.bf16 %v6124_v33  ;;  %v2295_v45 = vunpack.c.h.bf16 %v6148_v49  ;;  %v2227_v33 = vunpack.c.h.bf16 %v6156_v36 }
 0x27b   :  { %2563 = vmatpush.msrb.mxu0 %v2055_v41  ;;  %2583 = vmatpush.msrb.mxu1 %v2119_v19  ;;  %v2303_v41 = vunpack.c.h.bf16 %v6126_v3  ;;  %v2235_v19 = vunpack.c.h.bf16 %v6136_v46  ;;  %v2291_v3 = vunpack.c.h.bf16 %v6158_v34  ;;  %v2287_v46 = vunpack.c.h.bf16 %v6164_v24 }
 0x27c   :  { %2444 = vmatmul.f32.vlgmr.msrb.gmra.mxu2 %v6130_v42  ;;  %2464 = vmatmul.f32.vlgmr.msrb.gmra.mxu3 %v6132_v35  ;;  %v2215_v49 = vunpack.c.h.bf16 %v6176_v51  ;;  %v2279_v36 = vunpack.c.h.bf16 %v6178_v16  ;;  %v2211_v34 = vunpack.c.h.bf16 %v6184_v57  ;;  %v2207_v24 = vunpack.c.h.bf16 %v6190_v25 }
 0x27d   :  { %2512 = vmatpush.msra.mxu2 %v2226_v23  ;;  %2532 = vmatpush.msra.mxu3 %v2290_v59  ;;  %v2299_v23 = vunpack.c.h.bf16 %v6138_v4  ;;  %v2223_v59 = vunpack.c.h.bf16 %v6162_v61  ;;  %v2219_v4 = vunpack.c.h.bf16 %v6168_v56  ;;  %v2275_v61 = vunpack.c.h.bf16 %v6186_v52 }
 0x27e   :  { %2564 = vmatmul.f32.vlgmr.msrb.gmra.mxu0 %v5935_v10  ;;  %2584 = vmatmul.f32.vlgmr.msrb.gmra.mxu1 %v5937_v22  ;;  %v2210_v10 = vunpack.c.l.bf16 %v6184_v57  ;;  %v2274_v22 = vunpack.c.l.bf16 %v6186_v52  ;;  %v2271_v56 = vunpack.c.h.bf16 %v6192_v47  ;;  %v2203_v9 = vunpack.c.h.bf16 %v6196_v58  ;;  %v6270_v47 = vld [vmem:[#allocation5 + $0xcf0] sm:$0xff] }
 0x27f   :  { %2513 = vmatpush.msra.mxu2 %v2222_v26  ;;  %2533 = vmatpush.msra.mxu3 %v2286_v8  ;;  %v2267_v26 = vunpack.c.h.bf16 %v6198_v0  ;;  %v2199_v8 = vunpack.c.h.bf16 %v6202_v29  ;;  %v2263_v51 = vunpack.c.h.bf16 %v6204_v54  ;;  %v2195_v16 = vunpack.c.h.bf16 %v6208_v48  ;;  %v6276_v0 = vld [vmem:[#allocation5 + $0xce0] sm:$0xff]  ;;  %v6282_v29 = vld [vmem:[#allocation5 + $0xcd0] sm:$0xff] }
 0x280   :  { %v2255_v57 = vunpack.c.h.bf16 %v6216_v38  ;;  %v2187_v52 = vunpack.c.h.bf16 %v6220_v32  ;;  %v2247_v25 = vunpack.c.h.bf16 %v6228_v43  ;;  %v3001_v54 = vunpack.c.l.bf16 %v6282_v29  ;;  %v6290_v48 = vld [vmem:[#allocation5 + $0xdc0] sm:$0xff]  ;;  %v6306_v43 = vld [vmem:[#allocation5 + $0xc90] sm:$0xff] }
 0x281   :  { %2514 = vmatpush.msra.mxu2 %v2218_v1  ;;  %2534 = vmatpush.msra.mxu3 %v2282_v12  ;;  %v2259_v1 = vunpack.c.h.bf16 %v6210_v53  ;;  %v2191_v12 = vunpack.c.h.bf16 %v6214_v40  ;;  %v6296_v40 = vld [vmem:[#allocation5 + $0xdb0] sm:$0xff]  ;;  %v6302_v32 = vld [vmem:[#allocation5 + $0xda0] sm:$0xff] }
 0x283   :  { %2515 = vmatpush.msra.mxu2 %v2214_v28  ;;  %2535 = vmatpush.msra.mxu3 %v2278_v37  ;;  %v2251_v28 = vunpack.c.h.bf16 %v6222_v27  ;;  %v2183_v37 = vunpack.c.h.bf16 %v6226_v31  ;;  %v3053_v31 = vunpack.c.l.bf16 %v6302_v32 }
 0x285   :  { %2516 = vmatpush.msra.mxu2 %v2210_v10  ;;  %2536 = vmatpush.msra.mxu3 %v2274_v22  ;;  %v6272_v10 = vld [vmem:[#allocation5 + $0xdf0] sm:$0xff]  ;;  %v3009_v22 = vunpack.c.l.bf16 %v6270_v47 }
 0x286   :  { %v3073_v58 = vunpack.c.l.bf16 %v6272_v10 }
 0x287   :  { %2517 = vmatpush.msra.mxu2 %v2206_v55  ;;  %2537 = vmatpush.msra.mxu3 %v2270_v30  ;;  %v6278_v55 = vld [vmem:[#allocation5 + $0xde0] sm:$0xff]  ;;  %v3005_v30 = vunpack.c.l.bf16 %v6276_v0 }
 0x288   :  { %3205 = vmatpush.msra.mxu0 %v3009_v22  ;;  %3225 = vmatpush.msra.mxu1 %v3073_v58  ;;  %v6349_v58 = vld [vmem:[#allocation5 + $0xc30] sm:$0xff] }
 0x289   :  { %2518 = vmatpush.msra.mxu2 %v2202_v11  ;;  %2538 = vmatpush.msra.mxu3 %v2266_v14  ;;  %v6288_v14 = vld [vmem:[#allocation5 + $0xcc0] sm:$0xff] }
 0x28a   :  { %3206 = vmatpush.msra.mxu0 %v3005_v30  ;;  %v2997_v53 = vunpack.c.l.bf16 %v6288_v14  ;;  %v6351_v30 = vld [vmem:[#allocation5 + $0xd30] sm:$0xff] }
 0x28b   :  { %2519 = vmatpush.msra.mxu2 %v2198_v39  ;;  %2539 = vmatpush.msra.mxu3 %v2262_v63  ;;  %v3061_v39 = vunpack.c.l.bf16 %v6290_v48  ;;  %v6294_v63 = vld [vmem:[#allocation5 + $0xcb0] sm:$0xff] }
 0x28c   :  { %3207 = vmatpush.msra.mxu0 %v3001_v54  ;;  %v2993_v38 = vunpack.c.l.bf16 %v6294_v63  ;;  %v2961_v54 = vunpack.c.l.bf16 %v6349_v58 }
 0x28d   :  { %2520 = vmatpush.msra.mxu2 %v2194_v62  ;;  %2540 = vmatpush.msra.mxu3 %v2258_v6  ;;  %v3057_v62 = vunpack.c.l.bf16 %v6296_v40  ;;  %v6300_v6 = vld [vmem:[#allocation5 + $0xca0] sm:$0xff] }
 0x28e   :  { %3208 = vmatpush.msra.mxu0 %v2997_v53 }
 0x28f   :  { %2521 = vmatpush.msra.mxu2 %v2190_v44  ;;  %2541 = vmatpush.msra.mxu3 %v2254_v17  ;;  %v2989_v17 = vunpack.c.l.bf16 %v6300_v6 }
 0x290   :  { %3209 = vmatpush.msra.mxu0 %v2993_v38 }
 0x291   :  { %2522 = vmatpush.msra.mxu2 %v2186_v18  ;;  %2542 = vmatpush.msra.mxu3 %v2250_v15  ;;  %v6308_v18 = vld [vmem:[#allocation5 + $0xd90] sm:$0xff]  ;;  %v2985_v15 = vunpack.c.l.bf16 %v6306_v43 }
 0x292   :  { %3210 = vmatpush.msra.mxu0 %v2989_v17 }
 0x293   :  { %2523 = vmatpush.msra.mxu2 %v2182_v21  ;;  %2543 = vmatpush.msra.mxu3 %v2246_v50  ;;  %v3049_v21 = vunpack.c.l.bf16 %v6308_v18  ;;  %v6312_v50 = vld [vmem:[#allocation5 + $0xc80] sm:$0xff] }
 0x294   :  { %2524 = vmatmul.f32.vlgmr.msra.gmra.mxu2 %v6130_v42  ;;  %2544 = vmatmul.f32.vlgmr.msra.gmra.mxu3 %v6132_v35 }
 0x295   :  { %2588 = vmatpush.msrb.mxu2 %v2243_v13  ;;  %2608 = vmatpush.msrb.mxu3 %v2307_v60  ;;  %v6314_v13 = vld [vmem:[#allocation5 + $0xd80] sm:$0xff] }
 0x296   :  { %3211 = vmatpush.msra.mxu0 %v2985_v15 }
 0x297   :  { %2589 = vmatpush.msrb.mxu2 %v2239_v20  ;;  %2609 = vmatpush.msrb.mxu3 %v2303_v41  ;;  %v2981_v20 = vunpack.c.l.bf16 %v6312_v50  ;;  %v3045_v41 = vunpack.c.l.bf16 %v6314_v13 }
 0x299   :  { %2590 = vmatpush.msrb.mxu2 %v2235_v19  ;;  %2610 = vmatpush.msrb.mxu3 %v2299_v23  ;;  %v6318_v23 = vld [vmem:[#allocation5 + $0xc70] sm:$0xff] }
 0x29a   :  { %3212 = vmatpush.msra.mxu0 %v2981_v20  ;;  %v6363_v20 = vld [vmem:[#allocation5 + $0xc10] sm:$0xff] }
 0x29b   :  { %2591 = vmatpush.msrb.mxu2 %v2231_v5  ;;  %2611 = vmatpush.msrb.mxu3 %v2295_v45  ;;  %v6320_v5 = vld [vmem:[#allocation5 + $0xd70] sm:$0xff] }
 0x29d   :  { %2592 = vmatpush.msrb.mxu2 %v2227_v33  ;;  %2612 = vmatpush.msrb.mxu3 %v2291_v3  ;;  %v2977_v3 = vunpack.c.l.bf16 %v6318_v23 }
 0x29f   :  { %2593 = vmatpush.msrb.mxu2 %v2223_v59  ;;  %2613 = vmatpush.msrb.mxu3 %v2287_v46  ;;  %v3041_v59 = vunpack.c.l.bf16 %v6320_v5  ;;  %v6324_v46 = vld [vmem:[#allocation5 + $0xc60] sm:$0xff] }
 0x2a0   :  { %3213 = vmatpush.msra.mxu0 %v2977_v3 }
 0x2a1   :  { %2594 = vmatpush.msrb.mxu2 %v2219_v4  ;;  %2614 = vmatpush.msrb.mxu3 %v2283_v7  ;;  %v6326_v4 = vld [vmem:[#allocation5 + $0xd60] sm:$0xff] }
 0x2a3   :  { %2595 = vmatpush.msrb.mxu2 %v2215_v49  ;;  %2615 = vmatpush.msrb.mxu3 %v2279_v36  ;;  %v2973_v49 = vunpack.c.l.bf16 %v6324_v46  ;;  %v3037_v36 = vunpack.c.l.bf16 %v6326_v4 }
 0x2a5   :  { %2596 = vmatpush.msrb.mxu2 %v2211_v34  ;;  %2616 = vmatpush.msrb.mxu3 %v2275_v61  ;;  %v6332_v34 = vld [vmem:[#allocation5 + $0xc50] sm:$0xff] }
 0x2a6   :  { %v6334_v61 = vld [vmem:[#allocation5 + $0xd50] sm:$0xff]  ;;  %3214 = vmatpush.msra.mxu0 %v2973_v49 }
 0x2a7   :  { %2597 = vmatpush.msrb.mxu2 %v2207_v24  ;;  %2617 = vmatpush.msrb.mxu3 %v2271_v56 }
 0x2a9   :  { %2598 = vmatpush.msrb.mxu2 %v2203_v9  ;;  %2618 = vmatpush.msrb.mxu3 %v2267_v26 }
 0x2ab   :  { %2599 = vmatpush.msrb.mxu2 %v2199_v8  ;;  %2619 = vmatpush.msrb.mxu3 %v2263_v51  ;;  %v2969_v8 = vunpack.c.l.bf16 %v6332_v34  ;;  %v3033_v51 = vunpack.c.l.bf16 %v6334_v61 }
 0x2ad   :  { %2600 = vmatpush.msrb.mxu2 %v2195_v16  ;;  %2620 = vmatpush.msrb.mxu3 %v2259_v1  ;;  %v6342_v1 = vld [vmem:[#allocation5 + $0xc40] sm:$0xff] }
 0x2ae   :  { %3215 = vmatpush.msra.mxu0 %v2969_v8 }
 0x2af   :  { %2601 = vmatpush.msrb.mxu2 %v2191_v12  ;;  %2621 = vmatpush.msrb.mxu3 %v2255_v57  ;;  %v6344_v12 = vld [vmem:[#allocation5 + $0xd40] sm:$0xff] }
 0x2b1   :  { %2602 = vmatpush.msrb.mxu2 %v2187_v52  ;;  %2622 = vmatpush.msrb.mxu3 %v2251_v28  ;;  %v2965_v52 = vunpack.c.l.bf16 %v6342_v1  ;;  %v3029_v28 = vunpack.c.l.bf16 %v6344_v12 }
 0x2b3   :  { %2603 = vmatpush.msrb.mxu2 %v2183_v37  ;;  %2623 = vmatpush.msrb.mxu3 %v2247_v25 }
 0x2b4   :  { %2604 = vmatmul.f32.vlgmr.msrb.gmra.mxu2 %v6130_v42  ;;  %2624 = vmatmul.f32.vlgmr.msrb.gmra.mxu3 %v6132_v35  ;;  %v3069_v42 = vunpack.c.l.bf16 %v6278_v55  ;;  %v6284_v35 = vld [vmem:[#allocation5 + $0xdd0] sm:$0xff] }
 0x2b5   :  { %v3065_v11 = vunpack.c.l.bf16 %v6284_v35  ;;  %3216 = vmatpush.msra.mxu0 %v2965_v52 }
 0x2b6   :  { %3226 = vmatpush.msra.mxu1 %v3069_v42 }
 0x2b7   :  { %3217 = vmatpush.msra.mxu0 %v2961_v54  ;;  %v3070_v54 = vunpack.c.h.bf16 %v6278_v55  ;;  %v3062_v55 = vunpack.c.h.bf16 %v6290_v48  ;;  %v3054_v48 = vunpack.c.h.bf16 %v6302_v32  ;;  %v3046_v32 = vunpack.c.h.bf16 %v6314_v13 }
 0x2b8   :  { %3227 = vmatpush.msra.mxu1 %v3065_v11  ;;  %v2325_v27 = vpop.f32.mrf.mxu0  ;;  %v2345_v44 = vpop.f32.mrf.mxu1  ;;  %v3025_v11 = vunpack.c.l.bf16 %v6351_v30  ;;  %v2974_v13 = vunpack.c.h.bf16 %v6324_v46 }
 0x2b9   :  { %v2346_v60 = vadd.f32 %v2345_v44, %v2325_v27  ;;  %v6357_v27 = vld [vmem:[#allocation5 + $0xd20] sm:$0xff] }
 0x2ba   :  { %3228 = vmatpush.msra.mxu1 %v3061_v39 }
 0x2bc   :  { %3229 = vmatpush.msra.mxu1 %v3057_v62  ;;  %v6355_v62 = vld [vmem:[#allocation5 + $0xc20] sm:$0xff] }
 0x2bd   :  { %v2957_v17 = vunpack.c.l.bf16 %v6355_v62 }
 0x2be   :  { %3230 = vmatpush.msra.mxu1 %v3053_v31  ;;  %v3021_v31 = vunpack.c.l.bf16 %v6357_v27 }
 0x2bf   :  { %3218 = vmatpush.msra.mxu0 %v2957_v17 }
 0x2c0   :  { %3231 = vmatpush.msra.mxu1 %v3049_v21  ;;  %v2405_v24 = vpop.f32.mrf.mxu0  ;;  %v2425_v56 = vpop.f32.mrf.mxu1 }
 0x2c1   :  { %v2426_v37 = vadd.f32 %v2425_v56, %v2405_v24  ;;  %v6375_v24 = vld [vmem:[#allocation5 + $0xd00] sm:$0xff] }
 0x2c2   :  { %3232 = vmatpush.msra.mxu1 %v3045_v41  ;;  %v6365_v41 = vld [vmem:[#allocation5 + $0xd10] sm:$0xff] }
 0x2c4   :  { %3233 = vmatpush.msra.mxu1 %v3041_v59 }
 0x2c6   :  { %3234 = vmatpush.msra.mxu1 %v3037_v36  ;;  %v6373_v36 = vld [vmem:[#allocation5 + $0xc00] sm:$0xff] }
 0x2c8   :  { %3235 = vmatpush.msra.mxu1 %v3033_v51 }
 0x2ca   :  { %3236 = vmatpush.msra.mxu1 %v3029_v28 }
 0x2cc   :  { %3237 = vmatpush.msra.mxu1 %v3025_v11 }
 0x2ce   :  { %3238 = vmatpush.msra.mxu1 %v3021_v31 }
 0x2f6   :  { %v2365_v19 = vpop.f32.mrf.mxu2  ;;  %v2385_v33 = vpop.f32.mrf.mxu3 }
 0x2f7   :  { %v2366_v45 = vadd.f32 %v2365_v19, %v2346_v60  ;;  %v2953_v19 = vunpack.c.l.bf16 %v6363_v20 }
 0x2f9   :  { %v6328_v7 = vadd.f32 %v2385_v33, %v2366_v45  ;;  %v3017_v45 = vunpack.c.l.bf16 %v6365_v41  ;;  %3219 = vmatpush.msra.mxu0 %v2953_v19 }
 0x2fb   :  { %v2628_v9 = vsel %vm829_vm0, %v6328_v7, 0.0  ;;  %v2660_v26 = vmul.f32 %v6328_v7, %v6328_v7  ;;  %3239 = vmatpush.msra.mxu1 %v3017_v45  ;;  %v2994_v45 = vunpack.c.h.bf16 %v6294_v63  ;;  %v2986_v63 = vunpack.c.h.bf16 %v6306_v43 }
 0x2fc   :  { %v2629_v16 = vrot.slane %v2628_v9, 4 }
 0x2fd   :  { %v2664_v57 = vsel %vm829_vm0, %v2660_v26, 0.0  ;;  %v3013_v26 = vunpack.c.l.bf16 %v6375_v24 }
 0x2fe   :  { %v2630_v25 = vadd.f32 %v2629_v16, %v2628_v9  ;;  %v2665_v22 = vrot.slane %v2664_v57, 4  ;;  %v2949_v9 = vunpack.c.l.bf16 %v6373_v36 }
 0x2ff   :  { %v2445_v42 = vpop.f32.mrf.mxu2  ;;  %v2465_v44 = vpop.f32.mrf.mxu3  ;;  %3240 = vmatpush.msra.mxu1 %v3013_v26 }
 0x300   :  { %v2631_v53 = vrot.slane %v2630_v25, 2  ;;  %v2666_v39 = vadd.f32 %v2665_v22, %v2664_v57  ;;  %v2446_v38 = vadd.f32 %v2445_v42, %v2426_v37  ;;  %v3010_v57 = vunpack.c.h.bf16 %v6270_v47  ;;  %3220 = vmatpush.msra.mxu0 %v2949_v9 }
 0x301   :  { %v3074_v37 = vunpack.c.h.bf16 %v6272_v10  ;;  %v3006_v42 = vunpack.c.h.bf16 %v6276_v0  ;;  %v3002_v10 = vunpack.c.h.bf16 %v6282_v29  ;;  %v2998_v0 = vunpack.c.h.bf16 %v6288_v14 }
 0x302   :  { %v2632_v15 = vadd.f32 %v2631_v53, %v2630_v25  ;;  %v2667_v21 = vrot.slane %v2666_v39, 2  ;;  %v6361_v60 = vadd.f32 %v2465_v44, %v2446_v38  ;;  %3285 = vmatpush.msrb.mxu0 %v3010_v57  ;;  %v3066_v38 = vunpack.c.h.bf16 %v6284_v35 }
 0x303   :  { %3305 = vmatpush.msrb.mxu1 %v3074_v37  ;;  %v3058_v29 = vunpack.c.h.bf16 %v6296_v40  ;;  %v2990_v14 = vunpack.c.h.bf16 %v6300_v6  ;;  %v3050_v40 = vunpack.c.h.bf16 %v6308_v18  ;;  %v2982_v6 = vunpack.c.h.bf16 %v6312_v50 }
 0x304   :  { %v2633_v33 = vrot.slane %v2632_v15, 1  ;;  %v2668_v3 = vadd.f32 %v2667_v21, %v2666_v39  ;;  %v2635_v59 = vsel %vm829_vm0, %v6361_v60, 0.0  ;;  %v2661_v49 = vmul.f32 %v6361_v60, %v6361_v60  ;;  %3286 = vmatpush.msrb.mxu0 %v3006_v42 }
 0x305   :  { %v2636_v56 = vrot.slane %v2635_v59, 4  ;;  %3306 = vmatpush.msrb.mxu1 %v3070_v54  ;;  %v2978_v18 = vunpack.c.h.bf16 %v6318_v23  ;;  %v3038_v37 = vunpack.c.h.bf16 %v6326_v4  ;;  %v2970_v42 = vunpack.c.h.bf16 %v6332_v34 }
 0x306   :  { %v2634_v8 = vadd.f32 %v2633_v33, %v2632_v15  ;;  %v2669_v51 = vrot.slane %v2668_v3, 1  ;;  %v2671_v16 = vsel %vm829_vm0, %v2661_v49, 0.0  ;;  %3287 = vmatpush.msrb.mxu0 %v3002_v10  ;;  %v2485_v49 = vpop.f32.mrf.mxu0  ;;  %v3034_v54 = vunpack.c.h.bf16 %v6334_v61 }
 0x307   :  { %v2637_v52 = vadd.f32 %v2636_v56, %v2635_v59  ;;  %v2672_v28 = vrot.slane %v2671_v16, 4  ;;  %3307 = vmatpush.msrb.mxu1 %v3066_v38  ;;  %v2505_v56 = vpop.f32.mrf.mxu1  ;;  %v2966_v4 = vunpack.c.h.bf16 %v6342_v1  ;;  %v3026_v1 = vunpack.c.h.bf16 %v6351_v30 }
 0x308   :  { %v6383_v25 = vmul.f32 %v2634_v8, %v5019_v2  ;;  %v2670_v22 = vadd.f32 %v2669_v51, %v2668_v3  ;;  %3288 = vmatpush.msrb.mxu0 %v2998_v0  ;;  %v2506_v43 = vadd.f32 %v2505_v56, %v2485_v49  ;;  %v2958_v30 = vunpack.c.h.bf16 %v6355_v62  ;;  %v6467_v49 = vld [vmem:[#allocation5 + $0xfc0] sm:$0xff] }
 0x309   :  { %v2638_v11 = vrot.slane %v2637_v52, 2  ;;  %v2673_v53 = vadd.f32 %v2672_v28, %v2671_v16  ;;  %3308 = vmatpush.msrb.mxu1 %v3062_v55  ;;  %v3042_v16 = vunpack.c.h.bf16 %v6320_v5  ;;  %v2954_v62 = vunpack.c.h.bf16 %v6363_v20 }
 0x30a   :  { %v2692_v47 = vmul.f32 %v2670_v22, %v5019_v2  ;;  %v2696_v39 = vmul.f32 %v6383_v25, %v6383_v25  ;;  %3289 = vmatpush.msrb.mxu0 %v2994_v45  ;;  %v3014_v20 = vunpack.c.h.bf16 %v6375_v24 }
 0x30b   :  { %v2639_v44 = vadd.f32 %v2638_v11, %v2637_v52  ;;  %v2674_v17 = vrot.slane %v2673_v53, 2  ;;  %3309 = vmatpush.msrb.mxu1 %v3058_v29  ;;  %v6455_v29 = vld [vmem:[#allocation5 + $0xed0] sm:$0xff] }
 0x30c   :  { %v2700_v31 = vsub.f32 %v2692_v47, %v2696_v39  ;;  %3290 = vmatpush.msrb.mxu0 %v2990_v14  ;;  %v6433_v47 = vld [vmem:[#allocation5 + $0xef0] sm:$0xff]  ;;  %v3022_v14 = vunpack.c.h.bf16 %v6357_v27 }
 0x30d   :  { %v2640_v15 = vrot.slane %v2639_v44, 1  ;;  %v2675_v21 = vadd.f32 %v2674_v17, %v2673_v53  ;;  %3310 = vmatpush.msrb.mxu1 %v3054_v48  ;;  %v3030_v53 = vunpack.c.h.bf16 %v6344_v12  ;;  %v6435_v39 = vld [vmem:[#allocation5 + $0xff0] sm:$0xff]  ;;  %v3137_v61 = vunpack.c.l.bf16 %v6433_v47  ;;  %v6444_v12 = vld [vmem:[#allocation5 + $0xee0] sm:$0xff] }
 0x30e   :  { %v6394_v19 = vadd.f32 1e-05, %v2700_v31  ;;  %3291 = vmatpush.msrb.mxu0 %v2986_v63  ;;  %v3201_v38 = vunpack.c.l.bf16 %v6435_v39  ;;  %v2962_v17 = vunpack.c.h.bf16 %v6349_v58  ;;  %v6446_v31 = vld [vmem:[#allocation5 + $0xfe0] sm:$0xff] }
 0x30f   :  { %v2641_v35 = vadd.f32 %v2640_v15, %v2639_v44  ;;  %v2676_v33 = vrot.slane %v2675_v21, 1  ;;  %3311 = vmatpush.msrb.mxu1 %v3050_v40  ;;  %3245 = vmatpush.msra.mxu2 %v3137_v61  ;;  %v3197_v58 = vunpack.c.l.bf16 %v6446_v31  ;;  %v6465_v40 = vld [vmem:[#allocation5 + $0xec0] sm:$0xff] }
 0x310   :  { %4140 = vrsqrt.f32 %v6394_v19  ;;  %3292 = vmatpush.msrb.mxu0 %v2982_v6  ;;  %3265 = vmatpush.msra.mxu3 %v3201_v38  ;;  %v3125_v27 = vunpack.c.l.bf16 %v6465_v40  ;;  %vm2714_vm2 = vweird.f32 %v6394_v19 }
 0x311   :  { %v6402_v3 = vmul.f32 %v2641_v35, %v5019_v2  ;;  %v2677_v59 = vadd.f32 %v2676_v33, %v2675_v21  ;;  %3312 = vmatpush.msrb.mxu1 %v3046_v32  ;;  %v3133_v21 = vunpack.c.l.bf16 %v6444_v12  ;;  %v6457_v35 = vld [vmem:[#allocation5 + $0xfd0] sm:$0xff]  ;;  %v3189_v32 = vunpack.c.l.bf16 %v6467_v49 }
 0x312   :  { %3293 = vmatpush.msrb.mxu0 %v2978_v18  ;;  %3266 = vmatpush.msra.mxu3 %v3197_v58  ;;  %v3193_v63 = vunpack.c.l.bf16 %v6457_v35  ;;  %v6476_v18 = vld [vmem:[#allocation5 + $0xfb0] sm:$0xff] }
 0x313   :  { %v2693_v9 = vmul.f32 %v2677_v59, %v5019_v2  ;;  %v2697_v26 = vmul.f32 %v6402_v3, %v6402_v3  ;;  %3313 = vmatpush.msrb.mxu1 %v3042_v16  ;;  %3246 = vmatpush.msra.mxu2 %v3133_v21  ;;  %v3129_v59 = vunpack.c.l.bf16 %v6455_v29 }
 0x314   :  { %3294 = vmatpush.msrb.mxu0 %v2974_v13  ;;  %3267 = vmatpush.msra.mxu3 %v3193_v63  ;;  %v6523_v63 = vld [vmem:[#allocation5 + $0xe50] sm:$0xff] }
 0x315   :  { %v2701_v8 = vsub.f32 %v2693_v9, %v2697_v26  ;;  %3314 = vmatpush.msrb.mxu1 %v3038_v37  ;;  %v3018_v26 = vunpack.c.h.bf16 %v6365_v41  ;;  %3247 = vmatpush.msra.mxu2 %v3129_v59  ;;  %v3185_v41 = vunpack.c.l.bf16 %v6476_v18 }
 0x316   :  { %v6411_v51 = vpop.eup %4140  ;;  %3295 = vmatpush.msrb.mxu0 %v2970_v42  ;;  %3268 = vmatpush.msra.mxu3 %v3189_v32  ;;  %v6491_v42 = vld [vmem:[#allocation5 + $0xe90] sm:$0xff]  ;;  %v6531_v32 = vld [vmem:[#allocation5 + $0xf40] sm:$0xff] }
 0x317   :  { %v2709_v57 = vmul.f32 %v6411_v51, %v6394_v19  ;;  %v6417_v52 = vadd.f32 1e-05, %v2701_v8  ;;  %v2525_v28 = vpop.f32.mrf.mxu2  ;;  %v2545_v23 = vpop.f32.mrf.mxu3  ;;  %3315 = vmatpush.msrb.mxu1 %v3034_v54  ;;  %v2950_v8 = vunpack.c.h.bf16 %v6373_v36  ;;  %3248 = vmatpush.msra.mxu2 %v3125_v27  ;;  %v6483_v36 = vld [vmem:[#allocation5 + $0xfa0] sm:$0xff]  ;;  %vm2715_vm14 = vweird.f32 %v6411_v51  ;;  %v6493_v54 = vld [vmem:[#allocation5 + $0xf90] sm:$0xff] }
 0x318   :  { %v2526_v50 = vadd.f32 %v2525_v28, %v2506_v43  ;;  %3296 = vmatpush.msrb.mxu0 %v2966_v4  ;;  %v6474_v43 = vld [vmem:[#allocation5 + $0xeb0] sm:$0xff]  ;;  %v6481_v28 = vld [vmem:[#allocation5 + $0xea0] sm:$0xff]  ;;  %v3181_v13 = vunpack.c.l.bf16 %v6483_v36  ;;  %3269 = vmatpush.msra.mxu3 %v3185_v41  ;;  %vm2716_vm3 = vmor %vm2714_vm2, %vm2715_vm14 }
 0x319   :  { %v2710_v22 = vmul.f32 %v6411_v51, %v2709_v57  ;;  %4142 = vrsqrt.f32 %v6417_v52  ;;  %3316 = vmatpush.msrb.mxu1 %v3030_v53  ;;  %v3121_v16 = vunpack.c.l.bf16 %v6474_v43  ;;  %vm2724_vm15 = vweird.f32 %v6417_v52  ;;  %v6503_v53 = vld [vmem:[#allocation5 + $0xf80] sm:$0xff] }
 0x31a   :  { %v6423_v5 = vadd.f32 %v2545_v23, %v2526_v50  ;;  %3297 = vmatpush.msrb.mxu0 %v2962_v17  ;;  %v3117_v50 = vunpack.c.l.bf16 %v6481_v28  ;;  %3270 = vmatpush.msra.mxu3 %v3181_v13  ;;  %v3173_v19 = vunpack.c.l.bf16 %v6503_v53  ;;  %v6510_v17 = vld [vmem:[#allocation5 + $0xe70] sm:$0xff] }
 0x31b   :  { %v6437_v10 = vmul.f32 0.5, %v2710_v22  ;;  %3317 = vmatpush.msrb.mxu1 %v3026_v1  ;;  %3249 = vmatpush.msra.mxu2 %v3121_v16  ;;  %v6512_v1 = vld [vmem:[#allocation5 + $0xf70] sm:$0xff] }
 0x31c   :  { %v2642_v11 = vsel %vm829_vm0, %v6423_v5, 0.0  ;;  %v2662_v46 = vmul.f32 %v6423_v5, %v6423_v5  ;;  %3298 = vmatpush.msrb.mxu0 %v2958_v30  ;;  %v6539_v13 = vld [vmem:[#allocation5 + $0xe30] sm:$0xff] }
 0x31d   :  { %v2643_v34 = vrot.slane %v2642_v11, 4  ;;  %v2712_v33 = vsub.f32 1.5, %v6437_v10  ;;  %3318 = vmatpush.msrb.mxu1 %v3022_v14  ;;  %3250 = vmatpush.msra.mxu2 %v3117_v50  ;;  %v4160_v14 = vld [vmem:[#allocation7] sm:$0xff] }
 0x31e   :  { %v2678_v44 = vsel %vm829_vm0, %v2662_v46, 0.0  ;;  %3299 = vmatpush.msrb.mxu0 %v2954_v62  ;;  %v3177_v46 = vunpack.c.l.bf16 %v6493_v54  ;;  %v6525_v62 = vld [vmem:[#allocation5 + $0xf50] sm:$0xff] }
 0x31f   :  { %v6448_v0 = vpop.eup %4142  ;;  %v2644_v55 = vadd.f32 %v2643_v34, %v2642_v11  ;;  %v2679_v15 = vrot.slane %v2678_v44, 4  ;;  %3319 = vmatpush.msrb.mxu1 %v3018_v26  ;;  %v2713_v37 = vmul.f32 %v6411_v51, %v2712_v33  ;;  %v3113_v11 = vunpack.c.l.bf16 %v6491_v42 }
 0x320   :  { %v2719_v45 = vmul.f32 %v6448_v0, %v6417_v52  ;;  %vm2725_vm13 = vweird.f32 %v6448_v0  ;;  %3300 = vmatpush.msrb.mxu0 %v2950_v8  ;;  %v6501_v52 = vld [vmem:[#allocation5 + $0xe80] sm:$0xff]  ;;  %3271 = vmatpush.msra.mxu3 %v3177_v46  ;;  %v2565_v8 = vpop.f32.mrf.mxu0 }
 0x321   :  { %v2645_v56 = vrot.slane %v2644_v55, 2  ;;  %v2680_v9 = vadd.f32 %v2679_v15, %v2678_v44  ;;  %3320 = vmatpush.msrb.mxu1 %v3014_v20  ;;  %vm2726_vm1 = vmor %vm2724_vm15, %vm2725_vm13  ;;  %v3109_v61 = vunpack.c.l.bf16 %v6501_v52  ;;  %v2717_v38 = vsel %vm2716_vm3, %v6411_v51, %v2713_v37  ;;  %3251 = vmatpush.msra.mxu2 %v3113_v11  ;;  %v6519_v51 = vld [vmem:[#allocation5 + $0xf60] sm:$0xff]  ;;  %v2585_v20 = vpop.f32.mrf.mxu1  ;;  %v6541_v37 = vld [vmem:[#allocation5 + $0xf30] sm:$0xff] }
 0x322   :  { %v2720_v48 = vmul.f32 %v6448_v0, %v2719_v45  ;;  %v3169_v15 = vunpack.c.l.bf16 %v6512_v1  ;;  %3272 = vmatpush.msra.mxu3 %v3173_v19  ;;  %v6517_v45 = vld [vmem:[#allocation5 + $0xe60] sm:$0xff]  ;;  %v3165_v33 = vunpack.c.l.bf16 %v6519_v51  ;;  %v2586_v11 = vadd.f32 %v2585_v20, %v2565_v8  ;;  %v4161_v8 = vld [vmem:[#allocation8] sm:$0xff] }
 0x323   :  { %v2681_v24 = vrot.slane %v2680_v9, 2  ;;  %v2646_v23 = vadd.f32 %v2645_v56, %v2644_v55  ;;  %v3105_v55 = vunpack.c.l.bf16 %v6510_v17  ;;  %3252 = vmatpush.msra.mxu2 %v3109_v61  ;;  %v3101_v30 = vunpack.c.l.bf16 %v6517_v45 }
 0x324   :  { %v2721_v6 = vmul.f32 0.5, %v2720_v48  ;;  %3273 = vmatpush.msra.mxu3 %v3169_v15  ;;  %v3097_v56 = vunpack.c.l.bf16 %v6523_v63  ;;  %v6558_v15 = vld [vmem:[#allocation5 + $0xf10] sm:$0xff] }
 0x325   :  { %v2682_v34 = vadd.f32 %v2681_v24, %v2680_v9  ;;  %v2647_v44 = vrot.slane %v2646_v23, 1  ;;  %3253 = vmatpush.msra.mxu2 %v3105_v55  ;;  %v3161_v9 = vunpack.c.l.bf16 %v6525_v62  ;;  %v6556_v55 = vld [vmem:[#allocation5 + $0xe10] sm:$0xff] }
 0x326   :  { %v2722_v57 = vsub.f32 1.5, %v2721_v6  ;;  %3274 = vmatpush.msra.mxu3 %v3165_v33  ;;  %v6529_v6 = vld [vmem:[#allocation5 + $0xe40] sm:$0xff]  ;;  %v3145_v33 = vunpack.c.l.bf16 %v6558_v15 }
 0x327   :  { %v2683_v58 = vrot.slane %v2682_v34, 1  ;;  %v2648_v59 = vadd.f32 %v2647_v44, %v2646_v23  ;;  %3254 = vmatpush.msra.mxu2 %v3101_v30  ;;  %v3093_v41 = vunpack.c.l.bf16 %v6529_v6  ;;  %v3153_v23 = vunpack.c.l.bf16 %v6541_v37 }
 0x328   :  { %v2723_v22 = vmul.f32 %v6448_v0, %v2722_v57  ;;  %v3157_v57 = vunpack.c.l.bf16 %v6531_v32  ;;  %3275 = vmatpush.msra.mxu3 %v3161_v9  ;;  %v3081_v30 = vunpack.c.l.bf16 %v6556_v55  ;;  %v6566_v9 = vld [vmem:[#allocation5 + $0xf00] sm:$0xff] }
 0x329   :  { %v2684_v16 = vadd.f32 %v2683_v58, %v2682_v34  ;;  %v6537_v50 = vmul.f32 %v2648_v59, %v5019_v2  ;;  %3255 = vmatpush.msra.mxu2 %v3097_v56  ;;  %v6564_v56 = vld [vmem:[#allocation5 + $0xe00] sm:$0xff] }
 0x32a   :  { %v2727_v4 = vsel %vm2726_vm1, %v6448_v0, %v2723_v22  ;;  %v3089_v22 = vunpack.c.l.bf16 %v6539_v13  ;;  %3276 = vmatpush.msra.mxu3 %v3157_v57 }
 0x32b   :  { %v2752_v10 = vrot.slane %v2727_v4, 4  ;;  %3256 = vmatpush.msra.mxu2 %v3093_v41  ;;  %v2694_v34 = vmul.f32 %v2684_v16, %v5019_v2  ;;  %v3077_v16 = vunpack.c.l.bf16 %v6564_v56  ;;  %v3141_v41 = vunpack.c.l.bf16 %v6566_v9 }
 0x32c   :  { %3277 = vmatpush.msra.mxu3 %v3153_v23 }
 0x32d   :  { %v2754_v0 = vsel %vm963_vm8, %v2717_v38, %v2752_v10  ;;  %v6548_v10 = vld [vmem:[#allocation5 + $0xf20] sm:$0xff]  ;;  %3257 = vmatpush.msra.mxu2 %v3089_v22 }
 0x32e   :  { %v2756_v21 = vrot.slane %v2754_v0, 6  ;;  %v3149_v44 = vunpack.c.l.bf16 %v6548_v10  ;;  %v2698_v0 = vmul.f32 %v6537_v50, %v6537_v50 }
 0x330   :  { %v2760_v48 = vmul.f32 %v4160_v14, %v2756_v21  ;;  %3278 = vmatpush.msra.mxu3 %v3149_v44  ;;  %v2702_v57 = vsub.f32 %v2694_v34, %v2698_v0  ;;  %v3202_v34 = vunpack.c.h.bf16 %v6435_v39  ;;  %v6587_v39 = vld [vmem:[#allocation5 + $0xde8] sm:$0xff] }
 0x332   :  { %v2764_v26 = vperm.slane %v2760_v48, 2  ;;  %v2765_v27 = vperm.slane %v2760_v48, 6  ;;  %3279 = vmatpush.msra.mxu3 %v3145_v33 }
 0x334   :  { %v2773_v24 = vmul.f32 %v2765_v27, %v6402_v3  ;;  %v2772_v46 = vmul.f32 %v2764_v26, %v6383_v25  ;;  %v6546_v3 = vld [vmem:[#allocation5 + $0xe20] sm:$0xff]  ;;  %v2791_v14 = vperm.slane %v2765_v27, 2  ;;  %v2790_v59 = vperm.slane %v2764_v26, 2  ;;  %3280 = vmatpush.msra.mxu3 %v3141_v41 }
 0x335   :  { %v3085_v38 = vunpack.c.l.bf16 %v6546_v3 }
 0x336   :  { %v2780_v4 = vrot.slane %v2773_v24, 4  ;;  %3345 = vmatpush.msrb.mxu3 %v3202_v34  ;;  %v3190_v34 = vunpack.c.h.bf16 %v6467_v49  ;;  %v3186_v49 = vunpack.c.h.bf16 %v6476_v18 }
 0x337   :  { %v2605_v61 = vpop.f32.mrf.mxu2  ;;  %v2625_v58 = vpop.f32.mrf.mxu3  ;;  %3258 = vmatpush.msra.mxu2 %v3085_v38 }
 0x338   :  { %v2782_v19 = vsel %vm963_vm8, %v2772_v46, %v2780_v4  ;;  %v2606_v25 = vadd.f32 %v2605_v61, %v2586_v11  ;;  %v3138_v11 = vunpack.c.h.bf16 %v6433_v47  ;;  %v2795_v46 = vmul.f32 %v2791_v14, %v6361_v60  ;;  %v6585_v14 = vld [vmem:[#allocation5 + $0xce8] sm:$0xff] }
 0x339   :  { %v2784_v21 = vrot.slane %v2782_v19, 6  ;;  %3259 = vmatpush.msra.mxu2 %v3081_v30  ;;  %v2794_v61 = vmul.f32 %v2790_v59, %v6328_v7  ;;  %v3134_v60 = vunpack.c.h.bf16 %v6444_v12  ;;  %v3198_v47 = vunpack.c.h.bf16 %v6446_v31 }
 0x33a   :  { %v6562_v48 = vadd.f32 %v2625_v58, %v2606_v25  ;;  %v6579_v25 = vld [vmem:[#allocation5 + $0xcf8] sm:$0xff]  ;;  %v6589_v59 = vadd.f32 1e-05, %v2702_v57  ;;  %v3130_v12 = vunpack.c.h.bf16 %v6455_v29  ;;  %v3007_v57 = vunpack.c.l.bf16 %v6585_v14 }
 0x33b   :  { %v2788_v20 = vsub.f32 %v4161_v8, %v2784_v21  ;;  %3260 = vmatpush.msra.mxu2 %v3077_v16  ;;  %v6581_v21 = vld [vmem:[#allocation5 + $0xdf8] sm:$0xff]  ;;  %v3011_v8 = vunpack.c.l.bf16 %v6579_v25  ;;  %3346 = vmatpush.msrb.mxu3 %v3198_v47  ;;  %v3118_v47 = vunpack.c.h.bf16 %v6481_v28 }
 0x33c   :  { %v2649_v24 = vsel %vm829_vm0, %v6562_v48, 0.0  ;;  %v2663_v27 = vmul.f32 %v6562_v48, %v6562_v48  ;;  %4144 = vrsqrt.f32 %v6589_v59  ;;  %vm2734_vm9 = vweird.f32 %v6589_v59 }
 0x33d   :  { %v2801_v26 = vperm.slane %v2788_v20, 6  ;;  %v2650_v22 = vrot.slane %v2649_v24, 4  ;;  %v2800_v23 = vperm.slane %v2788_v20, 2  ;;  %3325 = vmatpush.msrb.mxu2 %v3138_v11  ;;  %v3075_v20 = vunpack.c.l.bf16 %v6581_v21 }
 0x33e   :  { %v2685_v4 = vsel %vm829_vm0, %v2663_v27, 0.0  ;;  %v6598_v27 = vld [vmem:[#allocation5 + $0xcd8] sm:$0xff]  ;;  %v3126_v11 = vunpack.c.h.bf16 %v6465_v40 }
 0x33f   :  { %v2809_v38 = vperm.slane %v2801_v26, 2  ;;  %v2651_v44 = vadd.f32 %v2650_v22, %v2649_v24  ;;  %v2686_v19 = vrot.slane %v2685_v4, 4  ;;  %v2808_v0 = vperm.slane %v2800_v23, 2  ;;  %3326 = vmatpush.msrb.mxu2 %v3134_v60  ;;  %v6600_v26 = vld [vmem:[#allocation5 + $0xdd8] sm:$0xff] }
 0x340   :  { %v3071_v22 = vunpack.c.l.bf16 %v6587_v39  ;;  %v3194_v23 = vunpack.c.h.bf16 %v6457_v35  ;;  %v3003_v35 = vunpack.c.l.bf16 %v6598_v27  ;;  %v3067_v40 = vunpack.c.l.bf16 %v6600_v26  ;;  %v6619_v60 = vld [vmem:[#allocation5 + $0xdb8] sm:$0xff] }
 0x341   :  { %v2813_v58 = vadd.f32 %v2809_v38, %v2795_v46  ;;  %v2652_v7 = vrot.slane %v2651_v44, 2  ;;  %v2687_v30 = vadd.f32 %v2686_v19, %v2685_v4  ;;  %v2812_v33 = vadd.f32 %v2808_v0, %v2794_v61  ;;  %3327 = vmatpush.msrb.mxu2 %v3130_v12  ;;  %v6608_v4 = vld [vmem:[#allocation5 + $0xcc8] sm:$0xff]  ;;  %v6617_v0 = vld [vmem:[#allocation5 + $0xcb8] sm:$0xff] }
 0x342   :  { %v6610_v61 = vld [vmem:[#allocation5 + $0xdc8] sm:$0xff]  ;;  %v3122_v38 = vunpack.c.h.bf16 %v6474_v43  ;;  %3347 = vmatpush.msrb.mxu3 %v3194_v23  ;;  %v2995_v18 = vunpack.c.l.bf16 %v6617_v0  ;;  %v3059_v28 = vunpack.c.l.bf16 %v6619_v60  ;;  %v6643_v23 = vpop.eup %4144 }
 0x343   :  { %v2653_v16 = vadd.f32 %v2652_v7, %v2651_v44  ;;  %v2688_v31 = vrot.slane %v2687_v30, 2  ;;  %v6594_v41 = vmax.f32 %v2812_v33, 0.0  ;;  %v6596_v24 = vmax.f32 %v2813_v58, 0.0  ;;  %3328 = vmatpush.msrb.mxu2 %v3126_v11  ;;  %v6628_v33 = vld [vmem:[#allocation5 + $0xca8] sm:$0xff] }
 0x344   :  { %v2999_v58 = vunpack.c.l.bf16 %v6608_v4  ;;  %v3063_v7 = vunpack.c.l.bf16 %v6610_v61  ;;  %3348 = vmatpush.msrb.mxu3 %v3190_v34  ;;  %v2991_v11 = vunpack.c.l.bf16 %v6628_v33  ;;  %v6649_v34 = vld [vmem:[#allocation5 + $0xc88] sm:$0xff]  ;;  %vm2735_vm5 = vweird.f32 %v6643_v23 }
 0x345   :  { %v2654_v29 = vrot.slane %v2653_v16, 1  ;;  %v2689_v46 = vadd.f32 %v2688_v31, %v2687_v30  ;;  %3221 = vmatmul.f32.vlgmr.msra.gmra.mxu0 %v6594_v41  ;;  %3241 = vmatmul.f32.vlgmr.msra.gmra.mxu1 %v6596_v24  ;;  %v6639_v31 = vld [vmem:[#allocation5 + $0xd98] sm:$0xff]  ;;  %vm2736_vm10 = vmor %vm2734_vm9, %vm2735_vm5 }
 0x346   :  { %3365 = vmatpush.msra.mxu0 %v3011_v8  ;;  %3385 = vmatpush.msra.mxu1 %v3075_v20  ;;  %v6630_v8 = vld [vmem:[#allocation5 + $0xda8] sm:$0xff] }
 0x347   :  { %v2655_v44 = vadd.f32 %v2654_v29, %v2653_v16  ;;  %v2690_v19 = vrot.slane %v2689_v46, 1  ;;  %3329 = vmatpush.msrb.mxu2 %v3122_v38  ;;  %v6637_v16 = vld [vmem:[#allocation5 + $0xc98] sm:$0xff]  ;;  %3349 = vmatpush.msrb.mxu3 %v3186_v49  ;;  %v3055_v29 = vunpack.c.l.bf16 %v6630_v8  ;;  %v3051_v38 = vunpack.c.l.bf16 %v6639_v31 }
 0x348   :  { %3366 = vmatpush.msra.mxu0 %v3007_v57  ;;  %3386 = vmatpush.msra.mxu1 %v3071_v22  ;;  %v3182_v57 = vunpack.c.h.bf16 %v6483_v36  ;;  %v3114_v22 = vunpack.c.h.bf16 %v6491_v42  ;;  %v3178_v36 = vunpack.c.h.bf16 %v6493_v54  ;;  %v3110_v42 = vunpack.c.h.bf16 %v6501_v52  ;;  %v6661_v49 = vld [vmem:[#allocation5 + $0xc78] sm:$0xff] }
 0x349   :  { %v6626_v43 = vmul.f32 %v2655_v44, %v5019_v2  ;;  %v2691_v30 = vadd.f32 %v2690_v19, %v2689_v46  ;;  %3330 = vmatpush.msrb.mxu2 %v3118_v47  ;;  %v2729_v44 = vmul.f32 %v6643_v23, %v6589_v59  ;;  %v6663_v47 = vld [vmem:[#allocation5 + $0xd78] sm:$0xff]  ;;  %v3174_v54 = vunpack.c.h.bf16 %v6503_v53 }
 0x34a   :  { %3367 = vmatpush.msra.mxu0 %v3003_v35  ;;  %3387 = vmatpush.msra.mxu1 %v3067_v40  ;;  %v6651_v35 = vld [vmem:[#allocation5 + $0xd88] sm:$0xff]  ;;  %v2987_v40 = vunpack.c.l.bf16 %v6637_v16  ;;  %v3106_v52 = vunpack.c.h.bf16 %v6510_v17  ;;  %v3102_v53 = vunpack.c.h.bf16 %v6517_v45  ;;  %v2979_v17 = vunpack.c.l.bf16 %v6661_v49 }
 0x34b   :  { %v2695_v20 = vmul.f32 %v2691_v30, %v5019_v2  ;;  %v2699_v12 = vmul.f32 %v6626_v43, %v6626_v43  ;;  %3350 = vmatpush.msrb.mxu3 %v3182_v57  ;;  %3331 = vmatpush.msrb.mxu2 %v3114_v22  ;;  %v6670_v30 = vld [vmem:[#allocation5 + $0xc68] sm:$0xff]  ;;  %v6679_v57 = vld [vmem:[#allocation5 + $0xc58] sm:$0xff]  ;;  %v3072_v59 = vunpack.c.h.bf16 %v6587_v39  ;;  %v3064_v39 = vunpack.c.h.bf16 %v6610_v61 }
 0x34c   :  { %3368 = vmatpush.msra.mxu0 %v2999_v58  ;;  %3388 = vmatpush.msra.mxu1 %v3063_v7  ;;  %v2983_v58 = vunpack.c.l.bf16 %v6649_v34  ;;  %v3047_v7 = vunpack.c.l.bf16 %v6651_v35  ;;  %v6681_v22 = vld [vmem:[#allocation5 + $0xd58] sm:$0xff]  ;;  %v2975_v45 = vunpack.c.l.bf16 %v6670_v30  ;;  %v2988_v61 = vunpack.c.h.bf16 %v6637_v16 }
 0x34d   :  { %v2703_v46 = vsub.f32 %v2695_v20, %v2699_v12  ;;  %3301 = vmatmul.f32.vlgmr.msrb.gmra.mxu0 %v6594_v41  ;;  %3321 = vmatmul.f32.vlgmr.msrb.gmra.mxu1 %v6596_v24  ;;  %v3043_v20 = vunpack.c.l.bf16 %v6663_v47  ;;  %v2730_v12 = vmul.f32 %v6643_v23, %v2729_v44 }
 0x34e   :  { %3369 = vmatpush.msra.mxu0 %v2995_v18  ;;  %3389 = vmatpush.msra.mxu1 %v3059_v28  ;;  %v6672_v18 = vld [vmem:[#allocation5 + $0xd68] sm:$0xff]  ;;  %v3170_v28 = vunpack.c.h.bf16 %v6512_v1  ;;  %v3098_v1 = vunpack.c.h.bf16 %v6523_v63  ;;  %v3035_v63 = vunpack.c.l.bf16 %v6681_v22 }
 0x34f   :  { %v6659_v19 = vadd.f32 1e-05, %v2703_v46  ;;  %3351 = vmatpush.msrb.mxu3 %v3178_v36  ;;  %3332 = vmatpush.msrb.mxu2 %v3110_v42  ;;  %v6687_v46 = vld [vmem:[#allocation5 + $0xc48] sm:$0xff]  ;;  %v3162_v42 = vunpack.c.h.bf16 %v6525_v62  ;;  %v2731_v44 = vmul.f32 0.5, %v2730_v12  ;;  %v3090_v62 = vunpack.c.h.bf16 %v6539_v13 }
 0x350   :  { %3370 = vmatpush.msra.mxu0 %v2991_v11  ;;  %3390 = vmatpush.msra.mxu1 %v3055_v29  ;;  %v3166_v11 = vunpack.c.h.bf16 %v6519_v51  ;;  %v3039_v29 = vunpack.c.l.bf16 %v6672_v18  ;;  %v6689_v36 = vld [vmem:[#allocation5 + $0xd48] sm:$0xff]  ;;  %v2971_v51 = vunpack.c.l.bf16 %v6679_v57 }
 0x351   :  { %4146 = vrsqrt.f32 %v6659_v19  ;;  %3352 = vmatpush.msrb.mxu3 %v3174_v54  ;;  %3333 = vmatpush.msrb.mxu2 %v3106_v52  ;;  %v6697_v54 = vld [vmem:[#allocation5 + $0xc38] sm:$0xff]  ;;  %vm2744_vm6 = vweird.f32 %v6659_v19 }
 0x352   :  { %3371 = vmatpush.msra.mxu0 %v2987_v40  ;;  %3391 = vmatpush.msra.mxu1 %v3051_v38  ;;  %v3094_v40 = vunpack.c.h.bf16 %v6529_v6  ;;  %v6699_v52 = vld [vmem:[#allocation5 + $0xd38] sm:$0xff]  ;;  %v2963_v12 = vunpack.c.l.bf16 %v6697_v54 }
 0x353   :  { %3353 = vmatpush.msrb.mxu3 %v3170_v28  ;;  %3334 = vmatpush.msrb.mxu2 %v3102_v53  ;;  %v3031_v28 = vunpack.c.l.bf16 %v6689_v36  ;;  %v6707_v53 = vld [vmem:[#allocation5 + $0xc28] sm:$0xff] }
 0x354   :  { %3372 = vmatpush.msra.mxu0 %v2983_v58  ;;  %3392 = vmatpush.msra.mxu1 %v3047_v7  ;;  %v3158_v58 = vunpack.c.h.bf16 %v6531_v32  ;;  %v2967_v7 = vunpack.c.l.bf16 %v6687_v46  ;;  %v3086_v32 = vunpack.c.h.bf16 %v6546_v3 }
 0x355   :  { %3354 = vmatpush.msrb.mxu3 %v3166_v11  ;;  %3335 = vmatpush.msrb.mxu2 %v3098_v1  ;;  %v3027_v11 = vunpack.c.l.bf16 %v6699_v52  ;;  %v2732_v1 = vsub.f32 1.5, %v2731_v44  ;;  %v6726_v44 = vld [vmem:[#allocation5 + $0xd08] sm:$0xff] }
 0x356   :  { %3373 = vmatpush.msra.mxu0 %v2979_v17  ;;  %3393 = vmatpush.msra.mxu1 %v3043_v20  ;;  %v6709_v17 = vld [vmem:[#allocation5 + $0xd28] sm:$0xff]  ;;  %v3154_v20 = vunpack.c.h.bf16 %v6541_v37  ;;  %v3082_v37 = vunpack.c.h.bf16 %v6556_v55 }
 0x357   :  { %v6695_v38 = vpop.eup %4146  ;;  %3355 = vmatpush.msrb.mxu3 %v3162_v42  ;;  %3336 = vmatpush.msrb.mxu2 %v3094_v40  ;;  %v3150_v42 = vunpack.c.h.bf16 %v6548_v10  ;;  %v2959_v40 = vunpack.c.l.bf16 %v6707_v53 }
 0x358   :  { %v2739_v6 = vmul.f32 %v6695_v38, %v6659_v19  ;;  %3374 = vmatpush.msra.mxu0 %v2975_v45  ;;  %3394 = vmatpush.msra.mxu1 %v3039_v29  ;;  %v6716_v45 = vld [vmem:[#allocation5 + $0xc18] sm:$0xff]  ;;  %vm2745_vm4 = vweird.f32 %v6695_v38  ;;  %v3076_v19 = vunpack.c.h.bf16 %v6581_v21  ;;  %v3004_v21 = vunpack.c.h.bf16 %v6598_v27 }
 0x359   :  { %v6718_v29 = vld [vmem:[#allocation5 + $0xd18] sm:$0xff]  ;;  %3356 = vmatpush.msrb.mxu3 %v3158_v58  ;;  %3337 = vmatpush.msrb.mxu2 %v3090_v62  ;;  %v3146_v58 = vunpack.c.h.bf16 %v6558_v15  ;;  %v3078_v62 = vunpack.c.h.bf16 %v6564_v56  ;;  %v2955_v55 = vunpack.c.l.bf16 %v6716_v45  ;;  %vm2746_vm7 = vmor %vm2744_vm6, %vm2745_vm4 }
 0x35a   :  { %v2740_v13 = vmul.f32 %v6695_v38, %v2739_v6  ;;  %3375 = vmatpush.msra.mxu0 %v2971_v51  ;;  %3395 = vmatpush.msra.mxu1 %v3035_v63  ;;  %v3023_v51 = vunpack.c.l.bf16 %v6709_v17  ;;  %v6724_v63 = vld [vmem:[#allocation5 + $0xc08] sm:$0xff]  ;;  %v3019_v6 = vunpack.c.l.bf16 %v6718_v29 }
 0x35b   :  { %3357 = vmatpush.msrb.mxu3 %v3154_v20  ;;  %3338 = vmatpush.msrb.mxu2 %v3086_v32  ;;  %v2951_v56 = vunpack.c.l.bf16 %v6724_v63  ;;  %v3015_v20 = vunpack.c.l.bf16 %v6726_v44 }
 0x35c   :  { %v2741_v3 = vmul.f32 0.5, %v2740_v13  ;;  %3376 = vmatpush.msra.mxu0 %v2967_v7  ;;  %3396 = vmatpush.msra.mxu1 %v3031_v28  ;;  %v2733_v7 = vmul.f32 %v6643_v23, %v2732_v1  ;;  %v3142_v28 = vunpack.c.h.bf16 %v6566_v9  ;;  %v3012_v9 = vunpack.c.h.bf16 %v6579_v25 }
 0x35d   :  { %3358 = vmatpush.msrb.mxu3 %v3150_v42  ;;  %3339 = vmatpush.msrb.mxu2 %v3082_v37  ;;  %v3068_v1 = vunpack.c.h.bf16 %v6600_v26  ;;  %v2992_v26 = vunpack.c.h.bf16 %v6628_v33 }
 0x35e   :  { %v2742_v10 = vsub.f32 1.5, %v2741_v3  ;;  %3377 = vmatpush.msra.mxu0 %v2963_v12  ;;  %3397 = vmatpush.msra.mxu1 %v3027_v11  ;;  %v2737_v12 = vsel %vm2736_vm10, %v6643_v23, %v2733_v7  ;;  %v3008_v11 = vunpack.c.h.bf16 %v6585_v14  ;;  %v4162_v23 = vld [vmem:[#allocation7 + $0x8] sm:$0xff]  ;;  %v3000_v14 = vunpack.c.h.bf16 %v6608_v4 }
 0x35f   :  { %3359 = vmatpush.msrb.mxu3 %v3146_v58  ;;  %3340 = vmatpush.msrb.mxu2 %v3078_v62  ;;  %v3056_v58 = vunpack.c.h.bf16 %v6630_v8  ;;  %v3044_v8 = vunpack.c.h.bf16 %v6663_v47 }
 0x360   :  { %v2743_v15 = vmul.f32 %v6695_v38, %v2742_v10  ;;  %3378 = vmatpush.msra.mxu0 %v2959_v40  ;;  %3398 = vmatpush.msra.mxu1 %v3023_v51  ;;  %v2996_v40 = vunpack.c.h.bf16 %v6617_v0  ;;  %v3060_v51 = vunpack.c.h.bf16 %v6619_v60  ;;  %v3052_v10 = vunpack.c.h.bf16 %v6639_v31 }
 0x361   :  { %3360 = vmatpush.msrb.mxu3 %v3142_v28  ;;  %v2984_v60 = vunpack.c.h.bf16 %v6649_v34  ;;  %v2976_v31 = vunpack.c.h.bf16 %v6670_v30  ;;  %v3040_v28 = vunpack.c.h.bf16 %v6672_v18  ;;  %v2968_v30 = vunpack.c.h.bf16 %v6687_v46 }
 0x362   :  { %v2747_v32 = vsel %vm2746_vm7, %v6695_v38, %v2743_v15  ;;  %3379 = vmatpush.msra.mxu0 %v2955_v55  ;;  %3399 = vmatpush.msra.mxu1 %v3019_v6  ;;  %v4163_v55 = vld [vmem:[#allocation8 + $0x8] sm:$0xff]  ;;  %v3032_v18 = vunpack.c.h.bf16 %v6689_v36  ;;  %v2964_v46 = vunpack.c.h.bf16 %v6697_v54  ;;  %v3028_v36 = vunpack.c.h.bf16 %v6699_v52  ;;  %v6807_v52 = vld [vmem:[#allocation5 + $0xfc8] sm:$0xff] }
 0x363   :  { %v2753_v13 = vrot.slane %v2747_v32, 4  ;;  %v3024_v54 = vunpack.c.h.bf16 %v6709_v17  ;;  %v3191_v17 = vunpack.c.l.bf16 %v6807_v52 }
 0x364   :  { %3380 = vmatpush.msra.mxu0 %v2951_v56  ;;  %3400 = vmatpush.msra.mxu1 %v3015_v20 }
 0x365   :  { %v2755_v38 = vsel %vm963_vm8, %v2737_v12, %v2753_v13  ;;  %3381 = vmatmul.f32.vlgmr.msra.gmra.mxu0 %v6594_v41  ;;  %3401 = vmatmul.f32.vlgmr.msra.gmra.mxu1 %v6596_v24  ;;  %v6783_v12 = vld [vmem:[#allocation5 + $0xee8] sm:$0xff] }
 0x366   :  { %v2757_v25 = vrot.slane %v2755_v38, 6  ;;  %3445 = vmatpush.msrb.mxu0 %v3012_v9  ;;  %3465 = vmatpush.msrb.mxu1 %v3076_v19  ;;  %v6777_v9 = vld [vmem:[#allocation5 + $0xef8] sm:$0xff] }
 0x367   :  { %v6779_v19 = vld [vmem:[#allocation5 + $0xff8] sm:$0xff] }
 0x368   :  { %v2761_v42 = vmul.f32 %v4162_v23, %v2757_v25  ;;  %3446 = vmatpush.msrb.mxu0 %v3008_v11  ;;  %3466 = vmatpush.msrb.mxu1 %v3072_v59  ;;  %v6795_v38 = vld [vmem:[#allocation5 + $0xed8] sm:$0xff]  ;;  %v2960_v23 = vunpack.c.h.bf16 %v6707_v53 }
 0x369   :  { %v6797_v25 = vld [vmem:[#allocation5 + $0xfd8] sm:$0xff] }
 0x36a   :  { %v2766_v37 = vperm.slane %v2761_v42, 2  ;;  %v2767_v3 = vperm.slane %v2761_v42, 6  ;;  %3447 = vmatpush.msrb.mxu0 %v3004_v21  ;;  %3467 = vmatpush.msrb.mxu1 %v3068_v1  ;;  %v3135_v21 = vunpack.c.l.bf16 %v6783_v12  ;;  %v6805_v42 = vld [vmem:[#allocation5 + $0xec8] sm:$0xff] }
 0x36b   :  { %v3127_v53 = vunpack.c.l.bf16 %v6805_v42 }
 0x36c   :  { %v2775_v27 = vmul.f32 %v2767_v3, %v6626_v43  ;;  %3448 = vmatpush.msrb.mxu0 %v3000_v14  ;;  %3468 = vmatpush.msrb.mxu1 %v3064_v39  ;;  %v2774_v4 = vmul.f32 %v2766_v37, %v6537_v50  ;;  %v3048_v43 = vunpack.c.h.bf16 %v6651_v35  ;;  %v2980_v50 = vunpack.c.h.bf16 %v6661_v49 }
 0x36d   :  { %v2793_v16 = vperm.slane %v2767_v3, 2  ;;  %v2792_v7 = vperm.slane %v2766_v37, 2  ;;  %v2972_v35 = vunpack.c.h.bf16 %v6679_v57  ;;  %v3036_v49 = vunpack.c.h.bf16 %v6681_v22  ;;  %v6785_v22 = vld [vmem:[#allocation5 + $0xfe8] sm:$0xff] }
 0x36e   :  { %v2781_v62 = vrot.slane %v2775_v27, 4  ;;  %3449 = vmatpush.msrb.mxu0 %v2996_v40  ;;  %3469 = vmatpush.msrb.mxu1 %v3060_v51  ;;  %v3199_v1 = vunpack.c.l.bf16 %v6785_v22  ;;  %v3131_v14 = vunpack.c.l.bf16 %v6795_v38  ;;  %v3195_v39 = vunpack.c.l.bf16 %v6797_v25  ;;  %v6815_v40 = vld [vmem:[#allocation5 + $0xeb8] sm:$0xff] }
 0x36f   :  { %v2797_v47 = vmul.f32 %v2793_v16, %v6562_v48  ;;  %v2796_v20 = vmul.f32 %v2792_v7, %v6423_v5  ;;  %v3139_v5 = vunpack.c.l.bf16 %v6777_v9  ;;  %v3203_v48 = vunpack.c.l.bf16 %v6779_v19  ;;  %v6817_v51 = vld [vmem:[#allocation5 + $0xfb8] sm:$0xff]  ;;  %v6851_v16 = vld [vmem:[#allocation5 + $0xf68] sm:$0xff] }
 0x370   :  { %v2783_v0 = vsel %vm963_vm8, %v2774_v4, %v2781_v62  ;;  %3450 = vmatpush.msrb.mxu0 %v2992_v26  ;;  %3470 = vmatpush.msrb.mxu1 %v3056_v58  ;;  %v2956_v37 = vunpack.c.h.bf16 %v6716_v45  ;;  %v3020_v3 = vunpack.c.h.bf16 %v6718_v29  ;;  %v2952_v27 = vunpack.c.h.bf16 %v6724_v63  ;;  %v6821_v45 = vld [vmem:[#allocation5 + $0xea8] sm:$0xff]  ;;  %v6827_v62 = vld [vmem:[#allocation5 + $0xe98] sm:$0xff] }
 0x371   :  { %v2785_v33 = vrot.slane %v2783_v0, 6  ;;  %v3016_v26 = vunpack.c.h.bf16 %v6726_v44  ;;  %v6823_v29 = vld [vmem:[#allocation5 + $0xfa8] sm:$0xff]  ;;  %v3123_v58 = vunpack.c.l.bf16 %v6815_v40  ;;  %v3187_v4 = vunpack.c.l.bf16 %v6817_v51  ;;  %v6855_v7 = vld [vmem:[#allocation5 + $0xe58] sm:$0xff] }
 0x372   :  { %3451 = vmatpush.msrb.mxu0 %v2988_v61  ;;  %3471 = vmatpush.msrb.mxu1 %v3052_v10  ;;  %v6829_v61 = vld [vmem:[#allocation5 + $0xf98] sm:$0xff]  ;;  %v3119_v63 = vunpack.c.l.bf16 %v6821_v45  ;;  %v3183_v44 = vunpack.c.l.bf16 %v6823_v29  ;;  %v6835_v10 = vld [vmem:[#allocation5 + $0xe88] sm:$0xff] }
 0x373   :  { %v2789_v6 = vsub.f32 %v4163_v55, %v2785_v33  ;;  %v6837_v0 = vld [vmem:[#allocation5 + $0xf88] sm:$0xff]  ;;  %v6843_v33 = vld [vmem:[#allocation5 + $0xe78] sm:$0xff] }
 0x374   :  { %3452 = vmatpush.msrb.mxu0 %v2984_v60  ;;  %3472 = vmatpush.msrb.mxu1 %v3048_v43  ;;  %v3115_v60 = vunpack.c.l.bf16 %v6827_v62  ;;  %v3179_v43 = vunpack.c.l.bf16 %v6829_v61  ;;  %v3175_v55 = vunpack.c.l.bf16 %v6837_v0 }
 0x375   :  { %v2803_v34 = vperm.slane %v2789_v6, 6  ;;  %v2802_v15 = vperm.slane %v2789_v6, 2  ;;  %v6849_v6 = vld [vmem:[#allocation5 + $0xe68] sm:$0xff] }
 0x376   :  { %3453 = vmatpush.msrb.mxu0 %v2980_v50  ;;  %3473 = vmatpush.msrb.mxu1 %v3044_v8  ;;  %v6845_v50 = vld [vmem:[#allocation5 + $0xf78] sm:$0xff]  ;;  %v3111_v8 = vunpack.c.l.bf16 %v6835_v10 }
 0x377   :  { %v2811_v56 = vperm.slane %v2803_v34, 2  ;;  %v2810_v32 = vperm.slane %v2802_v15, 2  ;;  %v3167_v34 = vunpack.c.l.bf16 %v6851_v16  ;;  %v6861_v15 = vld [vmem:[#allocation5 + $0xe48] sm:$0xff] }
 0x378   :  { %3454 = vmatpush.msrb.mxu0 %v2976_v31  ;;  %3474 = vmatpush.msrb.mxu1 %v3040_v28  ;;  %v6857_v31 = vld [vmem:[#allocation5 + $0xf58] sm:$0xff]  ;;  %v3103_v28 = vunpack.c.l.bf16 %v6849_v6 }
 0x379   :  { %v2815_v13 = vadd.f32 %v2811_v56, %v2797_v47  ;;  %v2814_v57 = vadd.f32 %v2810_v32, %v2796_v20  ;;  %v3163_v47 = vunpack.c.l.bf16 %v6857_v31  ;;  %v6867_v56 = vld [vmem:[#allocation5 + $0xe38] sm:$0xff]  ;;  %v3095_v32 = vunpack.c.l.bf16 %v6861_v15 }
 0x37a   :  { %3455 = vmatpush.msrb.mxu0 %v2972_v35  ;;  %3475 = vmatpush.msrb.mxu1 %v3036_v49  ;;  %v6863_v35 = vld [vmem:[#allocation5 + $0xf48] sm:$0xff]  ;;  %v3099_v49 = vunpack.c.l.bf16 %v6855_v7  ;;  %v6869_v20 = vld [vmem:[#allocation5 + $0xf38] sm:$0xff] }
 0x37b   :  { %v6789_v11 = vmax.f32 %v2814_v57, 0.0  ;;  %v6791_v59 = vmax.f32 %v2815_v13, 0.0  ;;  %v6875_v13 = vld [vmem:[#allocation5 + $0xf28] sm:$0xff]  ;;  %v3091_v57 = vunpack.c.l.bf16 %v6867_v56 }
 0x37c   :  { %3456 = vmatpush.msrb.mxu0 %v2968_v30  ;;  %3476 = vmatpush.msrb.mxu1 %v3032_v18  ;;  %v3159_v30 = vunpack.c.l.bf16 %v6863_v35  ;;  %v6873_v18 = vld [vmem:[#allocation5 + $0xe28] sm:$0xff] }
 0x37d   :  { %3261 = vmatmul.f32.vlgmr.msra.gmra.mxu2 %v6789_v11  ;;  %3281 = vmatmul.f32.vlgmr.msra.gmra.mxu3 %v6791_v59 }
 0x37e   :  { %3405 = vmatpush.msra.mxu2 %v3139_v5  ;;  %3425 = vmatpush.msra.mxu3 %v3203_v48  ;;  %v3155_v5 = vunpack.c.l.bf16 %v6869_v20  ;;  %v6879_v48 = vld [vmem:[#allocation5 + $0xe18] sm:$0xff] }
 0x37f   :  { %3457 = vmatpush.msrb.mxu0 %v2964_v46  ;;  %3477 = vmatpush.msrb.mxu1 %v3028_v36  ;;  %v6881_v46 = vld [vmem:[#allocation5 + $0xf18] sm:$0xff]  ;;  %v3087_v36 = vunpack.c.l.bf16 %v6873_v18 }
 0x380   :  { %3406 = vmatpush.msra.mxu2 %v3135_v21  ;;  %3426 = vmatpush.msra.mxu3 %v3199_v1  ;;  %v3151_v21 = vunpack.c.l.bf16 %v6875_v13  ;;  %v6885_v1 = vld [vmem:[#allocation5 + $0xe08] sm:$0xff] }
 0x381   :  { %3458 = vmatpush.msrb.mxu0 %v2960_v23  ;;  %3478 = vmatpush.msrb.mxu1 %v3024_v54  ;;  %v6887_v23 = vld [vmem:[#allocation5 + $0xf08] sm:$0xff]  ;;  %v3083_v54 = vunpack.c.l.bf16 %v6879_v48 }
 0x382   :  { %3407 = vmatpush.msra.mxu2 %v3131_v14  ;;  %3427 = vmatpush.msra.mxu3 %v3195_v39  ;;  %v3147_v14 = vunpack.c.l.bf16 %v6881_v46  ;;  %v3079_v39 = vunpack.c.l.bf16 %v6885_v1 }
 0x383   :  { %3459 = vmatpush.msrb.mxu0 %v2956_v37  ;;  %3479 = vmatpush.msrb.mxu1 %v3020_v3  ;;  %v3143_v37 = vunpack.c.l.bf16 %v6887_v23  ;;  %v3140_v3 = vunpack.c.h.bf16 %v6777_v9  ;;  %v3128_v9 = vunpack.c.h.bf16 %v6805_v42  ;;  %v3180_v42 = vunpack.c.h.bf16 %v6829_v61 }
 0x384   :  { %3408 = vmatpush.msra.mxu2 %v3127_v53  ;;  %3428 = vmatpush.msra.mxu3 %v3191_v17  ;;  %v3204_v53 = vunpack.c.h.bf16 %v6779_v19  ;;  %v3136_v17 = vunpack.c.h.bf16 %v6783_v12  ;;  %v3192_v19 = vunpack.c.h.bf16 %v6807_v52  ;;  %v3124_v12 = vunpack.c.h.bf16 %v6815_v40 }
 0x385   :  { %3460 = vmatpush.msrb.mxu0 %v2952_v27  ;;  %3480 = vmatpush.msrb.mxu1 %v3016_v26  ;;  %v3200_v27 = vunpack.c.h.bf16 %v6785_v22  ;;  %v3132_v26 = vunpack.c.h.bf16 %v6795_v38  ;;  %v3188_v22 = vunpack.c.h.bf16 %v6817_v51  ;;  %v3184_v38 = vunpack.c.h.bf16 %v6823_v29 }
 0x386   :  { %3341 = vmatmul.f32.vlgmr.msrb.gmra.mxu2 %v6789_v11  ;;  %3361 = vmatmul.f32.vlgmr.msrb.gmra.mxu3 %v6791_v59  ;;  %v3112_v52 = vunpack.c.h.bf16 %v6835_v10  ;;  %v3176_v40 = vunpack.c.h.bf16 %v6837_v0  ;;  %v3108_v51 = vunpack.c.h.bf16 %v6843_v33  ;;  %v3104_v29 = vunpack.c.h.bf16 %v6849_v6 }
 0x387   :  { %3409 = vmatpush.msra.mxu2 %v3123_v58  ;;  %3429 = vmatpush.msra.mxu3 %v3187_v4  ;;  %v3196_v58 = vunpack.c.h.bf16 %v6797_v25  ;;  %v3120_v4 = vunpack.c.h.bf16 %v6821_v45  ;;  %v3116_v25 = vunpack.c.h.bf16 %v6827_v62  ;;  %v3172_v45 = vunpack.c.h.bf16 %v6845_v50 }
 0x388   :  { %3461 = vmatmul.f32.vlgmr.msrb.gmra.mxu0 %v6594_v41  ;;  %3481 = vmatmul.f32.vlgmr.msrb.gmra.mxu1 %v6596_v24  ;;  %v3107_v41 = vunpack.c.l.bf16 %v6843_v33  ;;  %v3171_v24 = vunpack.c.l.bf16 %v6845_v50  ;;  %v3168_v62 = vunpack.c.h.bf16 %v6851_v16  ;;  %v3100_v61 = vunpack.c.h.bf16 %v6855_v7 }
 0x389   :  { %3410 = vmatpush.msra.mxu2 %v3119_v63  ;;  %3430 = vmatpush.msra.mxu3 %v3183_v44  ;;  %v3164_v63 = vunpack.c.h.bf16 %v6857_v31  ;;  %v3096_v44 = vunpack.c.h.bf16 %v6861_v15  ;;  %v3160_v10 = vunpack.c.h.bf16 %v6863_v35  ;;  %v3092_v0 = vunpack.c.h.bf16 %v6867_v56 }
 0x38a   :  { %v3152_v33 = vunpack.c.h.bf16 %v6875_v13  ;;  %v3084_v50 = vunpack.c.h.bf16 %v6879_v48  ;;  %v3144_v6 = vunpack.c.h.bf16 %v6887_v23 }
 0x38b   :  { %3411 = vmatpush.msra.mxu2 %v3115_v60  ;;  %3431 = vmatpush.msra.mxu3 %v3179_v43  ;;  %v3156_v60 = vunpack.c.h.bf16 %v6869_v20  ;;  %v3088_v43 = vunpack.c.h.bf16 %v6873_v18 }
 0x38d   :  { %3412 = vmatpush.msra.mxu2 %v3111_v8  ;;  %3432 = vmatpush.msra.mxu3 %v3175_v55  ;;  %v3148_v8 = vunpack.c.h.bf16 %v6881_v46  ;;  %v3080_v55 = vunpack.c.h.bf16 %v6885_v1 }
 0x38f   :  { %3413 = vmatpush.msra.mxu2 %v3107_v41  ;;  %3433 = vmatpush.msra.mxu3 %v3171_v24 }
 0x391   :  { %3414 = vmatpush.msra.mxu2 %v3103_v28  ;;  %3434 = vmatpush.msra.mxu3 %v3167_v34 }
 0x393   :  { %3415 = vmatpush.msra.mxu2 %v3099_v49  ;;  %3435 = vmatpush.msra.mxu3 %v3163_v47 }
 0x395   :  { %3416 = vmatpush.msra.mxu2 %v3095_v32  ;;  %3436 = vmatpush.msra.mxu3 %v3159_v30 }
 0x397   :  { %3417 = vmatpush.msra.mxu2 %v3091_v57  ;;  %3437 = vmatpush.msra.mxu3 %v3155_v5 }
 0x399   :  { %3418 = vmatpush.msra.mxu2 %v3087_v36  ;;  %3438 = vmatpush.msra.mxu3 %v3151_v21 }
 0x39b   :  { %3419 = vmatpush.msra.mxu2 %v3083_v54  ;;  %3439 = vmatpush.msra.mxu3 %v3147_v14 }
 0x39d   :  { %3420 = vmatpush.msra.mxu2 %v3079_v39  ;;  %3440 = vmatpush.msra.mxu3 %v3143_v37  ;;  %v4084_v39 = vld [vmem:[#allocation10 + $0x38] sm:$0xff]  }
 0x39e   :  { %3421 = vmatmul.f32.vlgmr.msra.gmra.mxu2 %v6789_v11  ;;  %3441 = vmatmul.f32.vlgmr.msra.gmra.mxu3 %v6791_v59  ;;  %v4092_v37 = vld [vmem:[#allocation10 + $0x78] sm:$0xff]  }
 0x39f   :  { %3485 = vmatpush.msrb.mxu2 %v3140_v3  ;;  %3505 = vmatpush.msrb.mxu3 %v3204_v53 }
 0x3a1   :  { %3486 = vmatpush.msrb.mxu2 %v3136_v17  ;;  %3506 = vmatpush.msrb.mxu3 %v3200_v27  ;;  %v3981_v27 = vunpack.c.h.bf16 %v4084_v39 }
 0x3a3   :  { %3487 = vmatpush.msrb.mxu2 %v3132_v26  ;;  %3507 = vmatpush.msrb.mxu3 %v3196_v58 }
 0x3a4   :  { %3849 = vmatpush.msra.mxu0 %v3981_v27 }
 0x3a5   :  { %3488 = vmatpush.msrb.mxu2 %v3128_v9  ;;  %3508 = vmatpush.msrb.mxu3 %v3192_v19  ;;  %v4013_v9 = vunpack.c.h.bf16 %v4092_v37 }
 0x3a7   :  { %3489 = vmatpush.msrb.mxu2 %v3124_v12  ;;  %3509 = vmatpush.msrb.mxu3 %v3188_v22  ;;  %v3980_v22 = vunpack.c.l.bf16 %v4084_v39 }
 0x3a8   :  { %3869 = vmatpush.msra.mxu1 %v4013_v9 }
 0x3a9   :  { %3490 = vmatpush.msrb.mxu2 %v3120_v4  ;;  %3510 = vmatpush.msrb.mxu3 %v3184_v38  ;;  %v4012_v4 = vunpack.c.l.bf16 %v4092_v37 }
 0x3aa   :  { %3850 = vmatpush.msra.mxu0 %v3980_v22 }
 0x3ab   :  { %3491 = vmatpush.msrb.mxu2 %v3116_v25  ;;  %3511 = vmatpush.msrb.mxu3 %v3180_v42  ;;  %v4083_v42 = vld [vmem:[#allocation10 + $0x30] sm:$0xff]  }
 0x3ac   :  { %3870 = vmatpush.msra.mxu1 %v4012_v4 }
 0x3ad   :  { %3492 = vmatpush.msrb.mxu2 %v3112_v52  ;;  %3512 = vmatpush.msrb.mxu3 %v3176_v40  ;;  %v4091_v52 = vld [vmem:[#allocation10 + $0x70] sm:$0xff]  }
 0x3af   :  { %3493 = vmatpush.msrb.mxu2 %v3108_v51  ;;  %3513 = vmatpush.msrb.mxu3 %v3172_v45  ;;  %v3977_v45 = vunpack.c.h.bf16 %v4083_v42 }
 0x3b1   :  { %3494 = vmatpush.msrb.mxu2 %v3104_v29  ;;  %3514 = vmatpush.msrb.mxu3 %v3168_v62  ;;  %v4009_v29 = vunpack.c.h.bf16 %v4091_v52 }
 0x3b2   :  { %3851 = vmatpush.msra.mxu0 %v3977_v45 }
 0x3b3   :  { %3495 = vmatpush.msrb.mxu2 %v3100_v61  ;;  %3515 = vmatpush.msrb.mxu3 %v3164_v63 }
 0x3b4   :  { %3871 = vmatpush.msra.mxu1 %v4009_v29 }
 0x3b5   :  { %3496 = vmatpush.msrb.mxu2 %v3096_v44  ;;  %3516 = vmatpush.msrb.mxu3 %v3160_v10  ;;  %v3976_v44 = vunpack.c.l.bf16 %v4083_v42  ;;  %v4008_v10 = vunpack.c.l.bf16 %v4091_v52  ;;  %v4086_v42 = vld [vmem:[#allocation10 + $0x48] sm:$0xff]  }
 0x3b7   :  { %3497 = vmatpush.msrb.mxu2 %v3092_v0  ;;  %3517 = vmatpush.msrb.mxu3 %v3156_v60 }
 0x3b8   :  { %3852 = vmatpush.msra.mxu0 %v3976_v44  ;;  %3872 = vmatpush.msra.mxu1 %v4008_v10  ;;  %v3988_v10 = vunpack.c.l.bf16 %v4086_v42 }
 0x3b9   :  { %3498 = vmatpush.msrb.mxu2 %v3088_v43  ;;  %3518 = vmatpush.msrb.mxu3 %v3152_v33  ;;  %v4082_v43 = vld [vmem:[#allocation10 + $0x28] sm:$0xff]  }
 0x3ba   :  { %v4090_v33 = vld [vmem:[#allocation10 + $0x68] sm:$0xff]  }
 0x3bb   :  { %3499 = vmatpush.msrb.mxu2 %v3084_v50  ;;  %3519 = vmatpush.msrb.mxu3 %v3148_v8  ;;  %v3973_v8 = vunpack.c.h.bf16 %v4082_v43 }
 0x3bd   :  { %3500 = vmatpush.msrb.mxu2 %v3080_v55  ;;  %3520 = vmatpush.msrb.mxu3 %v3144_v6  ;;  %v4005_v55 = vunpack.c.h.bf16 %v4090_v33 }
 0x3be   :  { %3501 = vmatmul.f32.vlgmr.msrb.gmra.mxu2 %v6789_v11  ;;  %3521 = vmatmul.f32.vlgmr.msrb.gmra.mxu3 %v6791_v59 }
 0x3bf   :  { %3853 = vmatpush.msra.mxu0 %v3973_v8  ;;  %3873 = vmatpush.msra.mxu1 %v4005_v55 }
 0x3c2   :  { %v3222_v16 = vpop.f32.mrf.mxu0  ;;  %v3242_v41 = vpop.f32.mrf.mxu1 }
 0x3c3   :  { %v3243_v24 = vadd.f32 %v3242_v41, %v3222_v16  ;;  %v3972_v41 = vunpack.c.l.bf16 %v4082_v43 }
 0x3c5   :  { %3854 = vmatpush.msra.mxu0 %v3972_v41 }
 0x3ca   :  { %v3302_v15 = vpop.f32.mrf.mxu0  ;;  %v3322_v35 = vpop.f32.mrf.mxu1 }
 0x3cb   :  { %v3323_v59 = vadd.f32 %v3322_v35, %v3302_v15  ;;  %v4089_v15 = vld [vmem:[#allocation10 + $0x60] sm:$0xff]  }
 0x400   :  { %v3262_v7 = vpop.f32.mrf.mxu2  ;;  %v3282_v28 = vpop.f32.mrf.mxu3 }
 0x401   :  { %v3263_v31 = vadd.f32 %v3262_v7, %v3243_v24  ;;  %v4004_v24 = vunpack.c.l.bf16 %v4090_v33 }
 0x403   :  { %v6929_v34 = vadd.f32 %v3282_v28, %v3263_v31  ;;  %v4081_v28 = vld [vmem:[#allocation10 + $0x20] sm:$0xff]   ;;  %3874 = vmatpush.msra.mxu1 %v4004_v24 }
 0x404   :  { %v3969_v35 = vunpack.c.h.bf16 %v4081_v28 }
 0x405   :  { %v3525_v49 = vsel %vm829_vm0, %v6929_v34, 0.0  ;;  %v3557_v47 = vmul.f32 %v6929_v34, %v6929_v34 }
 0x406   :  { %v3526_v56 = vrot.slane %v3525_v49, 4  ;;  %3855 = vmatpush.msra.mxu0 %v3969_v35 }
 0x407   :  { %v3561_v11 = vsel %vm829_vm0, %v3557_v47, 0.0  ;;  %v3382_v47 = vpop.f32.mrf.mxu0 }
 0x408   :  { %v3527_v20 = vadd.f32 %v3526_v56, %v3525_v49  ;;  %v3562_v32 = vrot.slane %v3561_v11, 4  ;;  %v4001_v49 = vunpack.c.h.bf16 %v4089_v15  ;;  %v3402_v56 = vpop.f32.mrf.mxu1 }
 0x409   :  { %v3342_v30 = vpop.f32.mrf.mxu2  ;;  %v3362_v5 = vpop.f32.mrf.mxu3 }
 0x40a   :  { %v3528_v18 = vrot.slane %v3527_v20, 2  ;;  %v3563_v13 = vadd.f32 %v3562_v32, %v3561_v11  ;;  %v3343_v57 = vadd.f32 %v3342_v30, %v3323_v59  ;;  %v4000_v32 = vunpack.c.l.bf16 %v4089_v15  ;;  %3875 = vmatpush.msra.mxu1 %v4001_v49 }
 0x40c   :  { %v3529_v48 = vadd.f32 %v3528_v18, %v3527_v20  ;;  %v3564_v46 = vrot.slane %v3563_v13, 2  ;;  %v6936_v36 = vadd.f32 %v3362_v5, %v3343_v57  ;;  %v3968_v20 = vunpack.c.l.bf16 %v4081_v28  ;;  %v4080_v18 = vld [vmem:[#allocation10 + $0x18] sm:$0xff]   ;;  %3876 = vmatpush.msra.mxu1 %v4000_v32 }
 0x40d   :  { %v3403_v5 = vadd.f32 %v3402_v56, %v3382_v47 }
 0x40e   :  { %v3530_v21 = vrot.slane %v3529_v48, 1  ;;  %v3565_v1 = vadd.f32 %v3564_v46, %v3563_v13  ;;  %v3532_v23 = vsel %vm829_vm0, %v6936_v36, 0.0  ;;  %v3558_v54 = vmul.f32 %v6936_v36, %v6936_v36  ;;  %v4088_v13 = vld [vmem:[#allocation10 + $0x58] sm:$0xff]   ;;  %3856 = vmatpush.msra.mxu0 %v3968_v20 }
 0x40f   :  { %v3533_v14 = vrot.slane %v3532_v23, 4  ;;  %v3997_v46 = vunpack.c.h.bf16 %v4088_v13  ;;  %v3996_v39 = vunpack.c.l.bf16 %v4088_v13 }
 0x410   :  { %v3531_v3 = vadd.f32 %v3530_v21, %v3529_v48  ;;  %v3566_v53 = vrot.slane %v3565_v1, 1  ;;  %v3568_v17 = vsel %vm829_vm0, %v3558_v54, 0.0  ;;  %v3965_v48 = vunpack.c.h.bf16 %v4080_v18 }
 0x411   :  { %v3534_v26 = vadd.f32 %v3533_v14, %v3532_v23  ;;  %v3569_v58 = vrot.slane %v3568_v17, 4  ;;  %v3964_v14 = vunpack.c.l.bf16 %v4080_v18  ;;  %3877 = vmatpush.msra.mxu1 %v3997_v46 }
 0x412   :  { %v6944_v19 = vmul.f32 %v3531_v3, %v5019_v2  ;;  %v3567_v12 = vadd.f32 %v3566_v53, %v3565_v1  ;;  %3857 = vmatpush.msra.mxu0 %v3965_v48  ;;  %v4079_v3 = vld [vmem:[#allocation10 + $0x10] sm:$0xff]   ;;  %v4164_v48 = vld [vmem:[#allocation7] sm:$0xff] }
 0x413   :  { %v3535_v38 = vrot.slane %v3534_v26, 2  ;;  %v3570_v25 = vadd.f32 %v3569_v58, %v3568_v17  ;;  %v4087_v53 = vld [vmem:[#allocation10 + $0x50] sm:$0xff]   ;;  %v3961_v27 = vunpack.c.h.bf16 %v4079_v3  ;;  %3878 = vmatpush.msra.mxu1 %v3996_v39  ;;  %v3960_v22 = vunpack.c.l.bf16 %v4079_v3 }
 0x414   :  { %v3589_v40 = vmul.f32 %v3567_v12, %v5019_v2  ;;  %v3593_v51 = vmul.f32 %v6944_v19, %v6944_v19  ;;  %3858 = vmatpush.msra.mxu0 %v3964_v14  ;;  %v3992_v4 = vunpack.c.l.bf16 %v4087_v53 }
 0x415   :  { %v3536_v62 = vadd.f32 %v3535_v38, %v3534_v26  ;;  %v3571_v61 = vrot.slane %v3570_v25, 2  ;;  %v3993_v26 = vunpack.c.h.bf16 %v4087_v53 }
 0x416   :  { %v3597_v63 = vsub.f32 %v3589_v40, %v3593_v51  ;;  %3859 = vmatpush.msra.mxu0 %v3961_v27  ;;  %v3989_v51 = vunpack.c.h.bf16 %v4086_v42 }
 0x417   :  { %v3537_v0 = vrot.slane %v3536_v62, 1  ;;  %v3572_v60 = vadd.f32 %v3571_v61, %v3570_v25  ;;  %3879 = vmatpush.msra.mxu1 %v3993_v26  ;;  %v4078_v25 = vld [vmem:[#allocation10 + $0x8] sm:$0xff]  }
 0x418   :  { %v6949_v50 = vadd.f32 1e-05, %v3597_v63  ;;  %3860 = vmatpush.msra.mxu0 %v3960_v22  ;;  %v3957_v40 = vunpack.c.h.bf16 %v4078_v25  ;;  %v3956_v44 = vunpack.c.l.bf16 %v4078_v25 }
 0x419   :  { %v3538_v6 = vadd.f32 %v3537_v0, %v3536_v62  ;;  %v3573_v16 = vrot.slane %v3572_v60, 1  ;;  %3880 = vmatpush.msra.mxu1 %v3992_v4  ;;  %v3951_v0 = vld [vmem:[#allocation10] sm:$0xff]  }
 0x41a   :  { %4148 = vrsqrt.f32 %v6949_v50  ;;  %3861 = vmatpush.msra.mxu0 %v3957_v40  ;;  %v3953_v33 = vunpack.c.h.bf16 %v3951_v0  ;;  %v3952_v24 = vunpack.c.l.bf16 %v3951_v0  ;;  %vm3611_vm15 = vweird.f32 %v6949_v50  ;;  %v4108_v40 = vld [vmem:[#allocation10 + $0xf8] sm:$0xff]  }
 0x41b   :  { %v6953_v7 = vmul.f32 %v3538_v6, %v5019_v2  ;;  %v3574_v31 = vadd.f32 %v3573_v16, %v3572_v60  ;;  %3881 = vmatpush.msra.mxu1 %v3989_v51  ;;  %v4085_v60 = vld [vmem:[#allocation10 + $0x40] sm:$0xff]  }
 0x41c   :  { %3862 = vmatpush.msra.mxu0 %v3956_v44  ;;  %v3985_v8 = vunpack.c.h.bf16 %v4085_v60 }
 0x41d   :  { %v3590_v11 = vmul.f32 %v3574_v31, %v5019_v2  ;;  %v3594_v59 = vmul.f32 %v6953_v7, %v6953_v7  ;;  %3882 = vmatpush.msra.mxu1 %v3988_v10  ;;  %v3984_v31 = vunpack.c.l.bf16 %v4085_v60  ;;  %v4077_v10 = vunpack.c.h.bf16 %v4108_v40 }
 0x41e   :  { %3863 = vmatpush.msra.mxu0 %v3953_v33  ;;  %v4076_v33 = vunpack.c.l.bf16 %v4108_v40 }
 0x41f   :  { %v3598_v30 = vsub.f32 %v3590_v11, %v3594_v59  ;;  %3883 = vmatpush.msra.mxu1 %v3985_v8  ;;  %3909 = vmatpush.msra.mxu3 %v4077_v10  ;;  %v4102_v10 = vld [vmem:[#allocation10 + $0xc8] sm:$0xff]  }
 0x420   :  { %v6958_v57 = vpop.eup %4148  ;;  %3864 = vmatpush.msra.mxu0 %v3952_v24 }
 0x421   :  { %v3606_v21 = vmul.f32 %v6958_v57, %v6949_v50  ;;  %v6962_v1 = vadd.f32 1e-05, %v3598_v30  ;;  %v3422_v23 = vpop.f32.mrf.mxu2  ;;  %v3442_v37 = vpop.f32.mrf.mxu3  ;;  %3884 = vmatpush.msra.mxu1 %v3984_v31  ;;  %vm3612_vm12 = vweird.f32 %v6958_v57  ;;  %3910 = vmatpush.msra.mxu3 %v4076_v33 }
 0x422   :  { %v3423_v54 = vadd.f32 %v3422_v23, %v3403_v5  ;;  %vm3613_vm1 = vmor %vm3611_vm15, %vm3612_vm12 }
 0x423   :  { %4150 = vrsqrt.f32 %v6962_v1  ;;  %v3607_v58 = vmul.f32 %v6958_v57, %v3606_v21  ;;  %vm3621_vm13 = vweird.f32 %v6962_v1 }
 0x424   :  { %v6965_v17 = vadd.f32 %v3442_v37, %v3423_v54  ;;  %v3482_v54 = vpop.f32.mrf.mxu1 }
 0x425   :  { %v3608_v61 = vmul.f32 0.5, %v3607_v58 }
 0x426   :  { %v3539_v9 = vsel %vm829_vm0, %v6965_v17, 0.0  ;;  %v3559_v12 = vmul.f32 %v6965_v17, %v6965_v17 }
 0x427   :  { %v3540_v38 = vrot.slane %v3539_v9, 4  ;;  %v3609_v16 = vsub.f32 1.5, %v3608_v61 }
 0x428   :  { %v3575_v52 = vsel %vm829_vm0, %v3559_v12, 0.0 }
 0x429   :  { %v4151_v45 = vpop.eup %4150  ;;  %v3541_v29 = vadd.f32 %v3540_v38, %v3539_v9  ;;  %v3576_v62 = vrot.slane %v3575_v52, 4  ;;  %v3610_v49 = vmul.f32 %v6958_v57, %v3609_v16  ;;  %v4099_v16 = vld [vmem:[#allocation10 + $0xb0] sm:$0xff]  }
 0x42a   :  { %v3616_v63 = vmul.f32 %v4151_v45, %v6962_v1  ;;  %vm3622_vm11 = vweird.f32 %v4151_v45  ;;  %v3462_v1 = vpop.f32.mrf.mxu0  ;;  %v4041_v24 = vunpack.c.h.bf16 %v4099_v16 }
 0x42b   :  { %v3542_v55 = vrot.slane %v3541_v29, 2  ;;  %v3577_v6 = vadd.f32 %v3576_v62, %v3575_v52  ;;  %vm3623_vm14 = vmor %vm3621_vm13, %vm3622_vm11  ;;  %v3614_v32 = vsel %vm3613_vm1, %v6958_v57, %v3610_v49  ;;  %v3483_v37 = vadd.f32 %v3482_v54, %v3462_v1 }
 0x42c   :  { %v3617_v43 = vmul.f32 %v4151_v45, %v3616_v63 }
 0x42d   :  { %v3543_v15 = vadd.f32 %v3542_v55, %v3541_v29  ;;  %v3578_v35 = vrot.slane %v3577_v6, 2 }
 0x42e   :  { %v3618_v41 = vmul.f32 0.5, %v3617_v43 }
 0x42f   :  { %v3544_v59 = vrot.slane %v3543_v15, 1  ;;  %v3579_v20 = vadd.f32 %v3578_v35, %v3577_v6 }
 0x430   :  { %v3619_v28 = vsub.f32 1.5, %v3618_v41  ;;  %v4107_v41 = vld [vmem:[#allocation10 + $0xf0] sm:$0xff]  }
 0x431   :  { %v3545_v13 = vadd.f32 %v3544_v59, %v3543_v15  ;;  %v3580_v5 = vrot.slane %v3579_v20, 1  ;;  %v4073_v31 = vunpack.c.h.bf16 %v4107_v41 }
 0x432   :  { %v3620_v47 = vmul.f32 %v4151_v45, %v3619_v28 }
 0x433   :  { %v6981_v50 = vmul.f32 %v3545_v13, %v5019_v2  ;;  %v3581_v14 = vadd.f32 %v3580_v5, %v3579_v20  ;;  %3911 = vmatpush.msra.mxu3 %v4073_v31 }
 0x434   :  { %v3624_v56 = vsel %vm3623_vm14, %v4151_v45, %v3620_v47 }
 0x435   :  { %v3649_v11 = vrot.slane %v3624_v56, 4  ;;  %v3591_v53 = vmul.f32 %v3581_v14, %v5019_v2  ;;  %v3595_v27 = vmul.f32 %v6981_v50, %v6981_v50  ;;  %v4072_v56 = vunpack.c.l.bf16 %v4107_v41  ;;  %v4097_v14 = vld [vmem:[#allocation10 + $0xa0] sm:$0xff]  }
 0x437   :  { %v3651_v30 = vsel %vm963_vm8, %v3614_v32, %v3649_v11  ;;  %v3599_v52 = vsub.f32 %v3591_v53, %v3595_v27  ;;  %3912 = vmatpush.msra.mxu3 %v4072_v56  ;;  %v4032_v27 = vunpack.c.l.bf16 %v4097_v14 }
 0x438   :  { %v3653_v18 = vrot.slane %v3651_v30, 5  ;;  %v4098_v30 = vld [vmem:[#allocation10 + $0xa8] sm:$0xff]  }
 0x439   :  { %v6998_v47 = vadd.f32 1e-05, %v3599_v52  ;;  %v4037_v13 = vunpack.c.h.bf16 %v4098_v30 }
 0x43a   :  { %v3657_v46 = vmul.f32 %v4164_v48, %v3653_v18  ;;  %v4106_v18 = vld [vmem:[#allocation10 + $0xe8] sm:$0xff]  }
 0x43b   :  { %v4069_v5 = vunpack.c.h.bf16 %v4106_v18  ;;  %4152 = vrsqrt.f32 %v6998_v47  ;;  %vm3631_vm5 = vweird.f32 %v6998_v47 }
 0x43c   :  { %v3661_v21 = vperm.slane %v3657_v46, 3  ;;  %v3662_v23 = vperm.slane %v3657_v46, 7 }
 0x43d   :  { %3913 = vmatpush.msra.mxu3 %v4069_v5  ;;  %v4166_v5 = vld [vmem:[#allocation7 + $0x8] sm:$0xff] }
 0x43e   :  { %v3670_v39 = vmul.f32 %v3662_v23, %v6953_v7  ;;  %v3669_v57 = vmul.f32 %v3661_v21, %v6944_v19  ;;  %v3688_v9 = vperm.slane %v3662_v23, 3  ;;  %v3687_v25 = vperm.slane %v3661_v21, 3  ;;  %v4165_v7 = vld [vmem:[#allocation8] sm:$0xff]  ;;  %v4100_v19 = vld [vmem:[#allocation10 + $0xb8] sm:$0xff]  }
 0x43f   :  { %v4045_v62 = vunpack.c.h.bf16 %v4100_v19  ;;  %v4044_v43 = vunpack.c.l.bf16 %v4100_v19  ;;  %v4036_v21 = vunpack.c.l.bf16 %v4098_v30  ;;  %v4068_v23 = vunpack.c.l.bf16 %v4106_v18 }
 0x440   :  { %v3677_v3 = vrot.slane %v3670_v39, 4  ;;  %v3692_v51 = vmul.f32 %v3688_v9, %v6936_v36  ;;  %v3691_v60 = vmul.f32 %v3687_v25, %v6929_v34  ;;  %v4040_v34 = vunpack.c.l.bf16 %v4099_v16  ;;  %v4105_v39 = vld [vmem:[#allocation10 + $0xe0] sm:$0xff]  }
 0x441   :  { %v3502_v26 = vpop.f32.mrf.mxu2  ;;  %v3522_v4 = vpop.f32.mrf.mxu3  ;;  %3889 = vmatpush.msra.mxu2 %v4045_v62  ;;  %3914 = vmatpush.msra.mxu3 %v4068_v23 }
 0x442   :  { %v3679_v58 = vsel %vm963_vm8, %v3669_v57, %v3677_v3  ;;  %v3503_v12 = vadd.f32 %v3502_v26, %v3483_v37  ;;  %v4033_v37 = vunpack.c.h.bf16 %v4097_v14  ;;  %v4065_v57 = vunpack.c.h.bf16 %v4105_v39 }
 0x443   :  { %v3681_v22 = vrot.slane %v3679_v58, 5  ;;  %3890 = vmatpush.msra.mxu2 %v4044_v43  ;;  %v4064_v26 = vunpack.c.l.bf16 %v4105_v39  ;;  %v4053_v43 = vunpack.c.h.bf16 %v4102_v10  ;;  %v4167_v39 = vld [vmem:[#allocation8 + $0x8] sm:$0xff] }
 0x444   :  { %v6989_v38 = vadd.f32 %v3522_v4, %v3503_v12  ;;  %v4096_v12 = vld [vmem:[#allocation10 + $0x98] sm:$0xff]   ;;  %3915 = vmatpush.msra.mxu3 %v4065_v57 }
 0x445   :  { %v3685_v42 = vsub.f32 %v4165_v7, %v3681_v22  ;;  %3891 = vmatpush.msra.mxu2 %v4041_v24  ;;  %v4104_v22 = vld [vmem:[#allocation10 + $0xd8] sm:$0xff]   ;;  %v4029_v4 = vunpack.c.h.bf16 %v4096_v12  ;;  %v7007_v7 = vpop.eup %4152  ;;  %v4028_v52 = vunpack.c.l.bf16 %v4096_v12 }
 0x446   :  { %v3546_v45 = vsel %vm829_vm0, %v6989_v38, 0.0  ;;  %v3560_v29 = vmul.f32 %v6989_v38, %v6989_v38  ;;  %v4061_v25 = vunpack.c.h.bf16 %v4104_v22  ;;  %3916 = vmatpush.msra.mxu3 %v4064_v26  ;;  %v4060_v19 = vunpack.c.l.bf16 %v4104_v22 }
 0x447   :  { %v3698_v61 = vperm.slane %v3685_v42, 7  ;;  %v3547_v63 = vrot.slane %v3546_v45, 4  ;;  %v3697_v44 = vperm.slane %v3685_v42, 3  ;;  %3892 = vmatpush.msra.mxu2 %v4040_v34  ;;  %vm3632_vm2 = vweird.f32 %v7007_v7 }
 0x448   :  { %v3582_v0 = vsel %vm829_vm0, %v3560_v29, 0.0  ;;  %3917 = vmatpush.msra.mxu3 %v4061_v25  ;;  %vm3633_vm6 = vmor %vm3631_vm5, %vm3632_vm2 }
 0x449   :  { %v3706_v8 = vperm.slane %v3698_v61, 3  ;;  %v3548_v36 = vadd.f32 %v3547_v63, %v3546_v45  ;;  %v3583_v55 = vrot.slane %v3582_v0, 4  ;;  %v3705_v6 = vperm.slane %v3697_v44, 3  ;;  %3893 = vmatpush.msra.mxu2 %v4037_v13  ;;  %v4103_v45 = vld [vmem:[#allocation10 + $0xd0] sm:$0xff]   ;;  %v4094_v44 = vld [vmem:[#allocation10 + $0x88] sm:$0xff]  }
 0x44a   :  { %v4057_v62 = vunpack.c.h.bf16 %v4103_v45  ;;  %3918 = vmatpush.msra.mxu3 %v4060_v19  ;;  %v4056_v63 = vunpack.c.l.bf16 %v4103_v45  ;;  %v4020_v33 = vunpack.c.l.bf16 %v4094_v44 }
 0x44b   :  { %v3710_v28 = vadd.f32 %v3706_v8, %v3692_v51  ;;  %v3549_v15 = vrot.slane %v3548_v36, 2  ;;  %v3584_v35 = vadd.f32 %v3583_v55, %v3582_v0  ;;  %v3709_v49 = vadd.f32 %v3705_v6, %v3691_v60  ;;  %3894 = vmatpush.msra.mxu2 %v4036_v21  ;;  %v4095_v51 = vld [vmem:[#allocation10 + $0x90] sm:$0xff]   ;;  %v4093_v55 = vld [vmem:[#allocation10 + $0x80] sm:$0xff]  }
 0x44c   :  { %v4025_v29 = vunpack.c.h.bf16 %v4095_v51  ;;  %v4024_v61 = vunpack.c.l.bf16 %v4095_v51  ;;  %3919 = vmatpush.msra.mxu3 %v4057_v62  ;;  %v4021_v60 = vunpack.c.h.bf16 %v4094_v44  ;;  %v4052_v8 = vunpack.c.l.bf16 %v4102_v10  ;;  %v4101_v6 = vld [vmem:[#allocation10 + $0xc0] sm:$0xff]  }
 0x44d   :  { %v3550_v11 = vadd.f32 %v3549_v15, %v3548_v36  ;;  %v3585_v59 = vrot.slane %v3584_v35, 2  ;;  %v3713_v20 = vmax.f32 %v3709_v49, 0.0  ;;  %v3714_v32 = vmax.f32 %v3710_v28, 0.0  ;;  %3895 = vmatpush.msra.mxu2 %v4033_v37 }
 0x44e   :  { %3920 = vmatpush.msra.mxu3 %v4056_v63  ;;  %v4017_v24 = vunpack.c.h.bf16 %v4093_v55  ;;  %v4049_v31 = vunpack.c.h.bf16 %v4101_v6  ;;  %v4016_v28 = vunpack.c.l.bf16 %v4093_v55 }
 0x44f   :  { %v3551_v48 = vrot.slane %v3550_v11, 1  ;;  %v3586_v46 = vadd.f32 %v3585_v59, %v3584_v35  ;;  %3865 = vmatmul.f32.vlgmr.msra.gmra.mxu0 %v3713_v20  ;;  %3885 = vmatmul.f32.vlgmr.msra.gmra.mxu1 %v3714_v32  ;;  %v4048_v35 = vunpack.c.l.bf16 %v4101_v6 }
 0x450   :  { %3896 = vmatpush.msra.mxu2 %v4032_v27  ;;  %3921 = vmatpush.msra.mxu3 %v4053_v43 }
 0x451   :  { %v3552_v1 = vadd.f32 %v3551_v48, %v3550_v11  ;;  %v3587_v54 = vrot.slane %v3586_v46, 1 }
 0x452   :  { %3897 = vmatpush.msra.mxu2 %v4029_v4  ;;  %3922 = vmatpush.msra.mxu3 %v4052_v8 }
 0x453   :  { %v7002_v3 = vmul.f32 %v3552_v1, %v5019_v2  ;;  %v3588_v53 = vadd.f32 %v3587_v54, %v3586_v46 }
 0x454   :  { %3898 = vmatpush.msra.mxu2 %v4028_v52  ;;  %3923 = vmatpush.msra.mxu3 %v4049_v31 }
 0x455   :  { %v3592_v58 = vmul.f32 %v3588_v53, %v5019_v2  ;;  %v3596_v9 = vmul.f32 %v7002_v3, %v7002_v3  ;;  %v3626_v2 = vmul.f32 %v7007_v7, %v6998_v47 }
 0x456   :  { %3899 = vmatpush.msra.mxu2 %v4025_v29  ;;  %3924 = vmatpush.msra.mxu3 %v4048_v35 }
 0x457   :  { %v3600_v42 = vsub.f32 %v3592_v58, %v3596_v9  ;;  %v3627_v0 = vmul.f32 %v7007_v7, %v3626_v2 }
 0x458   :  { %3900 = vmatpush.msra.mxu2 %v4024_v61 }
 0x459   :  { %v3604_v40 = vadd.f32 1e-05, %v3600_v42  ;;  %v3628_v16 = vmul.f32 0.5, %v3627_v0 }
 0x45a   :  { %3901 = vmatpush.msra.mxu2 %v4021_v60 }
 0x45b   :  { %4154 = vrsqrt.f32 %v3604_v40  ;;  %v3629_v49 = vsub.f32 1.5, %v3628_v16  ;;  %vm3641_vm3 = vweird.f32 %v3604_v40 }
 0x45c   :  { %3902 = vmatpush.msra.mxu2 %v4020_v33 }
 0x45d   :  { %v3630_v11 = vmul.f32 %v7007_v7, %v3629_v49 }
 0x45e   :  { %3903 = vmatpush.msra.mxu2 %v4017_v24 }
 0x45f   :  { %v3634_v30 = vsel %vm3633_vm6, %v7007_v7, %v3630_v11  ;;  %v4121_v7 = vld [vmem:[#allocation11] ss:$0 sm:$0xff] }
 0x460   :  { %3904 = vmatpush.msra.mxu2 %v4016_v28 }
 0x461   :  { %v4155_v36 = vpop.eup %4154 }
 0x462   :  { %v3636_v41 = vmul.f32 %v4155_v36, %v3604_v40  ;;  %vm3642_vm0 = vweird.f32 %v4155_v36 }
 0x463   :  { %vm3643_vm4 = vmor %vm3641_vm3, %vm3642_vm0 }
 0x464   :  { %v3637_v15 = vmul.f32 %v4155_v36, %v3636_v41 }
 0x466   :  { %v3638_v34 = vmul.f32 0.5, %v3637_v15 }
 0x468   :  { %v3639_v56 = vsub.f32 1.5, %v3638_v34 }
 0x46a   :  { %v3640_v59 = vmul.f32 %v4155_v36, %v3639_v56 }
 0x46c   :  { %v3644_v20 = vsel %vm3643_vm4, %v4155_v36, %v3640_v59 }
 0x46d   :  { %v3650_v32 = vrot.slane %v3644_v20, 4 }
 0x46f   :  { %v3652_v18 = vsel %vm963_vm8, %v3634_v30, %v3650_v32 }
 0x470   :  { %v3654_v13 = vrot.slane %v3652_v18, 5 }
 0x472   :  { %v3658_v48 = vmul.f32 %v4166_v5, %v3654_v13 }
 0x474   :  { %v3663_v46 = vperm.slane %v3658_v48, 3  ;;  %v3664_v21 = vperm.slane %v3658_v48, 7 }
 0x476   :  { %v3672_v23 = vmul.f32 %v3664_v21, %v7002_v3  ;;  %v3671_v1 = vmul.f32 %v3663_v46, %v6981_v50  ;;  %v3690_v57 = vperm.slane %v3664_v21, 3  ;;  %v3689_v53 = vperm.slane %v3663_v46, 3 }
 0x478   :  { %v3678_v54 = vrot.slane %v3672_v23, 4  ;;  %v3694_v58 = vmul.f32 %v3690_v57, %v6989_v38  ;;  %v3693_v12 = vmul.f32 %v3689_v53, %v6965_v17 }
 0x47a   :  { %v3680_v14 = vsel %vm963_vm8, %v3671_v1, %v3678_v54 }
 0x47b   :  { %v3682_v47 = vrot.slane %v3680_v14, 5 }
 0x47d   :  { %v3686_v37 = vsub.f32 %v4167_v39, %v3682_v47 }
 0x47f   :  { %v3700_v27 = vperm.slane %v3686_v37, 7  ;;  %v3699_v26 = vperm.slane %v3686_v37, 3 }
 0x481   :  { %v3708_v9 = vperm.slane %v3700_v27, 3  ;;  %v3707_v22 = vperm.slane %v3699_v26, 3 }
 0x483   :  { %v3712_v4 = vadd.f32 %v3708_v9, %v3694_v58  ;;  %v3711_v3 = vadd.f32 %v3707_v22, %v3693_v12 }
 0x485   :  { %v3715_v25 = vmax.f32 %v3711_v3, 0.0  ;;  %v3716_v50 = vmax.f32 %v3712_v4, 0.0 }
 0x487   :  { %3905 = vmatmul.f32.vlgmr.msra.gmra.mxu2 %v3715_v25  ;;  %3925 = vmatmul.f32.vlgmr.msra.gmra.mxu3 %v3716_v50 }
 0x4cc   :  { %v3866_v42 = vpop.f32.mrf.mxu0  ;;  %v3886_v19 = vpop.f32.mrf.mxu1 }
 0x4cd   :  { %v3867_v52 = vadd.f32 %v4121_v7, %v3866_v42 }
 0x4cf   :  { %v3887_v40 = vadd.f32 %v3886_v19, %v3867_v52 }
 0x50a   :  { %v3906_v51 = vpop.f32.mrf.mxu2  ;;  %v3926_v38 = vpop.f32.mrf.mxu3 }
 0x50b   :  { %v3907_v17 = vadd.f32 %v3906_v51, %v3887_v40 }
 0x50d   :  { %v3927_v45 = vadd.f32 %v3926_v38, %v3907_v17 }
 0x50f   :  { %3929 = vst [vmem:[#allocation13] sm:$0x3] %v3927_v45 }
 0x510   :  { %3940 = dma.vmem_to_hbm [thread:$0]  %s3936_s5, 32, %s3938_s29, [#allocation4]  }
 0x511   :  { %4344 = dma.done.wait [#allocation4], 32  }
 0x512   :  { %4345 = vsyncadd [#allocation4], 4294967264 }
 0x513   :  { %3945 = vsyncpa [#allocation3], 1 }
 0x514   :  { %3946 = vsyncpa [#allocation6], 1 }
 0x515   :  { %3947 = vsyncpa [#allocation9], 1 }
 0x516   :  { %3948 = vsyncpa [#allocation12], 1 }
 0x517   :  { %3949 = vsyncpa [#allocation4], 1 }

</bundles_post_ra>
